<compile_context>
chip_gen: v7x
topology: tpu7x:2x2x1
jax: 0.10.0
libtpu: 0.0.40
codegen_flags: <defaults>
</compile_context>

<pallas_src>
import functools

import jax
import jax.numpy as jnp
from jax.experimental import pallas as pl
from jax.experimental.pallas import tpu as pltpu


def _gem_voxel_partial_kernel(p_ref,               # scalar-prefetch: GeM norm p, shape (1,)
                              x_ref, idx_ref,      # [TN, C] f32, [1, TN] i32 (lane-major)
                              sum_ref,             # [B_pad, C] output-resident accumulator
                              *, eps, batch_pad, static_p, reduce_axis):
    t = pl.program_id(reduce_axis)                 # point-tile reduction axis (last)

    @pl.when(t == 0)
    def _():
        sum_ref[...] = jnp.zeros_like(sum_ref)

    x = x_ref[...].astype(jnp.float32)             # [TN, C]
    xc = jnp.maximum(x, eps)                       # clamp(min=eps)

    if static_p is not None:
        # Compile-time integer p: repeated VPU multiply, no EUP transcendentals.
        xp = xc
        for _ in range(int(static_p) - 1):
            xp = xp * xc
    else:
        # Runtime p -> exp/log on the EUP. Fine while HBM-bound (v5e/v6e); on v7x prefer
        # static_p since the faster HBM can make the EUP slot the binding unit.
        xp = jnp.power(xc, p_ref[0])

    tn = x.shape[0]
    b_ids = jax.lax.broadcasted_iota(jnp.int32, (batch_pad, tn), 0)
    onehot = (idx_ref[...] == b_ids).astype(jnp.float32)          # [B_pad, TN]

    # Segmented sum of x^p on the MXU (HIGHEST precision: f32 accumulation, hidden under
    # the HBM stream at these batch sizes).
    sum_ref[...] += jnp.dot(onehot, xp,
                            preferred_element_type=jnp.float32,
                            precision=jax.lax.Precision.HIGHEST)   # [B_pad, C]


def gem_voxel_forward(x, batch_indices, p, w_t, bias, *, batch_size,
                      eps=1e-6, tile_n=1024, num_splits=1, static_p=None,
                      norm_eps=1e-12):
    """Pallas forward for GeMVoxel with a dense head and L2 normalization.

    x:             [N', C] float32
    batch_indices: [N']    int, values in [0, batch_size)
    p:             (1,)    float32 GeM norm parameter
    w_t:           [C, D_out] float32 (PyTorch Linear weight, pre-transposed)
    bias:          [D_out] float32
    num_splits:    1 on single-TC chips (v5e/v6e); 2 on v7x to engage both TensorCores.
    static_p:      optional Python int asserting p == static_p, enabling the
                   no-transcendental x*x*... pow path inside the kernel.
    returns:       [batch_size, D_out] float32
    """
    n_pts, c = x.shape
    b_pad = ((batch_size + 7) // 8) * 8            # full sublanes for accumulator/output

    batch_indices = batch_indices.astype(jnp.int32)

    # Per-batch point counts depend only on batch_indices -> compute once outside the
    # kernel (scatter-add of ones), on the un-padded indices.
    cnts = jnp.zeros((batch_size,), jnp.float32).at[batch_indices].add(1.0)
    cnts = cnts.reshape(batch_size, 1)

    # Pad N' up to a multiple of tile_n * num_splits. Padded rows get batch index -1 so
    # their one-hot row is all-zero: they contribute nothing to the segmented sums.
    chunk = tile_n * num_splits
    n_padded = ((n_pts + chunk - 1) // chunk) * chunk
    pad = n_padded - n_pts
    if pad:
        x = jnp.concatenate([x, jnp.zeros((pad, c), x.dtype)], axis=0)
        batch_indices = jnp.concatenate(
            [batch_indices, jnp.full((pad,), -1, jnp.int32)], axis=0)
    idx_row = batch_indices.reshape(1, n_padded)   # lane-major index layout

    num_tiles = n_padded // tile_n
    tiles_per_split = n_padded // chunk

    if num_splits == 1:
        # Single-TensorCore layout (v5e/v6e default): one "arbitrary" reduction axis.
        grid = (num_tiles,)
        in_specs = [
            pl.BlockSpec((tile_n, c), lambda t, p_s: (t, 0)),          # x tile
            pl.BlockSpec((1, tile_n), lambda t, p_s: (0, t)),          # idx tile
        ]
        out_specs = pl.BlockSpec((b_pad, c), lambda t, p_s: (0, 0))    # resident sums
        out_shape = jax.ShapeDtypeStruct((b_pad, c), jnp.float32)
        dim_semantics = ("arbitrary",)
        reduce_axis = 0
    else:
        # v7x layout: leading split axis is "parallel" (one split per TensorCore).
        grid = (num_splits, tiles_per_split)
        in_specs = [
            pl.BlockSpec((tile_n, c),
                         lambda s, t, p_s: (s * tiles_per_split + t, 0)),
            pl.BlockSpec((1, tile_n),
                         lambda s, t, p_s: (0, s * tiles_per_split + t)),
        ]
        out_specs = pl.BlockSpec((None, b_pad, c), lambda s, t, p_s: (s, 0, 0))
        out_shape = jax.ShapeDtypeStruct((num_splits, b_pad, c), jnp.float32)
        dim_semantics = ("parallel", "arbitrary")
        reduce_axis = 1

    kernel = functools.partial(_gem_voxel_partial_kernel, eps=eps,
                               batch_pad=b_pad, static_p=static_p,
                               reduce_axis=reduce_axis)

    grid_spec = pltpu.PrefetchScalarGridSpec(
        num_scalar_prefetch=1,
        grid=grid,
        in_specs=in_specs,
        out_specs=out_specs,
    )

    sums = pl.pallas_call(
        kernel,
        grid_spec=grid_spec,
        out_shape=out_shape,
        compiler_params=pltpu.CompilerParams(dimension_semantics=dim_semantics),
    )(p.astype(jnp.float32), x, idx_row)

    # One-shot epilogue on [B, C] in plain JAX: combine per-split partials (if any),
    # GeM mean and root, dense head, L2 normalize.
    if num_splits > 1:
        sums = jnp.sum(sums, axis=0)                                # [B_pad, C]
    sums = sums[:batch_size]                                        # [B, C]
    mean = sums / jnp.maximum(cnts, 1.0)                            # guard empty batches
    inv_p = 1.0 / p.astype(jnp.float32)[0]
    pooled = jnp.power(mean, inv_p)                                 # [B, C]
    dense = pooled @ w_t + bias[None, :]                            # Linear head
    nrm = jnp.sqrt(jnp.sum(dense * dense, axis=1, keepdims=True))
    nrm = jnp.maximum(nrm, norm_eps)                                # F.normalize eps
    return dense / nrm


def _reference(x, batch_indices, p, w_t, bias, batch_size, eps=1e-6):
    """Pure-JAX reference mirroring the PyTorch forward."""
    descs = []
    for i in range(batch_size):
        xi = x[batch_indices == i]
        g = jnp.power(jnp.mean(jnp.power(jnp.maximum(xi, eps), p[0]), axis=0,
                               keepdims=True), 1.0 / p[0])
        descs.append(g)
    g = jnp.concatenate(descs, axis=0)
    dense = g @ w_t + bias[None, :]
    nrm = jnp.maximum(jnp.linalg.norm(dense, axis=1, keepdims=True), 1e-12)
    return dense / nrm


if __name__ == "__main__":
    # Deterministic setup: N'=2000 points (exercises padding), C=128, B=2, head 128->64.
    N_PTS, C, B, D_OUT = 2000, 128, 2, 64
    key = jax.random.PRNGKey(0)
    kx, kw, kb, ki = jax.random.split(key, 4)

    x = jax.random.uniform(kx, (N_PTS, C), dtype=jnp.float32)       # non-negative features
    batch_indices = jax.random.randint(ki, (N_PTS,), 0, B, dtype=jnp.int32)
    # Guarantee every batch element has at least one point.
    batch_indices = batch_indices.at[0].set(0).at[1].set(1)

    # GeMVoxel.__init__(p=3, eps=1e-6, normalize=True, dense_output_dim=(C, D_OUT))
    p_param = jnp.ones((1,), jnp.float32) * 3.0
    bound = 1.0 / (float(C) ** 0.5)                                 # nn.Linear default init
    w = jax.random.uniform(kw, (D_OUT, C), jnp.float32, -bound, bound)
    bias = jax.random.uniform(kb, (D_OUT,), jnp.float32, -bound, bound)
    w_t = w.T                                                       # pre-transpose for x @ W^T

    ref = _reference(x, batch_indices, p_param, w_t, bias, B)

    # Default path (v5e/v6e): single reduction axis, static integer p (no EUP work).
    out_fast = gem_voxel_forward(x, batch_indices, p_param, w_t, bias,
                                 batch_size=B, static_p=3)
    out_fast = jax.block_until_ready(out_fast)
    assert out_fast.shape == (B, D_OUT)
    assert jnp.allclose(out_fast, ref, atol=1e-4, rtol=1e-4), "static-p mismatch vs reference"

    # General path: runtime p via scalar prefetch (jnp.power inside the kernel).
    out_rt = gem_voxel_forward(x, batch_indices, p_param, w_t, bias,
                               batch_size=B, static_p=None)
    out_rt = jax.block_until_ready(out_rt)
    assert jnp.allclose(out_rt, ref, atol=1e-4, rtol=1e-4), "runtime-p mismatch vs reference"

    # v7x configuration: 2 splits (one per TensorCore), leading "parallel" axis.
    out_v7x = gem_voxel_forward(x, batch_indices, p_param, w_t, bias,
                                batch_size=B, static_p=3, num_splits=2, tile_n=1024)
    out_v7x = jax.block_until_ready(out_v7x)
    assert jnp.allclose(out_v7x, ref, atol=1e-4, rtol=1e-4), "num_splits=2 mismatch vs reference"

    print("KERNEL_OK")
</pallas_src>

<mosaic_0001>
module attributes {stable_mosaic.version = 11 : i64} {
  func.func @_gem_voxel_partial_kernel(%arg0: i32, %arg1: memref<1xf32, #tpu.memory_space<smem>>, %arg2: memref<1024x128xf32, #tpu.memory_space<vmem>>, %arg3: memref<1x1024xi32, #tpu.memory_space<vmem>>, %arg4: memref<8x128xf32, #tpu.memory_space<vmem>>) attributes {dimension_semantics = [#tpu.dimension_semantics<arbitrary>], iteration_bounds = array<i64: 2>, scalar_prefetch = 1 : i64, scratch_operands = 0 : i64, tpu.core_type = #tpu.core_type<tc>, window_params = [{transform_indices = @transform_0, window_bounds = array<i64: 1024, 128>}, {transform_indices = @transform_1, window_bounds = array<i64: 1, 1024>}, {pipeline_mode = #tpu.pipeline_mode<synchronous>, transform_indices = @transform_2, window_bounds = array<i64: 8, 128>}]} {
    %c0_i32 = arith.constant 0 : i32
    %0 = arith.cmpi eq, %arg0, %c0_i32 : i32
    %1 = arith.extui %0 : i1 to i32
    %c0_i32_0 = arith.constant 0 : i32
    %2 = arith.cmpi ne, %1, %c0_i32_0 : i32
    scf.if %2 {
      %cst_9 = arith.constant 0.000000e+00 : f32
      %18 = vector.broadcast %cst_9 : f32 to vector<8x128xf32>
      %c0_10 = arith.constant 0 : index
      %c0_11 = arith.constant 0 : index
      %19 = vector.load %arg4[%c0_10, %c0_11] : memref<8x128xf32, #tpu.memory_space<vmem>>, vector<8x128xf32>
      tpu.vector_store %arg4[%c0_10, %c0_11], %18 {strides = array<i32>} : memref<8x128xf32, #tpu.memory_space<vmem>>, vector<8x128xf32>,
    } else {
    }
    %c0 = arith.constant 0 : index
    %c0_1 = arith.constant 0 : index
    %3 = vector.load %arg2[%c0, %c0_1] : memref<1024x128xf32, #tpu.memory_space<vmem>>, vector<1024x128xf32>
    %cst = arith.constant 9.99999997E-7 : f32
    %4 = vector.broadcast %cst : f32 to vector<1024x128xf32>
    %5 = arith.maximumf %3, %4 : vector<1024x128xf32>
    %6 = arith.mulf %5, %5 : vector<1024x128xf32>
    %7 = arith.mulf %6, %5 : vector<1024x128xf32>
    %8 = tpu.iota {dimensions = array<i32: 0>} : vector<8x1024xi32>
    %c0_2 = arith.constant 0 : index
    %c0_3 = arith.constant 0 : index
    %9 = vector.load %arg3[%c0_2, %c0_3] : memref<1x1024xi32, #tpu.memory_space<vmem>>, vector<1x1024xi32>
    %10 = vector.broadcast %9 : vector<1x1024xi32> to vector<8x1024xi32>
    %11 = arith.cmpi eq, %10, %8 : vector<8x1024xi32>
    %12 = arith.extui %11 : vector<8x1024xi1> to vector<8x1024xi32>
    %13 = arith.sitofp %12 : vector<8x1024xi32> to vector<8x1024xf32>
    %c0_4 = arith.constant 0 : index
    %c0_5 = arith.constant 0 : index
    %14 = vector.load %arg4[%c0_4, %c0_5] : memref<8x128xf32, #tpu.memory_space<vmem>>, vector<8x128xf32>
    %cst_6 = arith.constant dense<0.000000e+00> : vector<8x128xf32>
    %15 = tpu.matmul %13, %7, %cst_6 {dimension_numbers = #tpu.dot_dimension_numbers<[1], [0], [0], [1], [0, 0, 1, 1], [], []>, precision = #tpu.contract_precision<fp32>} : vector<8x1024xf32>, vector<1024x128xf32>, vector<8x128xf32> -> vector<8x128xf32>
    %16 = arith.addf %14, %15 : vector<8x128xf32>
    %c0_7 = arith.constant 0 : index
    %c0_8 = arith.constant 0 : index
    %17 = vector.load %arg4[%c0_7, %c0_8] : memref<8x128xf32, #tpu.memory_space<vmem>>, vector<8x128xf32>
    tpu.vector_store %arg4[%c0_7, %c0_8], %16 {strides = array<i32>} : memref<8x128xf32, #tpu.memory_space<vmem>>, vector<8x128xf32>,
    return
  }
  func.func @transform_0(%arg0: i32, %arg1: memref<1xf32, #tpu.memory_space<smem>>) -> (i32, i32) {
    %c0_i32 = arith.constant 0 : i32
    %c0_i32_0 = arith.constant 0 : i32
    return %arg0, %c0_i32 : i32, i32
  }
  func.func @transform_1(%arg0: i32, %arg1: memref<1xf32, #tpu.memory_space<smem>>) -> (i32, i32) {
    %c0_i32 = arith.constant 0 : i32
    %c0_i32_0 = arith.constant 0 : i32
    return %c0_i32, %arg0 : i32, i32
  }
  func.func @transform_2(%arg0: i32, %arg1: memref<1xf32, #tpu.memory_space<smem>>) -> (i32, i32) {
    %c0_i32 = arith.constant 0 : i32
    %c0_i32_0 = arith.constant 0 : i32
    %c0_i32_1 = arith.constant 0 : i32
    return %c0_i32, %c0_i32_0 : i32, i32
  }
}

</mosaic_0001>

<bundles_post_ra>
// kernel: tpu_custom_call.1
= control target key start
LH: loop header
LB: loop body
LE: loop exit
PB: predicated region body
PF: predicated region fallthrough
CT: control target
= control target key end

     0   :  { %9 = vsyncpa [#allocation5], 0  ;;  %s8869_s0 = inlined_call_operand.<no memory space> [shape: f32[1], index: 0, kind: input, shape index: {}]   ;;  %s8870_s1 = inlined_call_operand.hbm [shape: f32[2048,128], index: 1, kind: input, shape index: {}]   ;;  %s8871_s2 = inlined_call_operand.hbm [shape: s32[1,2048], index: 2, kind: input, shape index: {}]   ;;  %s8872_s3 = inlined_call_operand.hbm [shape: f32[8,128], index: 3, kind: output, shape index: {}]  }
   0x1   :  { %11 = vsyncpa [#allocation5 + $0x1], 0 }
   0x2   :  { %12 = vsyncpa [#allocation8], 0 }
   0x3   :  { %14 = vsyncpa [#allocation8 + $0x1], 0 }
   0x4   :  { %15 = vsyncpa [#allocation6], 0  ;;  %s6174_s12 = smov 0   ;;  %s6176_s13 = smov 0  }
   0x5   :  { %s6178_s14 = smov 0   ;;  %s6180_s0 = smov 0  }
   0x6 LB: > { %s6193_s15 = sadd.s32 4294967295, %s6144_s0   ;;  %s6196_s16 = sadd.s32 1, %s6144_s0   ;;  %s6144_s0 = sphi %s6180_s0, %s9732_s0   ;;  %s6140_s14 = sphi %s6178_s14, %s9731_s14   ;;  %s6136_s13 = sphi %s6176_s13, %s9730_s13   ;;  %s6132_s12 = sphi %s6174_s12, %s9729_s12  }
   0x7   : > { %s25_s17 = ssub.s32 %s6144_s0, %s6196_s16  ;;  %s28_s18 = sadd.s32 1, %s6140_s14 }
   0x8   : > { %p26_p0 = scmp.eq.s32.totalorder %s25_s17, 0  ;;  %p35_p1 = scmp.ne.s32.totalorder %s6140_s14, %s6136_s13 }
   0x9   : > { %p36_p2 = scmp.eq.s32.totalorder %s6144_s0, 0  ;;  %p41_p3 = scmp.ne.s32.totalorder %s6136_s13, %s6132_s12 }
   0xa   : > { %s6206_s19 = scalar_select %p26_p0, %s6140_s14, %s28_s18  }
   0xb   : > { %p37_p4 = por %p36_p2, %p35_p1  ;;  %p42_p5 = scmp.eq.s32.totalorder %s6193_s15, 0 }
   0xc   : > { %p5973_p6 = scmp.lt.s32.totalorder %s6144_s0, 2  ;;  %s6215_s21 = sand.u32 1, %s6140_s14  }
   0xd   : > { %p6210_p7 = por %p42_p5, %p41_p3  ;;  %s4302_s22 = sshll.u32 %s6215_s21, 10 }
   0xe   : > { %s4348_s23 = sshll.u32 %s6144_s0, 14  ;;  %s116_s27 = scalar_lea.vmem [#allocation4], %s4302_s22 }
   0xf   : > { %s9130_s20 = scalar_select %p6210_p7, 1, 0 }
  0x10   : > { %s6222_s26 = scalar_lea.hbm %s8870_s1, %s4348_s23  ;;  %s123_s28 = sshll.u32 %s116_s27, 4  ;;  %s6224_s28 = int_to_ptr.vmem [resolvable:$true] %s123_s28 }
  0x11   : > { %p6226_p8 = pnand %p5973_p6, %p37_p4  ;;  %s113_s30 = scalar_lea.sflag [#allocation5], %s6215_s21 }
  0x12   : > { %s6016_s4 = scalar_lea.hbm %s6222_s26, 16384  ;;  %s6021_s7 = scalar_lea.hbm %s8870_s1, 32768 }
  0x13   : > { %p6017_p10 = scmp.ne.s32.totalorder %s6222_s26, %s6016_s4  ;;  %p6018_p11 = pneg %p6226_p8 }
  0x14   : > { %p6022_p0 = scmp.lt.u32.totalorder %s6222_s26, %s8870_s1  ;;  %p6023_p1 = scmp.lt.u32.totalorder %s6021_s7, %s6016_s4 }
  0x15   : > { %p6019_p12 = pnand %p6018_p11, %p6017_p10  ;;  %p6025_p3 = scmp.lt.u32.totalorder %s6016_s4, %s6222_s26 }
  0x16   : > { %p6024_p2 = por %p6023_p1, %p6022_p0 }
  0x17   : > { %p6020_p13 = pneg %p6019_p12 }
  0x18   : > { %p6026_p4 = por %p6025_p3, %p6024_p2 }
  0x1a   : > { %p6027_p5 = pnand %p6026_p4, %p6020_p13 }
  0x1c   : > { %6030 = shalt.err (!%p6027_p5)
}
  0x1d   : > { %s6031_s10 = scalar_lea.vmem %s6224_s28, 16384  ;;  %s6146_s11 = smov [#allocation4]  }
  0x1e   : > { %p6032_p6 = scmp.ne.s32.totalorder %s6224_s28, %s6031_s10  ;;  %s6036_s12 = sshll.u32 %s6146_s11, 4  ;;  %s6037_s12 = int_to_ptr.vmem [resolvable:$false] %s6036_s12 }
  0x1f   : > { %s6038_s17 = scalar_lea.vmem %s6037_s12, 32768  ;;  %p6039_p9 = scmp.lt.s32.totalorder %s6224_s28, %s6037_s12 }
  0x20   : > { %p6034_p10 = pnand %p6032_p6, %p6018_p11  ;;  %p6040_p0 = scmp.lt.s32.totalorder %s6038_s17, %s6031_s10 }
  0x22   : > { %p6035_p12 = pneg %p6034_p10  ;;  %p6041_p1 = por %p6040_p0, %p6039_p9 }
  0x24   : > { %p6042_p2 = pnand %p6041_p1, %p6035_p12 }
  0x26   : > { %6045 = shalt.err (!%p6042_p2)
}
  0x27   : > { %s6147_s18 = smov 128   ;;  %s6148_s22 = smov 8  }
  0x28   : > { %5969 = dma.hbm_to_vmem [thread:$0]  (!%p6226_p8), %s6222_s26, 16384, %s6224_s28, %s113_s30, %s6147_s18, %s6147_s18, %s6148_s22  }
  0x29   : > { %p150_p13 = scmp.lt.s32.totalorder %s6144_s0, 3  ;;  %s4305_s23 = sshll.u32 %s6215_s21, 3 }
  0x2a   : > { %s4349_s24 = sshll.u32 %s6144_s0, 7  ;;  %p9132_p9 = scmp.ge.s32.totalorder %s6144_s0, 1 }
  0x2b   : > { %s6271_s5 = scalar_lea.hbm %s8871_s2, %s4349_s24  ;;  %s137_s6 = scalar_lea.vmem [#allocation7], %s4305_s23 }
  0x2c   : > { %p6264_p3 = pnand %p9132_p9, %p150_p13  ;;  %s145_s7 = sshll.u32 %s137_s6, 4  ;;  %s146_s7 = int_to_ptr.vmem [resolvable:$true] %s145_s7 }
  0x2d   : > { %s134_s26 = scalar_lea.sflag [#allocation8], %s6215_s21  ;;  %s6046_s28 = scalar_lea.hbm %s6271_s5, 128 }
  0x2e   : > { %s9133_s25 = scalar_select %p6264_p3, 1, 0 }
  0x2f   : > { %p6047_p4 = scmp.ne.s32.totalorder %s6271_s5, %s6046_s28  ;;  %s6051_s8 = scalar_lea.hbm %s8871_s2, 256 }
  0x30   : > { %p6052_p10 = scmp.lt.u32.totalorder %s6271_s5, %s8871_s2  ;;  %p6053_p12 = scmp.lt.u32.totalorder %s6051_s8, %s6046_s28 }
  0x31   : > { %p6049_p5 = pnand %p6047_p4, %p6018_p11  ;;  %p6055_p1 = scmp.lt.u32.totalorder %s6046_s28, %s6271_s5 }
  0x32   : > { %p6054_p0 = por %p6053_p12, %p6052_p10 }
  0x33   : > { %p6050_p6 = pneg %p6049_p5 }
  0x34   : > { %p6056_p2 = por %p6055_p1, %p6054_p0 }
  0x36   : > { %p6057_p13 = pnand %p6056_p2, %p6050_p6 }
  0x38   : > { %6060 = shalt.err (!%p6057_p13)
}
  0x39   : > { %s6061_s21 = scalar_lea.vmem %s146_s7, 128  ;;  %s6149_s11 = smov [#allocation7]  }
  0x3a   : > { %p6062_p9 = scmp.ne.s32.totalorder %s146_s7, %s6061_s21  ;;  %s6066_s12 = sshll.u32 %s6149_s11, 4  ;;  %s6067_s12 = int_to_ptr.vmem [resolvable:$false] %s6066_s12 }
  0x3b   : > { %s6068_s17 = scalar_lea.vmem %s6067_s12, 256  ;;  %p6069_p7 = scmp.lt.s32.totalorder %s146_s7, %s6067_s12 }
  0x3c   : > { %p6064_p4 = pnand %p6062_p9, %p6018_p11  ;;  %p6070_p3 = scmp.lt.s32.totalorder %s6068_s17, %s6061_s21 }
  0x3e   : > { %p6065_p5 = pneg %p6064_p4  ;;  %p6071_p10 = por %p6070_p3, %p6069_p7 }
  0x40   : > { %p6072_p12 = pnand %p6071_p10, %p6065_p5 }
  0x42   : > { %6075 = shalt.err (!%p6072_p12)
}
  0x43   : > { %5972 = dma.hbm_to_vmem [thread:$0]  (!%p6226_p8), %s6271_s5, 128, %s146_s7, %s134_s26  }
  0x44   : > { %p9134_p6 = scmp.ne.s32.totalorder %s9133_s25, 0 }
  0x46   : > { %154 = sbr.rel (%p9134_p6) target bundleno = 792 (0x318), region = 28 }
  0x4d   : > { %s156_s18 = sand.u32 1, %s6136_s13   ;;  %p9135_p11 = scmp.ne.s32.totalorder %s9130_s20, 0 }
  0x4e   : > { %s4309_s22 = sshll.u32 %s156_s18, 10  ;;  %s157_s23 = scalar_lea.sflag [#allocation5], %s156_s18 }
  0x4f   : > { %s6296_s24 = scalar_lea.vmem [#allocation4], %s4309_s22 }
  0x50   : > { %6119 = dma.done.wait (%p9135_p11), %s157_s23, 16384  }
  0x51   : > { %6121 = vsyncadd (%p9135_p11), %s157_s23, 4294950912  ;;  %s4310_s27 = sshll.u32 %s156_s18, 3  ;;  %s166_s29 = scalar_lea.sflag [#allocation8], %s156_s18 }
  0x52   : > { %s6302_s4 = scalar_lea.vmem [#allocation7], %s4310_s27 }
  0x53   : > { %6123 = dma.done.wait (%p9135_p11), %s166_s29, 128  }
  0x54   : > { %6125 = vsyncadd (%p9135_p11), %s166_s29, 4294967168  ;;  %p4311_p7 = scmp.ne.s32.totalorder %s6193_s15, 0 }
  0x55   : > { %v6150_v0 = vmov (!%p4311_p7), 0.0  }
  0x56   : > { %195 = sbr.rel (%p4311_p7) target bundleno = 93 (0x5d), region = 40  ;;  %196 = vst [vmem:[#allocation9] sm:$0xff] (!%p4311_p7), %v6150_v0 }
  0x5d PF: > { %v213_v1 = vld [vmem:[%s6296_s24 + $0x80] sm:$0xff]  ;;  %v214_v2 = vld [vmem:[%s6296_s24 + $0x88] sm:$0xff]  ;;  %v215_v7 = vld [vmem:[%s6296_s24 + $0x90] sm:$0xff]  ;;  %v709_v12 = vlaneseq  ;;  %s6153_s20 = smov [#allocation9]   ;;  %p5974_p8 = scmp.eq.s32.totalorder %s6193_s15, 1 }
  0x5e   : > { %v197_v3 = vld [vmem:[%s6296_s24] sm:$0xff]  ;;  %v341_v4 = vmax.f32 %v213_v1, 1e-06  ;;  %v342_v5 = vmax.f32 %v214_v2, 1e-06  ;;  %v198_v6 = vld [vmem:[%s6296_s24 + $0x8] sm:$0xff] }
  0x5f   : > { %v325_v8 = vmax.f32 %v197_v3, 1e-06  ;;  %v326_v9 = vmax.f32 %v198_v6, 1e-06  ;;  %v216_v10 = vld [vmem:[%s6296_s24 + $0x98] sm:$0xff]  ;;  %v199_v11 = vld [vmem:[%s6296_s24 + $0x10] sm:$0xff] }
  0x60   : > { %v469_v13 = vmul.f32 %v341_v4, %v341_v4  ;;  %v470_v14 = vmul.f32 %v342_v5, %v342_v5  ;;  %v343_v15 = vmax.f32 %v215_v7, 1e-06  ;;  %v344_v16 = vmax.f32 %v216_v10, 1e-06  ;;  %v200_v17 = vld [vmem:[%s6296_s24 + $0x18] sm:$0xff]  ;;  %v217_v30 = vld [vmem:[%s6296_s24 + $0xa0] sm:$0xff] }
  0x61   : > { %v453_v18 = vmul.f32 %v325_v8, %v325_v8  ;;  %v454_v19 = vmul.f32 %v326_v9, %v326_v9  ;;  %v327_v20 = vmax.f32 %v199_v11, 1e-06  ;;  %v328_v21 = vmax.f32 %v200_v17, 1e-06  ;;  %v218_v42 = vld [vmem:[%s6296_s24 + $0xa8] sm:$0xff]  ;;  %v201_v48 = vld [vmem:[%s6296_s24 + $0x20] sm:$0xff] }
  0x62   : > { %v597_v22 = vmul.f32 %v469_v13, %v341_v4  ;;  %v598_v23 = vmul.f32 %v470_v14, %v342_v5  ;;  %v471_v24 = vmul.f32 %v343_v15, %v343_v15  ;;  %v472_v25 = vmul.f32 %v344_v16, %v344_v16  ;;  %v202_v53 = vld [vmem:[%s6296_s24 + $0x28] sm:$0xff]  ;;  %s4226_s25 = sshll.u32 %s6153_s20, 4  ;;  %s4227_s25 = int_to_ptr.vmem [resolvable:$true] %s4226_s25 }
  0x63   : > { %v581_v26 = vmul.f32 %v453_v18, %v325_v8  ;;  %v582_v27 = vmul.f32 %v454_v19, %v326_v9  ;;  %v455_v28 = vmul.f32 %v327_v20, %v327_v20  ;;  %v456_v29 = vmul.f32 %v328_v21, %v328_v21  ;;  %s6076_s5 = scalar_lea.vmem %s4227_s25, 128  ;;  %p6083_p2 = scmp.lt.s32.totalorder %s4227_s25, %s4227_s25 }
  0x64   : > { %v818_v31 = vand.u32 4294901760, %v597_v22  ;;  %v821_v32 = vand.u32 4294901760, %v598_v23  ;;  %v599_v33 = vmul.f32 %v471_v24, %v343_v15  ;;  %v600_v34 = vmul.f32 %v472_v25, %v344_v16  ;;  %v219_v15 = vld [vmem:[%s6296_s24 + $0xb0] sm:$0xff]  ;;  %p6077_p3 = scmp.ne.s32.totalorder %s4227_s25, %s6076_s5  ;;  %p6084_p13 = scmp.lt.s32.totalorder %s6076_s5, %s6076_s5 }
  0x65   : > { %v770_v35 = vand.u32 4294901760, %v581_v26  ;;  %v773_v36 = vand.u32 4294901760, %v582_v27  ;;  %v583_v37 = vmul.f32 %v455_v28, %v327_v20  ;;  %v584_v38 = vmul.f32 %v456_v29, %v328_v21  ;;  %v220_v20 = vld [vmem:[%s6296_s24 + $0xb8] sm:$0xff]  ;;  %v203_v29 = vld [vmem:[%s6296_s24 + $0x30] sm:$0xff] }
  0x66   : > { %v6318_v39 = vpack.c.bf16 %v821_v32, %v818_v31  ;;  %v824_v40 = vand.u32 4294901760, %v599_v33  ;;  %v827_v41 = vand.u32 4294901760, %v600_v34  ;;  %v345_v43 = vmax.f32 %v217_v30, 1e-06  ;;  %v204_v30 = vld [vmem:[%s6296_s24 + $0x38] sm:$0xff]  ;;  %p6078_p0 = pnand %p6077_p3, %p5974_p8  ;;  %p6085_p9 = por %p6084_p13, %p6083_p2 }
  0x67   : > { %v6321_v44 = vpack.c.bf16 %v773_v36, %v770_v35  ;;  %v6323_v45 = vsub.f32 %v581_v26, %v770_v35  ;;  %v6325_v46 = vsub.f32 %v582_v27, %v773_v36  ;;  %v776_v47 = vand.u32 4294901760, %v583_v37 }
  0x68   : > { %5191 = vmatprep.subr.bf16.mxu0 %v6318_v39  ;;  %v6329_v49 = vpack.c.bf16 %v827_v41, %v824_v40  ;;  %v6331_v50 = vsub.f32 %v599_v33, %v824_v40  ;;  %v6333_v51 = vsub.f32 %v600_v34, %v827_v41  ;;  %v779_v52 = vand.u32 4294901760, %v584_v38  ;;  %p6079_p1 = pneg %p6078_p0 }
  0x69   : > { %9136 = vst [vmem:[#allocation13_spill] sm:$0xff] %v6323_v45  ;;  %9137 = vst [vmem:[#allocation14_spill] sm:$0xff] %v6325_v46  ;;  %5193 = vmatpush3.bf16.msra.mxu0 %v6321_v44  ;;  %v6337_v54 = vsub.f32 %v583_v37, %v776_v47  ;;  %v346_v55 = vmax.f32 %v218_v42, 1e-06  ;;  %v473_v56 = vmul.f32 %v345_v43, %v345_v43  ;;  %v329_v61 = vmax.f32 %v201_v48, 1e-06 }
  0x6a   : > { %v6339_v57 = vsub.f32 %v597_v22, %v818_v31  ;;  %5195 = vmatprep.subr.bf16.mxu0 %v6329_v49  ;;  %v6342_v58 = vpack.c.bf16 %v779_v52, %v776_v47  ;;  %v6344_v59 = vsub.f32 %v584_v38, %v779_v52  ;;  %v6346_v60 = vsub.f32 %v598_v23, %v821_v32  ;;  %p6086_p4 = pnand %p6085_p9, %p6079_p1 }
  0x6b   : > { %v474_v62 = vmul.f32 %v346_v55, %v346_v55  ;;  %v601_v63 = vmul.f32 %v473_v56, %v345_v43  ;;  %v330_v1 = vmax.f32 %v202_v53, 1e-06  ;;  %v457_v3 = vmul.f32 %v329_v61, %v329_v61 }
  0x6c   : > { %v8877_v0 = vand.u32 4294901760, %v6339_v57  ;;  %v8876_v2 = vand.u32 4294901760, %v6346_v60  ;;  %v8875_v4 = vand.u32 4294901760, %v6323_v45  ;;  %v8874_v5 = vand.u32 4294901760, %v6325_v46 }
  0x6d   : > { %5197 = vmatpush3.bf16.msra.mxu0 %v6342_v58  ;;  %v602_v6 = vmul.f32 %v474_v62, %v346_v55  ;;  %v830_v7 = vand.u32 4294901760, %v601_v63  ;;  %v458_v9 = vmul.f32 %v330_v1, %v330_v1  ;;  %v585_v11 = vmul.f32 %v457_v3, %v329_v61 }
  0x6e   : > { %v997_v8 = vsub.f32 %v6339_v57, %v8877_v0  ;;  %v1004_v10 = vsub.f32 %v6346_v60, %v8876_v2  ;;  %v885_v13 = vsub.f32 %v6323_v45, %v8875_v4  ;;  %v892_v14 = vsub.f32 %v6325_v46, %v8874_v5 }
  0x6f   : > { %v833_v16 = vand.u32 4294901760, %v602_v6  ;;  %v6366_v17 = vsub.f32 %v601_v63, %v830_v7  ;;  %v586_v19 = vmul.f32 %v458_v9, %v330_v1  ;;  %v782_v22 = vand.u32 4294901760, %v585_v11  ;;  %v221_v63 = vld [vmem:[%s6296_s24 + $0xc0] sm:$0xff] }
  0x70   : > { %v998_v18 = vand.u32 4294901760, %v997_v8  ;;  %v1005_v21 = vand.u32 4294901760, %v1004_v10  ;;  %v886_v23 = vand.u32 4294901760, %v885_v13  ;;  %v893_v24 = vand.u32 4294901760, %v892_v14  ;;  %v222_v13 = vld [vmem:[%s6296_s24 + $0xc8] sm:$0xff] }
  0x71   : > { %v6369_v25 = vpack.c.bf16 %v833_v16, %v830_v7  ;;  %v6371_v26 = vsub.f32 %v602_v6, %v833_v16  ;;  %v785_v27 = vand.u32 4294901760, %v586_v19  ;;  %v347_v28 = vmax.f32 %v219_v15, 1e-06 }
  0x72   : > { %v5222_v31 = vpack.c.bf16 %v1005_v21, %v998_v18  ;;  %v6375_v32 = vsub.f32 %v585_v11, %v782_v22  ;;  %v5224_v33 = vpack.c.bf16 %v893_v24, %v886_v23  ;;  %v348_v34 = vmax.f32 %v220_v20, 1e-06 }
  0x73   : > { %5199 = vmatprep.subr.bf16.mxu0 %v6369_v25  ;;  %v6378_v35 = vpack.c.bf16 %v785_v27, %v782_v22  ;;  %v6380_v36 = vsub.f32 %v586_v19, %v785_v27  ;;  %v475_v37 = vmul.f32 %v347_v28, %v347_v28  ;;  %v8892_v38 = vand.u32 4294901760, %v6331_v50  ;;  %v205_v19 = vld [vmem:[%s6296_s24 + $0x40] sm:$0xff] }
  0x74   : > { %5223 = vmatprep.subr.bf16.mxu1 %v5222_v31  ;;  %v476_v40 = vmul.f32 %v348_v34, %v348_v34  ;;  %v8891_v41 = vand.u32 4294901760, %v6333_v51  ;;  %v331_v42 = vmax.f32 %v203_v29, 1e-06  ;;  %v332_v43 = vmax.f32 %v204_v30, 1e-06  ;;  %v206_v30 = vld [vmem:[%s6296_s24 + $0x48] sm:$0xff] }
  0x75   : > { %5201 = vmatpush3.bf16.msra.mxu0 %v6378_v35  ;;  %5225 = vmatpush3.bf16.msra.mxu1 %v5224_v33  ;;  %v603_v47 = vmul.f32 %v475_v37, %v347_v28  ;;  %v1011_v48 = vsub.f32 %v6331_v50, %v8892_v38  ;;  %v8889_v52 = vand.u32 4294901760, %v6337_v54  ;;  %v8888_v53 = vand.u32 4294901760, %v6344_v59 }
  0x76   : > { %v604_v55 = vmul.f32 %v476_v40, %v348_v34  ;;  %v1018_v56 = vsub.f32 %v6333_v51, %v8891_v41  ;;  %v459_v61 = vmul.f32 %v331_v42, %v331_v42  ;;  %v460_v62 = vmul.f32 %v332_v43, %v332_v43 }
  0x77   : > { %v836_v1 = vand.u32 4294901760, %v603_v47  ;;  %v1012_v3 = vand.u32 4294901760, %v1011_v48  ;;  %v899_v6 = vsub.f32 %v6337_v54, %v8889_v52  ;;  %v906_v7 = vsub.f32 %v6344_v59, %v8888_v53 }
  0x78   : > { %v839_v8 = vand.u32 4294901760, %v604_v55  ;;  %v1019_v9 = vand.u32 4294901760, %v1018_v56  ;;  %v587_v10 = vmul.f32 %v459_v61, %v331_v42  ;;  %v588_v11 = vmul.f32 %v460_v62, %v332_v43 }
  0x79   : > { %v6401_v14 = vsub.f32 %v603_v47, %v836_v1  ;;  %v900_v15 = vand.u32 4294901760, %v899_v6  ;;  %v907_v16 = vand.u32 4294901760, %v906_v7  ;;  %v349_v18 = vmax.f32 %v221_v63, 1e-06  ;;  %v223_v6 = vld [vmem:[%s6296_s24 + $0xd0] sm:$0xff] }
  0x7a   : > { %v6404_v20 = vpack.c.bf16 %v839_v8, %v836_v1  ;;  %v6406_v21 = vsub.f32 %v604_v55, %v839_v8  ;;  %v5226_v22 = vpack.c.bf16 %v1019_v9, %v1012_v3  ;;  %v788_v23 = vand.u32 4294901760, %v587_v10 }
  0x7b   : > { %v791_v24 = vand.u32 4294901760, %v588_v11  ;;  %v5228_v27 = vpack.c.bf16 %v907_v16, %v900_v15  ;;  %v350_v28 = vmax.f32 %v222_v13, 1e-06  ;;  %v477_v29 = vmul.f32 %v349_v18, %v349_v18 }
  0x7c   : > { %5203 = vmatprep.subr.bf16.mxu0 %v6404_v20  ;;  %5227 = vmatprep.subr.bf16.mxu1 %v5226_v22  ;;  %v6410_v31 = vsub.f32 %v587_v10, %v788_v23  ;;  %v8887_v33 = vand.u32 4294901760, %v6366_v17  ;;  %v8886_v34 = vand.u32 4294901760, %v6371_v26  ;;  %v333_v37 = vmax.f32 %v205_v19, 1e-06 }
  0x7d   : > { %v6414_v40 = vpack.c.bf16 %v791_v24, %v788_v23  ;;  %v6416_v42 = vsub.f32 %v588_v11, %v791_v24  ;;  %5229 = vmatpush3.bf16.msra.mxu1 %v5228_v27  ;;  %v478_v43 = vmul.f32 %v350_v28, %v350_v28  ;;  %v605_v47 = vmul.f32 %v477_v29, %v349_v18  ;;  %v224_v18 = vld [vmem:[%s6296_s24 + $0xd8] sm:$0xff]  ;;  %v207_v27 = vld [vmem:[%s6296_s24 + $0x50] sm:$0xff] }
  0x7e   : > { %v1025_v48 = vsub.f32 %v6366_v17, %v8887_v33  ;;  %v1032_v55 = vsub.f32 %v6371_v26, %v8886_v34  ;;  %v334_v56 = vmax.f32 %v206_v30, 1e-06  ;;  %v461_v61 = vmul.f32 %v333_v37, %v333_v37 }
  0x7f   : > { %5205 = vmatpush3.bf16.msra.mxu0 %v6414_v40  ;;  %v606_v62 = vmul.f32 %v478_v43, %v350_v28  ;;  %v842_v63 = vand.u32 4294901760, %v605_v47  ;;  %v8882_v1 = vand.u32 4294901760, %v6375_v32  ;;  %v8881_v3 = vand.u32 4294901760, %v6380_v36 }
  0x80   : > { %v1026_v7 = vand.u32 4294901760, %v1025_v48  ;;  %v1033_v8 = vand.u32 4294901760, %v1032_v55  ;;  %v462_v9 = vmul.f32 %v334_v56, %v334_v56  ;;  %v589_v10 = vmul.f32 %v461_v61, %v333_v37  ;;  %v208_v61 = vld [vmem:[%s6296_s24 + $0x58] sm:$0xff] }
  0x81   : > { %v845_v11 = vand.u32 4294901760, %v606_v62  ;;  %v6428_v13 = vsub.f32 %v605_v47, %v842_v63  ;;  %v913_v15 = vsub.f32 %v6375_v32, %v8882_v1  ;;  %v920_v16 = vsub.f32 %v6380_v36, %v8881_v3 }
  0x82   : > { %v5230_v19 = vpack.c.bf16 %v1033_v8, %v1026_v7  ;;  %v590_v22 = vmul.f32 %v462_v9, %v334_v56  ;;  %v794_v23 = vand.u32 4294901760, %v589_v10  ;;  %v351_v24 = vmax.f32 %v223_v6, 1e-06 }
  0x83   : > { %v6438_v28 = vpack.c.bf16 %v845_v11, %v842_v63  ;;  %v6440_v29 = vsub.f32 %v606_v62, %v845_v11  ;;  %v914_v30 = vand.u32 4294901760, %v913_v15  ;;  %v921_v37 = vand.u32 4294901760, %v920_v16 }
  0x84   : > { %5231 = vmatprep.subr.bf16.mxu1 %v5230_v19  ;;  %v797_v43 = vand.u32 4294901760, %v590_v22  ;;  %v6442_v47 = vsub.f32 %v589_v10, %v794_v23  ;;  %v352_v48 = vmax.f32 %v224_v18, 1e-06  ;;  %v479_v55 = vmul.f32 %v351_v24, %v351_v24 }
  0x85   : > { %5207 = vmatprep.subr.bf16.mxu0 %v6438_v28  ;;  %v5232_v7 = vpack.c.bf16 %v921_v37, %v914_v30  ;;  %v8879_v56 = vand.u32 4294901760, %v6401_v14  ;;  %v8878_v6 = vand.u32 4294901760, %v6406_v21  ;;  %v335_v63 = vmax.f32 %v207_v27, 1e-06  ;;  %v225_v27 = vld [vmem:[%s6296_s24 + $0xe0] sm:$0xff] }
  0x86   : > { %v6448_v62 = vpack.c.bf16 %v797_v43, %v794_v23  ;;  %v6450_v8 = vsub.f32 %v590_v22, %v797_v43  ;;  %v480_v9 = vmul.f32 %v352_v48, %v352_v48  ;;  %v607_v11 = vmul.f32 %v479_v55, %v351_v24 }
  0x87   : > { %5233 = vmatpush3.bf16.msra.mxu1 %v5232_v7  ;;  %v1039_v10 = vsub.f32 %v6401_v14, %v8879_v56  ;;  %v1046_v15 = vsub.f32 %v6406_v21, %v8878_v6  ;;  %v336_v16 = vmax.f32 %v208_v61, 1e-06  ;;  %v463_v18 = vmul.f32 %v335_v63, %v335_v63 }
  0x88   : > { %9138 = vst [vmem:[#allocation15_spill] sm:$0xff] %v6448_v62  ;;  %5209 = vmatpush3.bf16.msra.mxu0 %v6448_v62  ;;  %v608_v19 = vmul.f32 %v480_v9, %v352_v48  ;;  %v848_v23 = vand.u32 4294901760, %v607_v11  ;;  %v8880_v22 = vand.u32 4294901760, %v6410_v31  ;;  %v8883_v24 = vand.u32 4294901760, %v6416_v42  ;;  %v226_v9 = vld [vmem:[%s6296_s24 + $0xe8] sm:$0xff] }
  0x89   : > { %v1040_v30 = vand.u32 4294901760, %v1039_v10  ;;  %v1047_v37 = vand.u32 4294901760, %v1046_v15  ;;  %v464_v43 = vmul.f32 %v336_v16, %v336_v16  ;;  %v591_v55 = vmul.f32 %v463_v18, %v335_v63  ;;  %v209_v15 = vld [vmem:[%s6296_s24 + $0x60] sm:$0xff] }
  0x8a   : > { %v851_v7 = vand.u32 4294901760, %v608_v19  ;;  %v6462_v5 = vsub.f32 %v607_v11, %v848_v23  ;;  %v927_v61 = vsub.f32 %v6410_v31, %v8880_v22  ;;  %v934_v48 = vsub.f32 %v6416_v42, %v8883_v24  ;;  %v210_v24 = vld [vmem:[%s6296_s24 + $0x68] sm:$0xff] }
  0x8b   : > { %v5234_v4 = vpack.c.bf16 %v1047_v37, %v1040_v30  ;;  %v592_v2 = vmul.f32 %v464_v43, %v336_v16  ;;  %v800_v0 = vand.u32 4294901760, %v591_v55  ;;  %v353_v10 = vmax.f32 %v225_v27, 1e-06 }
  0x8c   : > { %v6472_v6 = vpack.c.bf16 %v851_v7, %v848_v23  ;;  %v6474_v63 = vsub.f32 %v608_v19, %v851_v7  ;;  %v928_v11 = vand.u32 4294901760, %v927_v61  ;;  %v935_v18 = vand.u32 4294901760, %v934_v48 }
  0x8d   : > { %5235 = vmatprep.subr.bf16.mxu1 %v5234_v4  ;;  %v803_v56 = vand.u32 4294901760, %v592_v2  ;;  %v6476_v22 = vsub.f32 %v591_v55, %v800_v0  ;;  %v354_v3 = vmax.f32 %v226_v9, 1e-06  ;;  %v481_v1 = vmul.f32 %v353_v10, %v353_v10 }
  0x8e   : > { %9139 = vst [vmem:[#allocation16_spill] sm:$0xff] %v6472_v6  ;;  %5211 = vmatprep.subr.bf16.mxu0 %v6472_v6  ;;  %v5236_v30 = vpack.c.bf16 %v935_v18, %v928_v11  ;;  %v8884_v16 = vand.u32 4294901760, %v6428_v13  ;;  %v8885_v27 = vand.u32 4294901760, %v6440_v29  ;;  %v337_v23 = vmax.f32 %v209_v15, 1e-06 }
  0x8f   : > { %v6482_v19 = vpack.c.bf16 %v803_v56, %v800_v0  ;;  %v6484_v37 = vsub.f32 %v592_v2, %v803_v56  ;;  %v482_v4 = vmul.f32 %v354_v3, %v354_v3  ;;  %v609_v43 = vmul.f32 %v481_v1, %v353_v10  ;;  %v227_v56 = vld [vmem:[%s6296_s24 + $0xf0] sm:$0xff] }
  0x90   : > { %5237 = vmatpush3.bf16.msra.mxu1 %v5236_v30  ;;  %v1053_v55 = vsub.f32 %v6428_v13, %v8884_v16  ;;  %v1060_v7 = vsub.f32 %v6440_v29, %v8885_v27  ;;  %v338_v61 = vmax.f32 %v210_v24, 1e-06  ;;  %v465_v48 = vmul.f32 %v337_v23, %v337_v23 }
  0x91   : > { %9140 = vst [vmem:[#allocation17_spill] sm:$0xff] %v6482_v19  ;;  %5213 = vmatpush3.bf16.msra.mxu0 %v6482_v19  ;;  %v610_v0 = vmul.f32 %v482_v4, %v354_v3  ;;  %v854_v9 = vand.u32 4294901760, %v609_v43  ;;  %v8890_v2 = vand.u32 4294901760, %v6442_v47  ;;  %v8893_v1 = vand.u32 4294901760, %v6450_v8  ;;  %v228_v4 = vld [vmem:[%s6296_s24 + $0xf8] sm:$0xff] }
  0x92   : > { %v1054_v10 = vand.u32 4294901760, %v1053_v55  ;;  %v1061_v15 = vand.u32 4294901760, %v1060_v7  ;;  %v466_v11 = vmul.f32 %v338_v61, %v338_v61  ;;  %v593_v18 = vmul.f32 %v465_v48, %v337_v23  ;;  %v211_v7 = vld [vmem:[%s6296_s24 + $0x70] sm:$0xff] }
  0x93   : > { %v857_v30 = vand.u32 4294901760, %v610_v0  ;;  %v6496_v16 = vsub.f32 %v609_v43, %v854_v9  ;;  %v941_v24 = vsub.f32 %v6442_v47, %v8890_v2  ;;  %v948_v3 = vsub.f32 %v6450_v8, %v8893_v1  ;;  %v212_v1 = vld [vmem:[%s6296_s24 + $0x78] sm:$0xff] }
  0x94   : > { %v5238_v27 = vpack.c.bf16 %v1061_v15, %v1054_v10  ;;  %v594_v34 = vmul.f32 %v466_v11, %v338_v61  ;;  %v806_v33 = vand.u32 4294901760, %v593_v18  ;;  %v355_v55 = vmax.f32 %v227_v56, 1e-06 }
  0x95   : > { %v6506_v53 = vpack.c.bf16 %v857_v30, %v854_v9  ;;  %v6508_v23 = vsub.f32 %v610_v0, %v857_v30  ;;  %v942_v43 = vand.u32 4294901760, %v941_v24  ;;  %v949_v48 = vand.u32 4294901760, %v948_v3 }
  0x96   : > { %5239 = vmatprep.subr.bf16.mxu1 %v5238_v27  ;;  %v809_v52 = vand.u32 4294901760, %v594_v34  ;;  %v6510_v2 = vsub.f32 %v593_v18, %v806_v33  ;;  %v356_v41 = vmax.f32 %v228_v4, 1e-06  ;;  %v483_v38 = vmul.f32 %v355_v55, %v355_v55 }
  0x97   : > { %9141 = vst [vmem:[#allocation18_spill] sm:$0xff] %v6506_v53  ;;  %5215 = vmatprep.subr.bf16.mxu0 %v6506_v53  ;;  %v5240_v10 = vpack.c.bf16 %v949_v48, %v942_v43  ;;  %v8895_v61 = vand.u32 4294901760, %v6462_v5  ;;  %v8894_v56 = vand.u32 4294901760, %v6474_v63  ;;  %v339_v9 = vmax.f32 %v211_v7, 1e-06 }
  0x98   : > { %v6516_v15 = vpack.c.bf16 %v809_v52, %v806_v33  ;;  %v6518_v0 = vsub.f32 %v594_v34, %v809_v52  ;;  %v484_v11 = vmul.f32 %v356_v41, %v356_v41  ;;  %v611_v27 = vmul.f32 %v483_v38, %v355_v55 }
  0x99   : > { %5241 = vmatpush3.bf16.msra.mxu1 %v5240_v10  ;;  %v1067_v18 = vsub.f32 %v6462_v5, %v8895_v61  ;;  %v1074_v30 = vsub.f32 %v6474_v63, %v8894_v56  ;;  %v340_v24 = vmax.f32 %v212_v1, 1e-06  ;;  %v467_v3 = vmul.f32 %v339_v9, %v339_v9 }
  0x9a   : > { %9142 = vst [vmem:[#allocation19_spill] sm:$0xff] %v6516_v15  ;;  %5217 = vmatpush3.bf16.msra.mxu0 %v6516_v15  ;;  %v612_v4 = vmul.f32 %v484_v11, %v356_v41  ;;  %v860_v33 = vand.u32 4294901760, %v611_v27  ;;  %v8898_v52 = vand.u32 4294901760, %v6476_v22  ;;  %v8901_v34 = vand.u32 4294901760, %v6484_v37  ;;  %v6545_v15 = vld [vmem:[%s6302_s4] sm:$0xff] }
  0x9b   : > { %v1068_v38 = vand.u32 4294901760, %v1067_v18  ;;  %v1075_v55 = vand.u32 4294901760, %v1074_v30  ;;  %v468_v7 = vmul.f32 %v340_v24, %v340_v24  ;;  %v595_v43 = vmul.f32 %v467_v3, %v339_v9  ;;  %9145 = vst [vmem:[#allocation22_spill] sm:$0xff] %v6545_v15 }
  0x9c   : > { %v863_v48 = vand.u32 4294901760, %v612_v4  ;;  %v6529_v10 = vsub.f32 %v611_v27, %v860_v33  ;;  %v955_v1 = vsub.f32 %v6476_v22, %v8898_v52  ;;  %v962_v41 = vsub.f32 %v6484_v37, %v8901_v34 }
  0x9d   : > { %v5242_v11 = vpack.c.bf16 %v1075_v55, %v1068_v38  ;;  %v596_v56 = vmul.f32 %v468_v7, %v340_v24  ;;  %v812_v61 = vand.u32 4294901760, %v595_v43  ;;  %v6538_v18 = vshrl.u32 %v709_v12, 7 }
  0x9e   : > { %v6540_v30 = vpack.c.bf16 %v863_v48, %v860_v33  ;;  %v6542_v9 = vsub.f32 %v612_v4, %v863_v48  ;;  %v956_v27 = vand.u32 4294901760, %v955_v1  ;;  %v963_v3 = vand.u32 4294901760, %v962_v41 }
  0x9f   : > { %9143 = vst [vmem:[#allocation20_spill] sm:$0xff] %v6538_v18  ;;  %5243 = vmatprep.subr.bf16.mxu1 %v5242_v11  ;;  %v815_v52 = vand.u32 4294901760, %v596_v56  ;;  %v6547_v53 = vsub.f32 %v595_v43, %v812_v61  ;;  %v718_v34 = vsub.s32 1, %v6538_v18  ;;  %v8904_v24 = vand.u32 4294901760, %v6496_v16 }
  0xa0   : > { %9144 = vst [vmem:[#allocation21_spill] sm:$0xff] %v6540_v30  ;;  %5219 = vmatprep.subr.bf16.mxu0 %v6540_v30  ;;  %v5244_v12 = vpack.c.bf16 %v963_v3, %v956_v27  ;;  %v8902_v33 = vand.u32 4294901760, %v6508_v23  ;;  %v5254_v4 = vpack.c.bf16 %v6346_v60, %v6339_v57  ;;  %v714_v38 = vsub.s32 0, %v6538_v18 }
  0xa1   : > { %v6556_v55 = vpack.c.bf16 %v815_v52, %v812_v61  ;;  %v6558_v7 = vsub.f32 %v596_v56, %v815_v52  ;;  %v6561_v43 = vrot.slane %v6545_v15, %v718_v34  ;;  %v1081_v48 = vsub.f32 %v6496_v16, %v8904_v24 }
  0xa2   : > { %5245 = vmatpush3.bf16.msra.mxu1 %v5244_v12  ;;  %v1088_v1 = vsub.f32 %v6508_v23, %v8902_v33  ;;  %v6570_v41 = vrot.slane %v6545_v15, %v714_v38  ;;  %v8903_v61 = vand.u32 4294901760, %v6510_v2  ;;  %v8917_v56 = vand.u32 4294901760, %v6518_v0 }
  0xa3   : > { %9146 = vst [vmem:[#allocation23_spill] sm:$0xff] %v6556_v55  ;;  %9147 = vst [vmem:[#allocation24_spill] sm:$0xff] %v6561_v43  ;;  %5221 = vmatpush3.bf16.msra.mxu0 %v6556_v55  ;;  %vm745_vm0 = vcmp.eq.s32.totalorder %v6561_v43, %v6538_v18  ;;  %v1082_v52 = vand.u32 4294901760, %v1081_v48  ;;  %v5256_v34 = vpack.c.bf16 %v6325_v46, %v6323_v45  ;;  %v8918_v11 = vand.u32 4294901760, %v6529_v10  ;;  %v245_v45 = vld [vmem:[%s6296_s24 + $0x180] sm:$0xff] }
  0xa4   : > { %9148 = vst [vmem:[#allocation25_spill] sm:$0xff] %v6570_v41  ;;  %v8915_v27 = vmov 0.0   ;;  %v1089_v12 = vand.u32 4294901760, %v1088_v1  ;;  %5255 = vmatprep.subr.bf16.mxu0 %v5254_v4  ;;  %vm744_vm1 = vcmp.eq.s32.totalorder %v6570_v41, %v6538_v18  ;;  %v969_v38 = vsub.f32 %v6510_v2, %v8903_v61 }
  0xa5   : > { %v4313_v3 = vsel %vm745_vm0, 1.0, %v8915_v27  ;;  %v8909_v48 = vmov 1.0   ;;  %v4312_v4 = vsel %vm744_vm1, 1.0, %v8915_v27  ;;  %v976_v1 = vsub.f32 %v6518_v0, %v8917_v56 }
  0xa6   : > { %4320 = vmatprep.mubr.msk.f32.mxu1 %vm745_vm0, %v8909_v48  ;;  %v6593_v33 = vsub.f32 %v4313_v3, %v4313_v3  ;;  %v1095_v61 = vsub.f32 %v6529_v10, %v8918_v11  ;;  %v5246_v24 = vpack.c.bf16 %v1089_v12, %v1082_v52  ;;  %v6605_v15 = vsub.f32 %v4312_v4, %v4312_v4 }
  0xa7   : > { %v970_v55 = vand.u32 4294901760, %v969_v38  ;;  %v8919_v3 = vand.u32 4294901760, %v6542_v9  ;;  %v977_v43 = vand.u32 4294901760, %v976_v1  ;;  %v982_v11 = vand.u32 4294901760, %v6547_v53 }
  0xa8   : > { %v8927_v48 = vand.u32 4294901760, %v6593_v33  ;;  %v1096_v30 = vand.u32 4294901760, %v1095_v61  ;;  %5247 = vmatprep.subr.bf16.mxu1 %v5246_v24  ;;  %v8929_v27 = vand.u32 4294901760, %v6605_v15  ;;  %v989_v52 = vand.u32 4294901760, %v6558_v7 }
  0xa9   : > { %v1102_v56 = vsub.f32 %v6542_v9, %v8919_v3  ;;  %v5248_v38 = vpack.c.bf16 %v977_v43, %v970_v55  ;;  %v983_v4 = vsub.f32 %v6547_v53, %v982_v11  ;;  %v5258_v19 = vpack.c.bf16 %v6333_v51, %v6331_v50  ;;  %v246_v55 = vld [vmem:[%s6296_s24 + $0x188] sm:$0xff]  ;;  %v229_v43 = vld [vmem:[%s6296_s24 + $0x100] sm:$0xff] }
  0xaa   : > { %v868_v12 = vsub.f32 %v6593_v33, %v8927_v48  ;;  %v874_v24 = vsub.f32 %v6605_v15, %v8929_v27  ;;  %v990_v1 = vsub.f32 %v6558_v7, %v989_v52  ;;  %v9174_v27 = vand.u32 4294901760, %v6510_v2 }
  0xab   : > { %v1103_v61 = vand.u32 4294901760, %v1102_v56  ;;  %5249 = vmatpush3.bf16.msra.mxu1 %v5248_v38  ;;  %v984_v46 = vand.u32 4294901760, %v983_v4  ;;  %v5262_v38 = vpack.c.bf16 %v6371_v26, %v6366_v17  ;;  %v230_v4 = vld [vmem:[%s6296_s24 + $0x108] sm:$0xff]  ;;  %v6718_v41 = vpack.c.bf16 %v989_v52, %v982_v11 }
  0xac   : > { %v869_v3 = vand.u32 4294901760, %v868_v12  ;;  %v875_v6 = vand.u32 4294901760, %v874_v24  ;;  %v991_v48 = vand.u32 4294901760, %v990_v1  ;;  %v5260_v12 = vpack.c.bf16 %v6344_v59, %v6337_v54 }
  0xad   : > { %v5250_v62 = vpack.c.bf16 %v1103_v61, %v1096_v30  ;;  %v5264_v30 = vpack.c.bf16 %v6380_v36, %v6375_v32  ;;  %v374_v61 = vmax.f32 %v246_v55, 1e-06  ;;  %v357_v1 = vmax.f32 %v229_v43, 1e-06  ;;  %9177 = vst [vmem:[#allocation29_spill] sm:$0xff] %v6718_v41 }
  0xae   : > { %870 = vmatprep.mubr.f32.mxu0 %v869_v3  ;;  %v5252_v56 = vpack.c.bf16 %v991_v48, %v984_v46  ;;  %v373_v3 = vmax.f32 %v245_v45, 1e-06  ;;  %v9150_v46 = vand.u32 4294901760, %v6333_v51  ;;  %v9152_v48 = vand.u32 4294901760, %v6344_v59 }
  0xaf   : > { %876 = vmatmul.mubr.f32.vlgmr.msra.gmra.mrb[0].mxu0 %v875_v6  ;;  %5251 = vmatprep.subr.bf16.mxu1 %v5250_v62  ;;  %v9149_v6 = vand.u32 4294901760, %v6331_v50  ;;  %v9153_v45 = vand.u32 4294901760, %v6366_v17  ;;  %v9154_v50 = vand.u32 4294901760, %v6371_v26  ;;  %v9155_v51 = vand.u32 4294901760, %v6375_v32  ;;  %v247_v26 = vld [vmem:[%s6296_s24 + $0x190] sm:$0xff] }
  0xb0   : > { %5257 = vmatpush3.bf16.msra.mxu0 %v5256_v34  ;;  %1243 = vmatprep.mubr.f32.mxu0 %v6593_v33  ;;  %v9151_v34 = vand.u32 4294901760, %v6337_v54  ;;  %v9157_v59 = vand.u32 4294901760, %v6401_v14  ;;  %v9158_v55 = vand.u32 4294901760, %v6406_v21  ;;  %v9159_v43 = vand.u32 4294901760, %v6410_v31 }
  0xb1   : > { %5259 = vmatprep.subr.bf16.mxu0 %v5258_v19  ;;  %5253 = vmatpush3.bf16.msra.mxu1 %v5252_v56  ;;  %v6639_v62 = vpack.c.bf16 %v9150_v46, %v9149_v6  ;;  %v6653_v19 = vpack.c.bf16 %v9154_v50, %v9153_v45  ;;  %v9156_v56 = vand.u32 4294901760, %v6380_v36  ;;  %v9160_v17 = vand.u32 4294901760, %v6416_v42 }
  0xb2   : > { %v6645_v24 = vpack.c.bf16 %v9152_v48, %v9151_v34  ;;  %5287 = vmatprep.subr.bf16.mxu1 %v6318_v39  ;;  %v6665_v6 = vpack.c.bf16 %v9158_v55, %v9157_v59  ;;  %v9161_v34 = vand.u32 4294901760, %v6428_v13  ;;  %v9162_v32 = vand.u32 4294901760, %v6440_v29 }
  0xb3   : > { %v6659_v54 = vpack.c.bf16 %v9156_v56, %v9155_v51  ;;  %v6671_v46 = vpack.c.bf16 %v9160_v17, %v9159_v43  ;;  %v9163_v48 = vand.u32 4294901760, %v6442_v47  ;;  %v9164_v45 = vand.u32 4294901760, %v6450_v8 }
  0xb4   : > { %v6678_v36 = vpack.c.bf16 %v9162_v32, %v9161_v34  ;;  %v9165_v51 = vand.u32 4294901760, %v6462_v5  ;;  %v9166_v56 = vand.u32 4294901760, %v6474_v63  ;;  %v9168_v55 = vand.u32 4294901760, %v6476_v22  ;;  %v248_v34 = vld [vmem:[%s6296_s24 + $0x198] sm:$0xff]  ;;  %5261 = vmatpush3.bf16.msra.mxu0 %v5260_v12 }
  0xb5   : > { %v6684_v50 = vpack.c.bf16 %v9164_v45, %v9163_v48  ;;  %v9169_v43 = vand.u32 4294901760, %v6484_v37  ;;  %v9171_v32 = vmov 1.0   ;;  %v5266_v48 = vpack.c.bf16 %v6406_v21, %v6401_v14  ;;  %5263 = vmatprep.subr.bf16.mxu0 %v5262_v38 }
  0xb6   : > { %v6690_v59 = vpack.c.bf16 %v9166_v56, %v9165_v51  ;;  %4321 = vmatmul.mubr.msk.f32.vlgmr.msra.gmra.mrb[0].mxu1 %vm744_vm1, %v9171_v32  ;;  %v9172_v45 = vand.u32 4294901760, %v6496_v16  ;;  %v9173_v51 = vand.u32 4294901760, %v6508_v23  ;;  %v358_v12 = vmax.f32 %v230_v4, 1e-06  ;;  %v232_v4 = vld [vmem:[%s6296_s24 + $0x118] sm:$0xff] }
  0xb7   : > { %v6696_v17 = vpack.c.bf16 %v9169_v43, %v9168_v55  ;;  %v9175_v55 = vand.u32 4294901760, %v6518_v0  ;;  %5289 = vmatpush3.bf16.msra.mxu1 %v6321_v44  ;;  %v501_v14 = vmul.f32 %v373_v3, %v373_v3  ;;  %v502_v21 = vmul.f32 %v374_v61, %v374_v61 }
  0xb8   : > { %9167 = vst [vmem:[#allocation26_spill] sm:$0xff] %v6690_v59  ;;  %v6709_v56 = vpack.c.bf16 %v9173_v51, %v9172_v45  ;;  %v231_v59 = vld [vmem:[%s6296_s24 + $0x110] sm:$0xff]  ;;  %5291 = vmatprep.subr.bf16.mxu1 %v6329_v49  ;;  %v9178_v45 = vand.u32 4294901760, %v6593_v33  ;;  %v485_v51 = vmul.f32 %v357_v1, %v357_v1  ;;  %5265 = vmatpush3.bf16.msra.mxu0 %v5264_v30  ;;  %v249_v30 = vld [vmem:[%s6296_s24 + $0x1a0] sm:$0xff] }
  0xb9   : > { %9170 = vst [vmem:[#allocation27_spill] sm:$0xff] %v6696_v17  ;;  %v6715_v43 = vpack.c.bf16 %v9175_v55, %v9174_v27  ;;  %v375_v17 = vmax.f32 %v247_v26, 1e-06  ;;  %v376_v27 = vmax.f32 %v248_v34, 1e-06  ;;  %v486_v55 = vmul.f32 %v358_v12, %v358_v12  ;;  %5267 = vmatprep.subr.bf16.mxu0 %v5266_v48 }
  0xba   : > { %1350 = vmatprep.mubr.f32.mxu1 %v9178_v45  ;;  %v5268_v38 = vpack.c.bf16 %v6416_v42, %v6410_v31  ;;  %v5270_v11 = vpack.c.bf16 %v6440_v29, %v6428_v13  ;;  %v629_v52 = vmul.f32 %v501_v14, %v373_v3  ;;  %v359_v26 = vmax.f32 %v231_v59, 1e-06  ;;  %v250_v42 = vld [vmem:[%s6296_s24 + $0x1a8] sm:$0xff] }
  0xbb   : > { %9176 = vst [vmem:[#allocation28_spill] sm:$0xff] %v6715_v43  ;;  %5293 = vmatpush3.bf16.msra.mxu1 %v6342_v58  ;;  %v630_v33 = vmul.f32 %v502_v21, %v374_v61  ;;  %v503_v45 = vmul.f32 %v375_v17, %v375_v17  ;;  %v504_v41 = vmul.f32 %v376_v27, %v376_v27  ;;  %v360_v31 = vmax.f32 %v232_v4, 1e-06 }
  0xbc   : > { %5295 = vmatprep.subr.bf16.mxu1 %v6369_v25  ;;  %v6731_v34 = vmul.f32 %v485_v51, %v357_v1  ;;  %v6734_v43 = vmul.f32 %v486_v55, %v358_v12  ;;  %5269 = vmatpush3.bf16.msra.mxu0 %v5268_v38  ;;  %v5272_v13 = vpack.c.bf16 %v6450_v8, %v6442_v47  ;;  %v1680_v3 = vand.u32 4294901760, %v629_v52  ;;  %v233_v51 = vld [vmem:[%s6296_s24 + $0x120] sm:$0xff] }
  0xbd   : > { %v5274_v29 = vpack.c.bf16 %v6474_v63, %v6462_v5  ;;  %v487_v61 = vmul.f32 %v359_v26, %v359_v26  ;;  %5271 = vmatprep.subr.bf16.mxu0 %v5270_v11  ;;  %v1683_v1 = vand.u32 4294901760, %v630_v33  ;;  %v631_v59 = vmul.f32 %v503_v45, %v375_v17  ;;  %v251_v45 = vld [vmem:[%s6296_s24 + $0x1b0] sm:$0xff] }
  0xbe   : > { %v632_v48 = vmul.f32 %v504_v41, %v376_v27  ;;  %v377_v12 = vmax.f32 %v249_v30, 1e-06  ;;  %v5276_v14 = vpack.c.bf16 %v6484_v37, %v6476_v22  ;;  %v5278_v47 = vpack.c.bf16 %v6508_v23, %v6496_v16  ;;  %v234_v27 = vld [vmem:[%s6296_s24 + $0x128] sm:$0xff] }
  0xbf   : > { %5297 = vmatpush3.bf16.msra.mxu1 %v6378_v35  ;;  %v1632_v5 = vand.u32 4294901760, %v6731_v34  ;;  %v378_v8 = vmax.f32 %v250_v42, 1e-06  ;;  %v5280_v63 = vpack.c.bf16 %v6518_v0, %v6510_v2  ;;  %v5282_v21 = vpack.c.bf16 %v6542_v9, %v6529_v10 }
  0xc0   : > { %5299 = vmatprep.subr.bf16.mxu1 %v6404_v20  ;;  %v1635_v41 = vand.u32 4294901760, %v6734_v43  ;;  %v488_v17 = vmul.f32 %v360_v31, %v360_v31  ;;  %5273 = vmatpush3.bf16.msra.mxu0 %v5272_v13  ;;  %v5284_v22 = vpack.c.bf16 %v6558_v7, %v6547_v53  ;;  %v9179_v16 = vand.u32 4294901760, %v6339_v57 }
  0xc1   : > { %v9180_v37 = vand.u32 4294901760, %v6346_v60  ;;  %v6763_v2 = vsub.f32 %v629_v52, %v1680_v3  ;;  %v615_v0 = vmul.f32 %v487_v61, %v359_v26  ;;  %5275 = vmatprep.subr.bf16.mxu0 %v5274_v29  ;;  %v6766_v55 = vsub.f32 %v630_v33, %v1683_v1  ;;  %v9184_v52 = vld [vmem:[#allocation13_spill] sm:$0xff]  ;;  %v9186_v26 = vld [vmem:[#allocation14_spill] sm:$0xff] }
  0xc2   : > { %v1686_v38 = vand.u32 4294901760, %v631_v59  ;;  %v1689_v11 = vand.u32 4294901760, %v632_v48  ;;  %v505_v4 = vmul.f32 %v377_v12, %v377_v12  ;;  %v6771_v57 = vsub.f32 %v6731_v34, %v1632_v5 }
  0xc3   : > { %v6761_v23 = vpack.c.bf16 %v9180_v37, %v9179_v16  ;;  %9181 = vst [vmem:[#allocation30_spill] sm:$0xff] %v6763_v2  ;;  %5301 = vmatpush3.bf16.msra.mxu1 %v6414_v40  ;;  %9182 = vst [vmem:[#allocation31_spill] sm:$0xff] %v6766_v55  ;;  %v506_v60 = vmul.f32 %v378_v8, %v378_v8  ;;  %v361_v53 = vmax.f32 %v233_v51, 1e-06  ;;  %v362_v7 = vmax.f32 %v234_v27, 1e-06 }
  0xc4   : > { %5303 = vmatprep.subr.bf16.mxu1 %v6438_v28  ;;  %9183 = vst [vmem:[#allocation32_spill] sm:$0xff] %v6771_v57  ;;  %v9185_v30 = vand.u32 4294901760, %v9184_v52  ;;  %v9187_v42 = vand.u32 4294901760, %v9186_v26  ;;  %v9188_v33 = vand.u32 4294901760, %v6529_v10  ;;  %v9189_v29 = vand.u32 4294901760, %v6542_v9  ;;  %5277 = vmatpush3.bf16.msra.mxu0 %v5276_v14 }
  0xc5   : > { %v6786_v16 = vsub.f32 %v6734_v43, %v1635_v41  ;;  %v616_v34 = vmul.f32 %v488_v17, %v360_v31  ;;  %v6788_v51 = vpack.c.bf16 %v1683_v1, %v1680_v3  ;;  %v1638_v27 = vand.u32 4294901760, %v615_v0  ;;  %5279 = vmatprep.subr.bf16.mxu0 %v5278_v47  ;;  %v252_v43 = vld [vmem:[%s6296_s24 + $0x1b8] sm:$0xff]  ;;  %v9195_v31 = vld [vmem:[#allocation16_spill] sm:$0xff] }
  0xc6   : > { %v6777_v13 = vpack.c.bf16 %v9187_v42, %v9185_v30  ;;  %v6783_v61 = vpack.c.bf16 %v9189_v29, %v9188_v33  ;;  %v8932_v37 = vand.u32 4294901760, %v6763_v2  ;;  %v379_v52 = vmax.f32 %v251_v45, 1e-06  ;;  %v9192_v30 = vld [vmem:[#allocation15_spill] sm:$0xff]  ;;  %v236_v29 = vld [vmem:[%s6296_s24 + $0x138] sm:$0xff] }
  0xc7   : > { %9190 = vst [vmem:[#allocation13_spill] sm:$0xff] %v6786_v16  ;;  %9191 = vst [vmem:[#allocation14_spill] sm:$0xff] %v6788_v51  ;;  %5305 = vmatpush3.bf16.msra.mxu1 %v9192_v30  ;;  %v6792_v26 = vsub.f32 %v631_v59, %v1686_v38  ;;  %v6794_v10 = vsub.f32 %v632_v48, %v1689_v11  ;;  %v633_v9 = vmul.f32 %v505_v4, %v377_v12  ;;  %v9198_v17 = vld [vmem:[#allocation17_spill] sm:$0xff] }
  0xc8   : > { %v8936_v42 = vand.u32 4294901760, %v6766_v55  ;;  %5307 = vmatprep.subr.bf16.mxu1 %v9195_v31  ;;  %v634_v3 = vmul.f32 %v506_v60, %v378_v8  ;;  %v489_v1 = vmul.f32 %v361_v53, %v361_v53  ;;  %v490_v14 = vmul.f32 %v362_v7, %v362_v7  ;;  %5281 = vmatpush3.bf16.msra.mxu0 %v5280_v63  ;;  %v235_v60 = vld [vmem:[%s6296_s24 + $0x130] sm:$0xff] }
  0xc9   : > { %9193 = vst [vmem:[#allocation15_spill] sm:$0xff] %v6792_v26  ;;  %9194 = vst [vmem:[#allocation33_spill] sm:$0xff] %v6794_v10  ;;  %v6800_v47 = vpack.c.bf16 %v1635_v41, %v1632_v5  ;;  %v6802_v45 = vpack.c.bf16 %v1689_v11, %v1686_v38  ;;  %v1641_v59 = vand.u32 4294901760, %v616_v34  ;;  %v6805_v12 = vsub.f32 %v615_v0, %v1638_v27  ;;  %v9199_v38 = vld [vmem:[#allocation18_spill] sm:$0xff] }
  0xca   : > { %v1859_v4 = vsub.f32 %v6763_v2, %v8932_v37  ;;  %v380_v33 = vmax.f32 %v252_v43, 1e-06  ;;  %v507_v8 = vmul.f32 %v379_v52, %v379_v52  ;;  %5283 = vmatprep.subr.bf16.mxu0 %v5282_v21  ;;  %v1692_v5 = vand.u32 4294901760, %v633_v9 }
  0xcb   : > { %9196 = vst [vmem:[#allocation16_spill] sm:$0xff] %v6800_v47  ;;  %9197 = vst [vmem:[#allocation34_spill] sm:$0xff] %v6802_v45  ;;  %5309 = vmatpush3.bf16.msra.mxu1 %v9198_v17  ;;  %v1866_v41 = vsub.f32 %v6766_v55, %v8936_v42  ;;  %v1695_v11 = vand.u32 4294901760, %v634_v3  ;;  %v617_v43 = vmul.f32 %v489_v1, %v361_v53  ;;  %v9200_v48 = vand.u32 4294901760, %v6771_v57  ;;  %v9203_v1 = vld [vmem:[#allocation19_spill] sm:$0xff] }
  0xcc   : > { %5311 = vmatprep.subr.bf16.mxu1 %v9199_v38  ;;  %v618_v37 = vmul.f32 %v490_v14, %v362_v7  ;;  %v6822_v2 = vpack.c.bf16 %v1641_v59, %v1638_v27  ;;  %v9202_v45 = vand.u32 4294901760, %v6786_v16  ;;  %v363_v63 = vmax.f32 %v235_v60, 1e-06  ;;  %5285 = vmatpush3.bf16.msra.mxu0 %v5284_v22  ;;  %v253_v7 = vld [vmem:[%s6296_s24 + $0x1c0] sm:$0xff] }
  0xcd   : > { %v1747_v21 = vsub.f32 %v6771_v57, %v9200_v48  ;;  %v364_v55 = vmax.f32 %v236_v29, 1e-06  ;;  %v6827_v0 = vsub.f32 %v616_v34, %v1641_v59  ;;  %v1860_v47 = vand.u32 4294901760, %v1859_v4  ;;  %5319 = vmatprep.subr.bf16.mxu0 %v6761_v23  ;;  %v254_v59 = vld [vmem:[%s6296_s24 + $0x1c8] sm:$0xff]  ;;  %v9206_v4 = vld [vmem:[#allocation21_spill] sm:$0xff] }
  0xce   : > { %9201 = vst [vmem:[#allocation17_spill] sm:$0xff] %v6822_v2  ;;  %v1754_v42 = vsub.f32 %v6786_v16, %v9202_v45  ;;  %v508_v51 = vmul.f32 %v380_v33, %v380_v33  ;;  %v6829_v53 = vmul.f32 %v507_v8, %v379_v52  ;;  %v6834_v27 = vsub.f32 %v633_v9, %v1692_v5 }
  0xcf   : > { %5313 = vmatpush3.bf16.msra.mxu1 %v9203_v1  ;;  %v1867_v14 = vand.u32 4294901760, %v1866_v41  ;;  %v9204_v48 = vand.u32 4294901760, %v6792_v26  ;;  %v9205_v22 = vand.u32 4294901760, %v6794_v10  ;;  %v6844_v52 = vpack.c.bf16 %v1695_v11, %v1692_v5  ;;  %1246 = vmatmul.mubr.f32.vlgmr.msra.gmra.mrb[2].mxu0 %v6605_v15 }
  0xd0   : > { %5315 = vmatprep.subr.bf16.mxu1 %v9206_v4  ;;  %v1644_v8 = vand.u32 4294901760, %v617_v43  ;;  %v1647_v23 = vand.u32 4294901760, %v618_v37  ;;  %v1748_v60 = vand.u32 4294901760, %v1747_v21  ;;  %v1755_v9 = vand.u32 4294901760, %v1754_v42  ;;  %5321 = vmatpush3.bf16.msra.mxu0 %v6777_v13  ;;  %v9209_v42 = vld [vmem:[#allocation23_spill] sm:$0xff] }
  0xd1   : > { %v1873_v45 = vsub.f32 %v6792_v26, %v9204_v48  ;;  %v1880_v34 = vsub.f32 %v6794_v10, %v9205_v22  ;;  %9207 = vst [vmem:[#allocation18_spill] sm:$0xff] %v6844_v52  ;;  %v491_v29 = vmul.f32 %v363_v63, %v363_v63  ;;  %v492_v41 = vmul.f32 %v364_v55, %v364_v55  ;;  %v238_v21 = vld [vmem:[%s6296_s24 + $0x148] sm:$0xff] }
  0xd2   : > { %v381_v16 = vmax.f32 %v253_v7, 1e-06  ;;  %4322 = vmatprep.mubr.msk.f32.mxu0 %vm745_vm0, %v9171_v32  ;;  %v636_v22 = vmul.f32 %v508_v51, %v380_v33  ;;  %v1698_v5 = vand.u32 4294901760, %v6829_v53  ;;  %v382_v10 = vmax.f32 %v254_v59, 1e-06  ;;  %5323 = vmatprep.subr.bf16.mxu0 %v6639_v62  ;;  %v237_v62 = vld [vmem:[%s6296_s24 + $0x140] sm:$0xff] }
  0xd3   : > { %5317 = vmatpush3.bf16.msra.mxu1 %v9209_v42  ;;  %v6856_v7 = vsub.f32 %v634_v3, %v1695_v11  ;;  %v6858_v13 = vpack.c.bf16 %v1867_v14, %v1860_v47  ;;  %v1874_v26 = vand.u32 4294901760, %v1873_v45  ;;  %v1881_v57 = vand.u32 4294901760, %v1880_v34 }
  0xd4   : > { %5351 = vmatprep.subr.bf16.mxu1 %v6318_v39  ;;  %v6861_v52 = vpack.c.bf16 %v1647_v23, %v1644_v8  ;;  %v6863_v51 = vsub.f32 %v617_v43, %v1644_v8  ;;  %v6865_v33 = vsub.f32 %v618_v37, %v1647_v23  ;;  %v8955_v59 = vand.u32 4294901760, %v6827_v0  ;;  %5325 = vmatpush3.bf16.msra.mxu0 %v6645_v24  ;;  %v255_v8 = vld [vmem:[%s6296_s24 + $0x1d0] sm:$0xff] }
  0xd5   : > { %v6870_v2 = vpack.c.bf16 %v1755_v9, %v1748_v60  ;;  %v619_v3 = vmul.f32 %v491_v29, %v363_v63  ;;  %v620_v47 = vmul.f32 %v492_v41, %v364_v55  ;;  %v509_v11 = vmul.f32 %v381_v16, %v381_v16  ;;  %5327 = vmatprep.subr.bf16.mxu0 %v6653_v19 }
  0xd6   : > { %9210 = vst [vmem:[#allocation19_spill] sm:$0xff] %v6861_v52  ;;  %9211 = vst [vmem:[#allocation21_spill] sm:$0xff] %v6863_v51  ;;  %v9213_v39 = vand.u32 4294901760, %v6605_v15  ;;  %v1701_v14 = vand.u32 4294901760, %v636_v22  ;;  %v6876_v43 = vsub.f32 %v6829_v53, %v1698_v5  ;;  %v9214_v37 = vand.u32 4294901760, %v6805_v12 }
  0xd7   : > { %9212 = vst [vmem:[#allocation24_spill] sm:$0xff] %v6865_v33  ;;  %v510_v34 = vmul.f32 %v382_v10, %v382_v10  ;;  %v6884_v55 = vpack.c.bf16 %v1881_v57, %v1874_v26  ;;  %v8954_v15 = vand.u32 4294901760, %v6834_v27  ;;  %v365_v24 = vmax.f32 %v237_v62, 1e-06  ;;  %v256_v26 = vld [vmem:[%s6296_s24 + $0x1d8] sm:$0xff] }
  0xd8   : > { %1354 = vmatmul.mubr.f32.vlgmr.msra.gmra.mrb[2].mxu1 %v9213_v39  ;;  %v1761_v45 = vsub.f32 %v6805_v12, %v9214_v37  ;;  %v366_v63 = vmax.f32 %v238_v21, 1e-06  ;;  %v1768_v53 = vsub.f32 %v6827_v0, %v8955_v59  ;;  %v8953_v19 = vand.u32 4294901760, %v6856_v7  ;;  %5329 = vmatpush3.bf16.msra.mxu0 %v6659_v54 }
  0xd9   : > { %5353 = vmatpush3.bf16.msra.mxu1 %v6321_v44  ;;  %4324 = vmatprep.mubr.msk.f32.mxu1 %vm745_vm0, %v9171_v32  ;;  %v8952_v44 = vand.u32 4294901760, %v6863_v51  ;;  %v8951_v57 = vand.u32 4294901760, %v6865_v33  ;;  %v1650_v23 = vand.u32 4294901760, %v619_v3  ;;  %v1653_v60 = vand.u32 4294901760, %v620_v47 }
  0xda   : > { %5355 = vmatprep.subr.bf16.mxu1 %v6329_v49  ;;  %v637_v9 = vmul.f32 %v509_v11, %v381_v16  ;;  %v383_v49 = vmax.f32 %v255_v8, 1e-06  ;;  %v6900_v29 = vpack.c.bf16 %v1701_v14, %v1698_v5  ;;  %v6902_v41 = vsub.f32 %v636_v22, %v1701_v14  ;;  %5331 = vmatprep.subr.bf16.mxu0 %v6665_v6  ;;  %v257_v8 = vld [vmem:[%s6296_s24 + $0x1e0] sm:$0xff] }
  0xdb   : > { %v1762_v48 = vand.u32 4294901760, %v1761_v45  ;;  %v638_v21 = vmul.f32 %v510_v34, %v382_v10  ;;  %v1887_v62 = vsub.f32 %v6834_v27, %v8954_v15  ;;  %v493_v39 = vmul.f32 %v365_v24, %v365_v24 }
  0xdc   : > { %9215 = vst [vmem:[#allocation23_spill] sm:$0xff] %v6900_v29  ;;  %v494_v16 = vmul.f32 %v366_v63, %v366_v63  ;;  %v384_v11 = vmax.f32 %v256_v26, 1e-06  ;;  %v1769_v54 = vand.u32 4294901760, %v1768_v53  ;;  %v1894_v10 = vsub.f32 %v6856_v7, %v8953_v19  ;;  %5333 = vmatpush3.bf16.msra.mxu0 %v6671_v46  ;;  %v240_v26 = vld [vmem:[%s6296_s24 + $0x158] sm:$0xff] }
  0xdd   : > { %5357 = vmatpush3.bf16.msra.mxu1 %v6342_v58  ;;  %v1775_v6 = vsub.f32 %v6863_v51, %v8952_v44  ;;  %v1782_v58 = vsub.f32 %v6865_v33, %v8951_v57  ;;  %v6919_v22 = vpack.c.bf16 %v1653_v60, %v1650_v23  ;;  %v6921_v5 = vsub.f32 %v619_v3, %v1650_v23 }
  0xde   : > { %5359 = vmatprep.subr.bf16.mxu1 %v6369_v25  ;;  %v1704_v14 = vand.u32 4294901760, %v637_v9  ;;  %v511_v37 = vmul.f32 %v383_v49, %v383_v49  ;;  %v239_v25 = vld [vmem:[%s6296_s24 + $0x150] sm:$0xff]  ;;  %v1707_v45 = vand.u32 4294901760, %v638_v21  ;;  %v512_v34 = vmul.f32 %v384_v11, %v384_v11  ;;  %5335 = vmatprep.subr.bf16.mxu0 %v6678_v36 }
  0xdf   : > { %9216 = vst [vmem:[#allocation35_spill] sm:$0xff] %v6919_v22  ;;  %v6930_v3 = vsub.f32 %v620_v47, %v1653_v60  ;;  %v1888_v23 = vand.u32 4294901760, %v1887_v62  ;;  %v621_v57 = vmul.f32 %v493_v39, %v365_v24  ;;  %v622_v44 = vmul.f32 %v494_v16, %v366_v63  ;;  %v241_v16 = vld [vmem:[%s6296_s24 + $0x160] sm:$0xff] }
  0xe0   : > { %v1895_v46 = vand.u32 4294901760, %v1894_v10  ;;  %v1776_v19 = vand.u32 4294901760, %v1775_v6  ;;  %v1783_v15 = vand.u32 4294901760, %v1782_v58  ;;  %v367_v59 = vmax.f32 %v239_v25, 1e-06  ;;  %5337 = vmatpush3.bf16.msra.mxu0 %v6684_v50  ;;  %v242_v58 = vld [vmem:[%s6296_s24 + $0x168] sm:$0xff] }
  0xe1   : > { %5361 = vmatpush3.bf16.msra.mxu1 %v6378_v35  ;;  %v6934_v33 = vpack.c.bf16 %v1769_v54, %v1762_v48  ;;  %v6936_v53 = vsub.f32 %v637_v9, %v1704_v14  ;;  %v639_v36 = vmul.f32 %v511_v37, %v383_v49  ;;  %v368_v51 = vmax.f32 %v240_v26, 1e-06  ;;  %v258_v35 = vld [vmem:[%s6296_s24 + $0x1e8] sm:$0xff]  ;;  %v9220_v9 = vld [vmem:[#allocation26_spill] sm:$0xff] }
  0xe2   : > { %5363 = vmatprep.subr.bf16.mxu1 %v6404_v20  ;;  %v6940_v47 = vpack.c.bf16 %v1707_v45, %v1704_v14  ;;  %v6942_v24 = vmul.f32 %v512_v34, %v384_v11  ;;  %v9218_v20 = vand.u32 4294901760, %v6876_v43  ;;  %v9219_v60 = vand.u32 4294901760, %v6902_v41  ;;  %5339 = vmatprep.subr.bf16.mxu0 %v9220_v9 }
  0xe3   : > { %v6952_v49 = vsub.f32 %v638_v21, %v1707_v45  ;;  %v1656_v50 = vand.u32 4294901760, %v621_v57  ;;  %v1659_v62 = vand.u32 4294901760, %v622_v44  ;;  %v385_v39 = vmax.f32 %v257_v8, 1e-06  ;;  %v9221_v21 = vld [vmem:[#allocation27_spill] sm:$0xff] }
  0xe4   : > { %9217 = vst [vmem:[#allocation36_spill] sm:$0xff] %v6940_v47  ;;  %v1901_v63 = vsub.f32 %v6876_v43, %v9218_v20  ;;  %v1908_v48 = vsub.f32 %v6902_v41, %v9219_v60  ;;  %v6956_v11 = vpack.c.bf16 %v1895_v46, %v1888_v23  ;;  %v6958_v54 = vpack.c.bf16 %v1783_v15, %v1776_v19  ;;  %v259_v60 = vld [vmem:[%s6296_s24 + $0x1f0] sm:$0xff] }
  0xe5   : > { %5365 = vmatpush3.bf16.msra.mxu1 %v6414_v40  ;;  %v495_v10 = vmul.f32 %v367_v59, %v367_v59  ;;  %v386_v6 = vmax.f32 %v258_v35, 1e-06  ;;  %v1710_v14 = vand.u32 4294901760, %v639_v36  ;;  %v496_v37 = vmul.f32 %v368_v51, %v368_v51  ;;  %5341 = vmatpush3.bf16.msra.mxu0 %v9221_v21 }
  0xe6   : > { %5367 = vmatprep.subr.bf16.mxu1 %v6438_v28  ;;  %v8963_v25 = vand.u32 4294901760, %v6921_v5  ;;  %v8962_v40 = vand.u32 4294901760, %v6930_v3  ;;  %v1713_v45 = vand.u32 4294901760, %v6942_v24  ;;  %v1902_v34 = vand.u32 4294901760, %v1901_v63  ;;  %5343 = vmatprep.subr.bf16.mxu0 %v6709_v56 }
  0xe7   : > { %v1909_v28 = vand.u32 4294901760, %v1908_v48  ;;  %v369_v8 = vmax.f32 %v241_v16, 1e-06  ;;  %v6967_v15 = vpack.c.bf16 %v1659_v62, %v1656_v50  ;;  %v513_v19 = vmul.f32 %v385_v39, %v385_v39 }
  0xe8   : > { %v8960_v26 = vand.u32 4294901760, %v6936_v53  ;;  %v370_v23 = vmax.f32 %v242_v58, 1e-06  ;;  %v6971_v46 = vsub.f32 %v621_v57, %v1656_v50  ;;  %v6973_v35 = vmul.f32 %v495_v10, %v367_v59  ;;  %v9223_v57 = vld [vmem:[#allocation28_spill] sm:$0xff] }
  0xe9   : > { %5369 = vmatpush3.bf16.msra.mxu1 %v9192_v30  ;;  %9222 = vst [vmem:[#allocation26_spill] sm:$0xff] %v6967_v15  ;;  %v514_v20 = vmul.f32 %v386_v6, %v386_v6  ;;  %v8961_v63 = vand.u32 4294901760, %v6952_v49  ;;  %v6977_v56 = vsub.f32 %v622_v44, %v1659_v62  ;;  %v6979_v30 = vmul.f32 %v496_v37, %v368_v51  ;;  %v260_v51 = vld [vmem:[%s6296_s24 + $0x1f8] sm:$0xff]  ;;  %v243_v37 = vld [vmem:[%s6296_s24 + $0x170] sm:$0xff] }
  0xea   : > { %5371 = vmatprep.subr.bf16.mxu1 %v9195_v31  ;;  %v1789_v48 = vsub.f32 %v6921_v5, %v8963_v25  ;;  %v1796_v31 = vsub.f32 %v6930_v3, %v8962_v40  ;;  %5345 = vmatpush3.bf16.msra.mxu0 %v9223_v57  ;;  %v6988_v59 = vpack.c.bf16 %v1713_v45, %v1710_v14  ;;  %v387_v58 = vmax.f32 %v259_v60, 1e-06  ;;  %v9224_v60 = vld [vmem:[#allocation29_spill] sm:$0xff] }
  0xeb   : > { %v6990_v9 = vsub.f32 %v639_v36, %v1710_v14  ;;  %v6992_v44 = vpack.c.bf16 %v1909_v28, %v1902_v34  ;;  %v497_v50 = vmul.f32 %v369_v8, %v369_v8  ;;  %5347 = vmatprep.subr.bf16.mxu0 %v6783_v61  ;;  %v6997_v62 = vmul.f32 %v513_v19, %v385_v39  ;;  %v244_v39 = vld [vmem:[%s6296_s24 + $0x178] sm:$0xff] }
  0xec   : > { %v1915_v16 = vsub.f32 %v6936_v53, %v8960_v26  ;;  %v498_v10 = vmul.f32 %v370_v23, %v370_v23  ;;  %v8967_v36 = vand.u32 4294901760, %v6973_v35  ;;  %v7005_v14 = vmul.f32 %v514_v20, %v386_v6  ;;  %v9225_v26 = vld [vmem:[#allocation14_spill] sm:$0xff] }
  0xed   : > { %5373 = vmatpush3.bf16.msra.mxu1 %v9198_v17  ;;  %v1922_v61 = vsub.f32 %v6952_v49, %v8961_v63  ;;  %v8964_v17 = vand.u32 4294901760, %v6971_v46  ;;  %v8965_v21 = vand.u32 4294901760, %v6979_v30  ;;  %v1790_v34 = vand.u32 4294901760, %v1789_v48 }
  0xee   : > { %5375 = vmatprep.subr.bf16.mxu1 %v9199_v38  ;;  %v388_v28 = vmax.f32 %v260_v51, 1e-06  ;;  %v515_v19 = vmul.f32 %v387_v58, %v387_v58  ;;  %5349 = vmatpush3.bf16.msra.mxu0 %v9224_v60  ;;  %v1797_v57 = vand.u32 4294901760, %v1796_v31  ;;  %v7014_v38 = vmul.f32 %v497_v50, %v369_v8  ;;  %v9228_v60 = vld [vmem:[#allocation34_spill] sm:$0xff] }
  0xef   : > { %v8966_v6 = vand.u32 4294901760, %v6977_v56  ;;  %v371_v20 = vmax.f32 %v243_v37, 1e-06  ;;  %5383 = vmatprep.subr.bf16.mxu0 %v9225_v26  ;;  %v8968_v63 = vand.u32 4294901760, %v6997_v62  ;;  %v1916_v40 = vand.u32 4294901760, %v1915_v16 }
  0xf0   : > { %v7020_v25 = vmul.f32 %v498_v10, %v370_v23  ;;  %v372_v48 = vmax.f32 %v244_v39, 1e-06  ;;  %v8969_v51 = vand.u32 4294901760, %v7005_v14  ;;  %v1923_v31 = vand.u32 4294901760, %v1922_v61  ;;  %v9227_v10 = vld [vmem:[#allocation16_spill] sm:$0xff] }
  0xf1   : > { %5377 = vmatpush3.bf16.msra.mxu1 %v9203_v1  ;;  %v7027_v8 = vsub.f32 %v6971_v46, %v8964_v17  ;;  %v516_v50 = vmul.f32 %v388_v28, %v388_v28  ;;  %4323 = vmatmul.mubr.msk.f32.vlgmr.msra.gmra.mrb[4].mxu0 %vm744_vm1, %v9171_v32  ;;  %v7034_v1 = vsub.f32 %v6942_v24, %v1713_v45  ;;  %v8970_v24 = vand.u32 4294901760, %v7014_v38 }
  0xf2   : > { %5379 = vmatprep.subr.bf16.mxu1 %v9206_v4  ;;  %v7039_v4 = vsub.f32 %v6973_v35, %v8967_v36  ;;  %v7041_v23 = vmul.f32 %v515_v19, %v387_v58  ;;  %v499_v16 = vmul.f32 %v371_v20, %v371_v20  ;;  %5385 = vmatpush3.bf16.msra.mxu0 %v9227_v10 }
  0xf3   : > { %v7047_v61 = vsub.f32 %v6979_v30, %v8965_v21  ;;  %v7049_v39 = vpack.c.bf16 %v1797_v57, %v1790_v34  ;;  %v500_v45 = vmul.f32 %v372_v48, %v372_v48  ;;  %5387 = vmatprep.subr.bf16.mxu0 %v9228_v60  ;;  %v7058_v19 = vsub.f32 %v6977_v56, %v8966_v6 }
  0xf4   : > { %v7060_v17 = vmul.f32 %v516_v50, %v388_v28  ;;  %v726_v21 = vsub.s32 3, %v6538_v18  ;;  %v7067_v34 = vsub.f32 %v6997_v62, %v8968_v63  ;;  %v7074_v57 = vpack.c.bf16 %v1923_v31, %v1916_v40  ;;  %v9231_v63 = vld [vmem:[#allocation17_spill] sm:$0xff] }
  0xf5   : > { %5381 = vmatpush3.bf16.msra.mxu1 %v9209_v42  ;;  %v7072_v42 = vsub.f32 %v7005_v14, %v8969_v51  ;;  %v8971_v28 = vand.u32 4294901760, %v7041_v23  ;;  %v7079_v36 = vmul.f32 %v499_v16, %v371_v20  ;;  %v7092_v40 = vsub.f32 %v7014_v38, %v8970_v24 }
  0xf6   : > { %5415 = vmatprep.subr.bf16.mxu1 %v6858_v13  ;;  %v9229_v13 = vld [vmem:[#allocation22_spill] sm:$0xff]  ;;  %5389 = vmatpush3.bf16.msra.mxu0 %v9231_v63  ;;  %v8972_v31 = vand.u32 4294901760, %v7034_v1  ;;  %v7095_v6 = vmul.f32 %v500_v45, %v372_v48  ;;  %v722_v20 = vsub.s32 2, %v6538_v18  ;;  %v9233_v16 = vand.u32 4294901760, %v7020_v25 }
  0xf7   : > { %v7082_v58 = vrot.slane %v9229_v13, %v726_v21  ;;  %v9232_v21 = vld [vmem:[#allocation18_spill] sm:$0xff]  ;;  %v9236_v24 = vand.u32 4294901760, %v6990_v9  ;;  %v9237_v51 = vmov 0.0  }
  0xf8   : > { %4325 = vmatmul.mubr.msk.f32.vlgmr.msra.gmra.mrb[4].mxu1 %vm744_vm1, %v9171_v32  ;;  %5391 = vmatprep.subr.bf16.mxu0 %v9232_v21  ;;  %v7103_v37 = vsub.f32 %v7020_v25, %v9233_v16  ;;  %v7112_v48 = vrot.slane %v9229_v13, %v722_v20  ;;  %v7119_v16 = vsub.f32 %v7041_v23, %v8971_v28 }
  0xf9   : > { %9230 = vst [vmem:[#allocation27_spill] sm:$0xff] %v7082_v58  ;;  %5417 = vmatpush3.bf16.msra.mxu1 %v6870_v2  ;;  %vm747_vm2 = vcmp.eq.s32.totalorder %v7082_v58, %v6538_v18  ;;  %v1929_v50 = vsub.f32 %v6990_v9, %v9236_v24  ;;  %v1936_v20 = vsub.f32 %v7034_v1, %v8972_v31  ;;  %v9239_v2 = vand.u32 4294901760, %v7039_v4 }
  0xfa   : > { %9234 = vst [vmem:[#allocation28_spill] sm:$0xff] %v7103_v37  ;;  %5419 = vmatprep.subr.bf16.mxu1 %v6884_v55  ;;  %9235 = vst [vmem:[#allocation29_spill] sm:$0xff] %v7112_v48  ;;  %v4315_v13 = vsel %vm747_vm2, 1.0, %v9237_v51  ;;  %4326 = vmatprep.mubr.msk.f32.mxu1 %vm747_vm2, %v9171_v32  ;;  %vm746_vm3 = vcmp.eq.s32.totalorder %v7112_v48, %v6538_v18  ;;  %v9238_v55 = vand.u32 4294901760, %v7060_v17  ;;  %v9240_v24 = vand.u32 4294901760, %v7047_v61 }
  0xfb   : > { %5393 = vmatpush3.bf16.msra.mxu0 %v6861_v52  ;;  %v7138_v28 = vsub.f32 %v4315_v13, %v4315_v13  ;;  %v1817_v31 = vsub.f32 %v7039_v4, %v9239_v2  ;;  %v4314_v58 = vsel %vm746_vm3, 1.0, %v9237_v51  ;;  %v9242_v52 = vand.u32 4294901760, %v7072_v42 }
  0xfc   : > { %5395 = vmatprep.subr.bf16.mxu0 %v6900_v29  ;;  %v7147_v45 = vsub.f32 %v7060_v17, %v9238_v55  ;;  %v1824_v13 = vsub.f32 %v7047_v61, %v9240_v24  ;;  %v9241_v55 = vand.u32 4294901760, %v7067_v34  ;;  %v9243_v24 = vand.u32 4294901760, %v7079_v36 }
  0xfd   : > { %5421 = vmatpush3.bf16.msra.mxu1 %v6934_v33  ;;  %v1950_v2 = vsub.f32 %v7072_v42, %v9242_v52  ;;  %v7173_v51 = vsub.f32 %v4314_v58, %v4314_v58  ;;  %v1930_v60 = vand.u32 4294901760, %v1929_v50  ;;  %v9245_v52 = vand.u32 4294901760, %v7095_v6 }
  0xfe   : > { %5423 = vmatprep.subr.bf16.mxu1 %v6956_v11  ;;  %v1943_v29 = vsub.f32 %v7067_v34, %v9241_v55  ;;  %v7171_v63 = vsub.f32 %v7079_v36, %v9243_v24  ;;  %v1837_v11 = vand.u32 4294901760, %v7103_v37  ;;  %v1811_v55 = vand.u32 4294901760, %v7058_v19 }
  0xff   : > { %9244 = vst [vmem:[#allocation14_spill] sm:$0xff] %v7173_v51  ;;  %5397 = vmatpush3.bf16.msra.mxu0 %v6919_v22  ;;  %v7182_v21 = vsub.f32 %v7095_v6, %v9245_v52  ;;  %v9246_v10 = vand.u32 4294901760, %v7138_v28  ;;  %v1937_v58 = vand.u32 4294901760, %v1936_v20  ;;  %v1818_v33 = vand.u32 4294901760, %v1817_v31 }
 0x100   : > { %5399 = vmatprep.subr.bf16.mxu0 %v6940_v47  ;;  %v1825_v18 = vand.u32 4294901760, %v1824_v13  ;;  %v1963_v22 = vand.u32 4294901760, %v7147_v45  ;;  %v1944_v50 = vand.u32 4294901760, %v1943_v29  ;;  %v1951_v48 = vand.u32 4294901760, %v1950_v2 }
 0x101   : > { %v1730_v24 = vsub.f32 %v7138_v28, %v9246_v10  ;;  %5425 = vmatpush3.bf16.msra.mxu1 %v6958_v54  ;;  %v9247_v52 = vand.u32 4294901760, %v7092_v40  ;;  %v1838_v47 = vsub.f32 %v7103_v37, %v1837_v11  ;;  %v9248_v54 = vand.u32 4294901760, %v7119_v16 }
 0x102   : > { %5427 = vmatprep.subr.bf16.mxu1 %v6992_v44  ;;  %v1844_v20 = vand.u32 4294901760, %v7171_v63  ;;  %v9249_v44 = vand.u32 4294901760, %v6973_v35  ;;  %v9250_v29 = vand.u32 4294901760, %v6979_v30  ;;  %v9252_v2 = vand.u32 4294901760, %v6997_v62 }
 0x103   : > { %v1731_v19 = vand.u32 4294901760, %v1730_v24  ;;  %v1831_v32 = vsub.f32 %v7092_v40, %v9247_v52  ;;  %v1957_v31 = vsub.f32 %v7119_v16, %v9248_v54  ;;  %5401 = vmatpush3.bf16.msra.mxu0 %v6967_v15  ;;  %v9253_v24 = vand.u32 4294901760, %v7005_v14 }
 0x104   : > { %v7205_v13 = vpack.c.bf16 %v9250_v29, %v9249_v44  ;;  %v9255_v10 = vand.u32 4294901760, %v7014_v38  ;;  %v9256_v54 = vand.u32 4294901760, %v7020_v25  ;;  %v1851_v15 = vand.u32 4294901760, %v7182_v21  ;;  %5403 = vmatprep.subr.bf16.mxu0 %v6988_v59 }
 0x105   : > { %v7211_v52 = vpack.c.bf16 %v9253_v24, %v9252_v2  ;;  %1732 = vmatprep.mubr.f32.mxu0 %v1731_v19  ;;  %5429 = vmatpush3.bf16.msra.mxu1 %v7049_v39  ;;  %v9257_v35 = vand.u32 4294901760, %v7027_v8  ;;  %v5434_v62 = vpack.c.bf16 %v1937_v58, %v1930_v60  ;;  %v1964_v14 = vsub.f32 %v7147_v45, %v1963_v22 }
 0x106   : > { %9251 = vst [vmem:[#allocation25_spill] sm:$0xff] %v7205_v13  ;;  %v7217_v37 = vpack.c.bf16 %v9256_v54, %v9255_v10  ;;  %5431 = vmatprep.subr.bf16.mxu1 %v7074_v57  ;;  %v9258_v38 = vand.u32 4294901760, %v7041_v23  ;;  %v9259_v25 = vand.u32 4294901760, %v7060_v17  ;;  %v5436_v19 = vpack.c.bf16 %v1825_v18, %v1818_v33  ;;  %v9261_v23 = vld [vmem:[#allocation30_spill] sm:$0xff]  ;;  %v9263_v17 = vld [vmem:[#allocation31_spill] sm:$0xff]  ;;  %v9266_v18 = vld [vmem:[#allocation32_spill] sm:$0xff] }
 0x107   : > { %9254 = vst [vmem:[#allocation22_spill] sm:$0xff] %v7211_v52  ;;  %v5432_v30 = vpack.c.bf16 %v1811_v55, %v9257_v35  ;;  %v5438_v44 = vpack.c.bf16 %v1951_v48, %v1944_v50  ;;  %v1832_v29 = vand.u32 4294901760, %v1831_v32  ;;  %v9260_v2 = vand.u32 4294901760, %v7173_v51  ;;  %5405 = vmatpush3.bf16.msra.mxu0 %v7205_v13  ;;  %v9268_v48 = vld [vmem:[#allocation13_spill] sm:$0xff] }
 0x108   : > { %v7230_v10 = vpack.c.bf16 %v9259_v25, %v9258_v38  ;;  %v1839_v8 = vand.u32 4294901760, %v1838_v47  ;;  %v1958_v55 = vand.u32 4294901760, %v1957_v31  ;;  %v1845_v60 = vsub.f32 %v7171_v63, %v1844_v20  ;;  %v9271_v47 = vld [vmem:[#allocation15_spill] sm:$0xff]  ;;  %v9273_v35 = vld [vmem:[#allocation33_spill] sm:$0xff]  ;;  %5407 = vmatprep.subr.bf16.mxu0 %v7211_v52 }
 0x109   : > { %v1736_v39 = vsub.f32 %v7173_v51, %v9260_v2  ;;  %v1852_v57 = vsub.f32 %v7182_v21, %v1851_v15  ;;  %v9262_v58 = vand.u32 4294901760, %v9261_v23  ;;  %v9264_v24 = vand.u32 4294901760, %v9263_v17  ;;  %5433 = vmatpush3.bf16.msra.mxu1 %v5432_v30 }
 0x10a   : > { %v9267_v32 = vand.u32 4294901760, %v9266_v18  ;;  %v9269_v33 = vand.u32 4294901760, %v9268_v48  ;;  %v9272_v31 = vand.u32 4294901760, %v9271_v47  ;;  %v9274_v38 = vand.u32 4294901760, %v9273_v35  ;;  %5435 = vmatprep.subr.bf16.mxu1 %v5434_v62 }
 0x10b   : > { %v7242_v54 = vpack.c.bf16 %v9264_v24, %v9262_v58  ;;  %v1965_v2 = vand.u32 4294901760, %v1964_v14  ;;  %v9276_v51 = vand.u32 4294901760, %v6805_v12  ;;  %v9277_v58 = vand.u32 4294901760, %v6827_v0  ;;  %5409 = vmatpush3.bf16.msra.mxu0 %v7217_v37 }
 0x10c   : > { %v7248_v50 = vpack.c.bf16 %v9269_v33, %v9267_v32  ;;  %v7254_v25 = vpack.c.bf16 %v9274_v38, %v9272_v31  ;;  %v9280_v32 = vand.u32 4294901760, %v6856_v7  ;;  %v9284_v38 = vld [vmem:[#allocation24_spill] sm:$0xff]  ;;  %v9286_v14 = vand.u32 4294901760, %v6876_v43  ;;  %5411 = vmatprep.subr.bf16.mxu0 %v7230_v10 }
 0x10d   : > { %9265 = vst [vmem:[#allocation30_spill] sm:$0xff] %v7242_v54  ;;  %v7261_v24 = vpack.c.bf16 %v9277_v58, %v9276_v51  ;;  %v9279_v54 = vand.u32 4294901760, %v6834_v27  ;;  %v9287_v51 = vand.u32 4294901760, %v6902_v41  ;;  %v9290_v52 = vand.u32 4294901760, %v6930_v3  ;;  %5437 = vmatpush3.bf16.msra.mxu1 %v5436_v19 }
 0x10e   : > { %9270 = vst [vmem:[#allocation31_spill] sm:$0xff] %v7248_v50  ;;  %9275 = vst [vmem:[#allocation32_spill] sm:$0xff] %v7254_v25  ;;  %v9282_v50 = vld [vmem:[#allocation21_spill] sm:$0xff]  ;;  %v9285_v25 = vand.u32 4294901760, %v9284_v38  ;;  %v9295_v62 = vand.u32 4294901760, %v6971_v46  ;;  %5439 = vmatprep.subr.bf16.mxu1 %v5438_v44 }
 0x10f   : > { %9278 = vst [vmem:[#allocation13_spill] sm:$0xff] %v7261_v24  ;;  %v7267_v33 = vpack.c.bf16 %v9280_v32, %v9279_v54  ;;  %v9283_v31 = vand.u32 4294901760, %v9282_v50  ;;  %v7279_v58 = vpack.c.bf16 %v9287_v51, %v9286_v14  ;;  %v9289_v24 = vand.u32 4294901760, %v6921_v5 }
 0x110   : > { %v9292_v32 = vand.u32 4294901760, %v6936_v53  ;;  %v9297_v14 = vand.u32 4294901760, %v6990_v9  ;;  %v9298_v51 = vand.u32 4294901760, %v7034_v1 }
 0x111   : > { %9281 = vst [vmem:[#allocation15_spill] sm:$0xff] %v7267_v33  ;;  %v7273_v30 = vpack.c.bf16 %v9285_v25, %v9283_v31  ;;  %9288 = vst [vmem:[#allocation33_spill] sm:$0xff] %v7279_v58  ;;  %v7285_v54 = vpack.c.bf16 %v9290_v52, %v9289_v24  ;;  %v9293_v33 = vand.u32 4294901760, %v6952_v49  ;;  %v9296_v25 = vand.u32 4294901760, %v6977_v56 }
 0x112   : > { %v7303_v58 = vpack.c.bf16 %v9298_v51, %v9297_v14  ;;  %v9300_v52 = vand.u32 4294901760, %v7039_v4  ;;  %v9301_v24 = vand.u32 4294901760, %v7047_v61  ;;  %v9307_v14 = vand.u32 4294901760, %v7079_v36 }
 0x113   : > { %9291 = vst [vmem:[#allocation21_spill] sm:$0xff] %v7285_v54  ;;  %v7291_v13 = vpack.c.bf16 %v9293_v33, %v9292_v32  ;;  %v7297_v31 = vpack.c.bf16 %v9296_v25, %v9295_v62  ;;  %v9302_v33 = vand.u32 4294901760, %v7067_v34  ;;  %v9303_v32 = vand.u32 4294901760, %v7072_v42 }
 0x114   : > { %9299 = vst [vmem:[#allocation37_spill] sm:$0xff] %v7303_v58  ;;  %v7309_v54 = vpack.c.bf16 %v9301_v24, %v9300_v52  ;;  %v9305_v62 = vand.u32 4294901760, %v7092_v40  ;;  %v9308_v51 = vand.u32 4294901760, %v7095_v6  ;;  %v9309_v52 = vand.u32 4294901760, %v7119_v16 }
 0x115   : > { %9294 = vst [vmem:[#allocation24_spill] sm:$0xff] %v7291_v13  ;;  %v7315_v13 = vpack.c.bf16 %v9303_v32, %v9302_v33  ;;  %v7332_v33 = vpack.c.bf16 %v1851_v15, %v1844_v20  ;;  %v277_v32 = vld [vmem:[%s6296_s24 + $0x280] sm:$0xff]  ;;  %v5440_v36 = vpack.c.bf16 %v1839_v8, %v1832_v29  ;;  %v1853_v6 = vand.u32 4294901760, %v1852_v57  ;;  %v280_v57 = vld [vmem:[%s6296_s24 + $0x298] sm:$0xff] }
 0x116   : > { %v7319_v25 = vpack.c.bf16 %v1837_v11, %v9305_v62  ;;  %v7326_v58 = vpack.c.bf16 %v9308_v51, %v9307_v14  ;;  %v7330_v24 = vpack.c.bf16 %v1963_v22, %v9309_v52  ;;  %v5446_v11 = vpack.c.bf16 %v9263_v17, %v9261_v23  ;;  %v261_v51 = vld [vmem:[%s6296_s24 + $0x200] sm:$0xff] }
 0x117   : > { %9304 = vst [vmem:[#allocation38_spill] sm:$0xff] %v7315_v13  ;;  %v278_v13 = vld [vmem:[%s6296_s24 + $0x288] sm:$0xff]  ;;  %v1846_v62 = vand.u32 4294901760, %v1845_v60  ;;  %v5442_v14 = vpack.c.bf16 %v1965_v2, %v1958_v55  ;;  %v405_v22 = vmax.f32 %v277_v32, 1e-06  ;;  %v5448_v15 = vpack.c.bf16 %v9268_v48, %v9266_v18  ;;  %5441 = vmatpush3.bf16.msra.mxu1 %v5440_v36  ;;  %v279_v60 = vld [vmem:[%s6296_s24 + $0x290] sm:$0xff] }
 0x118   : > { %9306 = vst [vmem:[#allocation39_spill] sm:$0xff] %v7319_v25  ;;  %9310 = vst [vmem:[#allocation40_spill] sm:$0xff] %v7330_v24  ;;  %v1737_v25 = vand.u32 4294901760, %v1736_v39  ;;  %v406_v52 = vmax.f32 %v278_v13, 1e-06  ;;  %v262_v24 = vld [vmem:[%s6296_s24 + $0x208] sm:$0xff]  ;;  %5413 = vmatpush3.bf16.msra.mxu0 %v7326_v58  ;;  %v5450_v20 = vpack.c.bf16 %v9273_v35, %v9271_v47  ;;  %v5452_v8 = vpack.c.bf16 %v6827_v0, %v6805_v12 }
 0x119   : > { %5447 = vmatprep.subr.bf16.mxu0 %v5446_v11  ;;  %v5444_v19 = vpack.c.bf16 %v1853_v6, %v1846_v62  ;;  %5443 = vmatprep.subr.bf16.mxu1 %v5442_v14  ;;  %v389_v44 = vmax.f32 %v261_v51, 1e-06  ;;  %v390_v29 = vmax.f32 %v262_v24, 1e-06  ;;  %v533_v39 = vmul.f32 %v405_v22, %v405_v22  ;;  %v9313_v47 = vld [vmem:[#allocation20_spill] sm:$0xff]  ;;  %v264_v32 = vld [vmem:[%s6296_s24 + $0x218] sm:$0xff] }
 0x11a   : > { %v534_v13 = vmul.f32 %v406_v52, %v406_v52  ;;  %v5454_v55 = vpack.c.bf16 %v6856_v7, %v6834_v27  ;;  %v9311_v12 = vmov 1.0   ;;  %v5456_v27 = vpack.c.bf16 %v9284_v38, %v9282_v50  ;;  %v263_v2 = vld [vmem:[%s6296_s24 + $0x210] sm:$0xff]  ;;  %v9315_v11 = vld [vmem:[#allocation34_spill] sm:$0xff] }
 0x11b   : > { %1738 = vmatmul.mubr.f32.vlgmr.msra.gmra.mrb[6].mxu0 %v1737_v25  ;;  %5445 = vmatpush3.bf16.msra.mxu1 %v5444_v19  ;;  %v517_v23 = vmul.f32 %v389_v44, %v389_v44  ;;  %v518_v17 = vmul.f32 %v390_v29, %v390_v29  ;;  %v7354_v18 = vmul.f32 %v533_v39, %v405_v22  ;;  %v407_v7 = vmax.f32 %v279_v60, 1e-06  ;;  %v9314_v25 = vld [vmem:[#allocation16_spill] sm:$0xff]  ;;  %v281_v50 = vld [vmem:[%s6296_s24 + $0x2a0] sm:$0xff]  ;;  %v266_v60 = vld [vmem:[%s6296_s24 + $0x228] sm:$0xff] }
 0x11c   : > { %5449 = vmatpush3.bf16.msra.mxu0 %v5448_v15  ;;  %2105 = vmatprep.mubr.f32.mxu0 %v7138_v28  ;;  %v7356_v48 = vmul.f32 %v534_v13, %v406_v52  ;;  %v408_v35 = vmax.f32 %v280_v57, 1e-06  ;;  %v5458_v24 = vpack.c.bf16 %v6902_v41, %v6876_v43  ;;  %v9316_v36 = vand.u32 4294901760, %v7138_v28  ;;  %v9317_v52 = vld [vmem:[#allocation17_spill] sm:$0xff]  ;;  %v265_v13 = vld [vmem:[%s6296_s24 + $0x220] sm:$0xff]  ;;  %v9321_v57 = vld [vmem:[#allocation19_spill] sm:$0xff] }
 0x11d   : > { %5451 = vmatprep.subr.bf16.mxu0 %v5450_v20  ;;  %5479 = vmatprep.subr.bf16.mxu1 %v9225_v26  ;;  %v7372_v62 = vmul.f32 %v517_v23, %v389_v44  ;;  %v7374_v6 = vmul.f32 %v518_v17, %v390_v29  ;;  %v2542_v38 = vand.u32 4294901760, %v7354_v18  ;;  %v391_v51 = vmax.f32 %v263_v2, 1e-06  ;;  %v282_v20 = vld [vmem:[%s6296_s24 + $0x2a8] sm:$0xff]  ;;  %v9318_v44 = vld [vmem:[#allocation18_spill] sm:$0xff] }
 0x11e   : > { %4327 = vmatmul.mubr.msk.f32.vlgmr.msra.gmra.mrb[6].mxu1 %vm746_vm3, %v9311_v12  ;;  %v2545_v14 = vand.u32 4294901760, %v7356_v48  ;;  %v5460_v43 = vpack.c.bf16 %v6930_v3, %v6921_v5  ;;  %v535_v41 = vmul.f32 %v407_v7, %v407_v7  ;;  %v536_v22 = vmul.f32 %v408_v35, %v408_v35 }
 0x11f   : > { %5481 = vmatpush3.bf16.msra.mxu1 %v9314_v25  ;;  %2212 = vmatprep.mubr.f32.mxu1 %v9316_v36  ;;  %v392_v28 = vmax.f32 %v264_v32, 1e-06  ;;  %v5462_v15 = vpack.c.bf16 %v6952_v49, %v6936_v53  ;;  %v409_v19 = vmax.f32 %v281_v50, 1e-06  ;;  %v5464_v29 = vpack.c.bf16 %v6977_v56, %v6971_v46  ;;  %v284_v36 = vld [vmem:[%s6296_s24 + $0x2b8] sm:$0xff] }
 0x120   : > { %5453 = vmatpush3.bf16.msra.mxu0 %v5452_v8  ;;  %5483 = vmatprep.subr.bf16.mxu1 %v9315_v11  ;;  %v5466_v5 = vpack.c.bf16 %v7034_v1, %v6990_v9  ;;  %v2494_v3 = vand.u32 4294901760, %v7372_v62  ;;  %v2497_v39 = vand.u32 4294901760, %v7374_v6  ;;  %v5468_v8 = vpack.c.bf16 %v7047_v61, %v7039_v4  ;;  %v9322_v61 = vld [vmem:[#allocation28_spill] sm:$0xff] }
 0x121   : > { %5455 = vmatprep.subr.bf16.mxu0 %v5454_v55  ;;  %v7396_v53 = vsub.f32 %v7354_v18, %v2542_v38  ;;  %v7399_v49 = vsub.f32 %v7356_v48, %v2545_v14  ;;  %v519_v55 = vmul.f32 %v391_v51, %v391_v51  ;;  %v663_v46 = vmul.f32 %v535_v41, %v407_v7  ;;  %v9323_v48 = vld [vmem:[#allocation23_spill] sm:$0xff] }
 0x122   : > { %v664_v56 = vmul.f32 %v536_v22, %v408_v35  ;;  %v520_v9 = vmul.f32 %v392_v28, %v392_v28  ;;  %v410_v1 = vmax.f32 %v282_v20, 1e-06  ;;  %v5470_v4 = vpack.c.bf16 %v7072_v42, %v7067_v34 }
 0x123   : > { %5485 = vmatpush3.bf16.msra.mxu1 %v9317_v52  ;;  %9319 = vst [vmem:[#allocation29_spill] sm:$0xff] %v7396_v53  ;;  %9320 = vst [vmem:[#allocation16_spill] sm:$0xff] %v7399_v49  ;;  %v5472_v23 = vpack.c.bf16 %v9322_v61, %v7092_v40  ;;  %v537_v17 = vmul.f32 %v409_v19, %v409_v19  ;;  %v393_v18 = vmax.f32 %v265_v13, 1e-06  ;;  %v394_v2 = vmax.f32 %v266_v60, 1e-06 }
 0x124   : > { %5457 = vmatpush3.bf16.msra.mxu0 %v5456_v27  ;;  %5487 = vmatprep.subr.bf16.mxu1 %v9318_v44  ;;  %v5474_v27 = vpack.c.bf16 %v7147_v45, %v7119_v16  ;;  %v7411_v7 = vsub.f32 %v7372_v62, %v2494_v3  ;;  %v7414_v35 = vsub.f32 %v7374_v6, %v2497_v39  ;;  %v8998_v40 = vand.u32 4294901760, %v7396_v53 }
 0x125   : > { %5459 = vmatprep.subr.bf16.mxu0 %v5458_v24  ;;  %v283_v24 = vld [vmem:[%s6296_s24 + $0x2b0] sm:$0xff]  ;;  %v647_v42 = vmul.f32 %v519_v55, %v391_v51  ;;  %v8999_v32 = vand.u32 4294901760, %v7399_v49  ;;  %v2548_v50 = vand.u32 4294901760, %v663_v46  ;;  %v2551_v45 = vand.u32 4294901760, %v664_v56 }
 0x126   : > { %9324 = vst [vmem:[#allocation34_spill] sm:$0xff] %v7411_v7  ;;  %9325 = vst [vmem:[#allocation17_spill] sm:$0xff] %v7414_v35  ;;  %v648_v16 = vmul.f32 %v520_v9, %v392_v28  ;;  %v538_v62 = vmul.f32 %v410_v1, %v410_v1  ;;  %v7423_v6 = vpack.c.bf16 %v2545_v14, %v2542_v38  ;;  %v9328_v51 = vld [vmem:[#allocation36_spill] sm:$0xff]  ;;  %v9000_v13 = vand.u32 4294901760, %v7411_v7 }
 0x127   : > { %5489 = vmatpush3.bf16.msra.mxu1 %v9321_v57  ;;  %v665_v41 = vmul.f32 %v537_v17, %v409_v19  ;;  %v521_v22 = vmul.f32 %v393_v18, %v393_v18  ;;  %v522_v20 = vmul.f32 %v394_v2, %v394_v2  ;;  %v412_v55 = vmax.f32 %v284_v36, 1e-06  ;;  %v267_v17 = vld [vmem:[%s6296_s24 + $0x230] sm:$0xff] }
 0x128   : > { %5461 = vmatpush3.bf16.msra.mxu0 %v5460_v43  ;;  %5491 = vmatprep.subr.bf16.mxu1 %v9323_v48  ;;  %v9326_v43 = vld [vmem:[#allocation35_spill] sm:$0xff]  ;;  %9327 = vst [vmem:[#allocation18_spill] sm:$0xff] %v7423_v6  ;;  %v7428_v28 = vpack.c.bf16 %v2497_v39, %v2494_v3  ;;  %v2721_v38 = vsub.f32 %v7396_v53, %v8998_v40  ;;  %v2503_v9 = vand.u32 4294901760, %v648_v16  ;;  %v9332_v3 = vld [vmem:[#allocation26_spill] sm:$0xff] }
 0x129   : > { %5463 = vmatprep.subr.bf16.mxu0 %v5462_v15  ;;  %v411_v15 = vmax.f32 %v283_v24, 1e-06  ;;  %v2728_v14 = vsub.f32 %v7399_v49, %v8999_v32  ;;  %v7436_v19 = vpack.c.bf16 %v2551_v45, %v2548_v50  ;;  %v7438_v60 = vsub.f32 %v663_v46, %v2548_v50  ;;  %v268_v24 = vld [vmem:[%s6296_s24 + $0x238] sm:$0xff] }
 0x12a   : > { %9329 = vst [vmem:[#allocation19_spill] sm:$0xff] %v7428_v28  ;;  %v666_v61 = vmul.f32 %v538_v62, %v410_v1  ;;  %v7443_v39 = vsub.f32 %v664_v56, %v2551_v45  ;;  %v2554_v36 = vand.u32 4294901760, %v665_v41  ;;  %v649_v40 = vmul.f32 %v521_v22, %v393_v18 }
 0x12b   : > { %5493 = vmatpush3.bf16.msra.mxu1 %v9326_v43  ;;  %9330 = vst [vmem:[#allocation28_spill] sm:$0xff] %v7436_v19  ;;  %9331 = vst [vmem:[#allocation23_spill] sm:$0xff] %v7438_v60  ;;  %v539_v34 = vmul.f32 %v411_v15, %v411_v15  ;;  %v650_v32 = vmul.f32 %v522_v20, %v394_v2  ;;  %v540_v1 = vmul.f32 %v412_v55, %v412_v55  ;;  %v9336_v20 = vld [vmem:[#allocation25_spill] sm:$0xff] }
 0x12c   : > { %5465 = vmatpush3.bf16.msra.mxu0 %v5464_v29  ;;  %5495 = vmatprep.subr.bf16.mxu1 %v9328_v51  ;;  %v9001_v29 = vand.u32 4294901760, %v7414_v35  ;;  %9333 = vst [vmem:[#allocation35_spill] sm:$0xff] %v7443_v39  ;;  %v2729_v50 = vand.u32 4294901760, %v2728_v14  ;;  %v395_v62 = vmax.f32 %v267_v17, 1e-06  ;;  %v2557_v2 = vand.u32 4294901760, %v666_v61 }
 0x12d   : > { %5467 = vmatprep.subr.bf16.mxu0 %v5466_v5  ;;  %v2500_v5 = vand.u32 4294901760, %v647_v42  ;;  %v396_v56 = vmax.f32 %v268_v24, 1e-06  ;;  %v9006_v22 = vand.u32 4294901760, %v7438_v60  ;;  %v9338_v14 = vld [vmem:[#allocation22_spill] sm:$0xff] }
 0x12e   : > { %v2616_v46 = vsub.f32 %v7414_v35, %v9001_v29  ;;  %v2506_v29 = vand.u32 4294901760, %v649_v40  ;;  %v667_v35 = vmul.f32 %v539_v34, %v411_v15  ;;  %v285_v24 = vld [vmem:[%s6296_s24 + $0x2c0] sm:$0xff]  ;;  %v9339_v34 = vpack.c.bf16 %v7182_v21, %v7171_v63 }
 0x12f   : > { %5497 = vmatpush3.bf16.msra.mxu1 %v9332_v3  ;;  %v7452_v18 = vpack.c.bf16 %v2503_v9, %v2500_v5  ;;  %v7454_v45 = vsub.f32 %v647_v42, %v2500_v5  ;;  %v668_v5 = vmul.f32 %v540_v1, %v412_v55  ;;  %v7470_v15 = vpack.c.bf16 %v2557_v2, %v2554_v36  ;;  %v9341_v1 = vld [vmem:[#allocation30_spill] sm:$0xff] }
 0x130   : > { %5469 = vmatpush3.bf16.msra.mxu0 %v5468_v8  ;;  %5499 = vmatprep.subr.bf16.mxu1 %v6988_v59  ;;  %v2609_v8 = vsub.f32 %v7411_v7, %v9000_v13  ;;  %v7458_v13 = vsub.f32 %v648_v16, %v2503_v9  ;;  %v2617_v42 = vand.u32 4294901760, %v2616_v46  ;;  %v7463_v7 = vsub.f32 %v665_v41, %v2554_v36  ;;  %v269_v46 = vld [vmem:[%s6296_s24 + $0x240] sm:$0xff] }
 0x131   : > { %5471 = vmatprep.subr.bf16.mxu0 %v5470_v4  ;;  %v2722_v4 = vand.u32 4294901760, %v2721_v38  ;;  %9334 = vst [vmem:[#allocation36_spill] sm:$0xff] %v7452_v18  ;;  %9335 = vst [vmem:[#allocation26_spill] sm:$0xff] %v7454_v45  ;;  %v523_v16 = vmul.f32 %v395_v62, %v395_v62  ;;  %v524_v9 = vmul.f32 %v396_v56, %v396_v56  ;;  %v9342_v63 = vand.u32 4294901760, %v7443_v39  ;;  %v9345_v41 = vld [vmem:[#allocation14_spill] sm:$0xff] }
 0x132   : > { %9337 = vst [vmem:[#allocation25_spill] sm:$0xff] %v7458_v13  ;;  %v2610_v17 = vand.u32 4294901760, %v2609_v8  ;;  %9340 = vst [vmem:[#allocation22_spill] sm:$0xff] %v7470_v15  ;;  %v7472_v38 = vsub.f32 %v666_v61, %v2557_v2  ;;  %v2735_v55 = vsub.f32 %v7438_v60, %v9006_v22  ;;  %v286_v8 = vld [vmem:[%s6296_s24 + $0x2c8] sm:$0xff]  ;;  %v413_v36 = vmax.f32 %v285_v24, 1e-06 }
 0x133   : > { %5501 = vmatpush3.bf16.msra.mxu1 %v9336_v20  ;;  %v2742_v21 = vsub.f32 %v7443_v39, %v9342_v63  ;;  %v651_v60 = vmul.f32 %v523_v16, %v395_v62  ;;  %v7495_v49 = vmul.f32 %v524_v9, %v396_v56  ;;  %v414_v63 = vmax.f32 %v286_v8, 1e-06  ;;  %v287_v61 = vld [vmem:[%s6296_s24 + $0x2d0] sm:$0xff]  ;;  %v9346_v24 = vld [vmem:[#allocation31_spill] sm:$0xff] }
 0x134   : > { %5473 = vmatpush3.bf16.msra.mxu0 %v5472_v23  ;;  %5503 = vmatprep.subr.bf16.mxu1 %v9338_v14  ;;  %v2509_v23 = vand.u32 4294901760, %v650_v32  ;;  %v7492_v22 = vpack.c.bf16 %v2617_v42, %v2610_v17  ;;  %v397_v39 = vmax.f32 %v269_v46, 1e-06  ;;  %v9348_v17 = vand.u32 4294901760, %v7454_v45  ;;  %v9349_v42 = vld [vmem:[#allocation32_spill] sm:$0xff] }
 0x135   : > { %5475 = vmatprep.subr.bf16.mxu0 %v5474_v27  ;;  %v7465_v27 = vpack.c.bf16 %v2729_v50, %v2722_v4  ;;  %v2560_v4 = vand.u32 4294901760, %v667_v35  ;;  %v270_v50 = vld [vmem:[%s6296_s24 + $0x248] sm:$0xff]  ;;  %v2743_v9 = vand.u32 4294901760, %v2742_v21  ;;  %v9350_v8 = vand.u32 4294901760, %v7458_v13 }
 0x136   : > { %v7488_v2 = vpack.c.bf16 %v2509_v23, %v2506_v29  ;;  %9344 = vst [vmem:[#allocation41_spill] sm:$0xff] %v7492_v22  ;;  %v2623_v62 = vsub.f32 %v7454_v45, %v9348_v17  ;;  %v398_v56 = vmax.f32 %v270_v50, 1e-06  ;;  %v415_v17 = vmax.f32 %v287_v61, 1e-06 }
 0x137   : > { %5505 = vmatpush3.bf16.msra.mxu1 %v7217_v37  ;;  %v7510_v16 = vsub.f32 %v667_v35, %v2560_v4  ;;  %v2630_v46 = vsub.f32 %v7458_v13, %v9350_v8  ;;  %v2515_v35 = vand.u32 4294901760, %v7495_v49  ;;  %v542_v45 = vmul.f32 %v414_v63, %v414_v63 }
 0x138   : > { %5477 = vmatpush3.bf16.msra.mxu0 %v9339_v34  ;;  %5507 = vmatprep.subr.bf16.mxu1 %v7230_v10  ;;  %9343 = vst [vmem:[#allocation30_spill] sm:$0xff] %v7488_v2  ;;  %v7490_v34 = vsub.f32 %v649_v40, %v2506_v29  ;;  %v7503_v40 = vsub.f32 %v650_v32, %v2509_v23  ;;  %v2736_v29 = vand.u32 4294901760, %v2735_v55  ;;  %v288_v32 = vld [vmem:[%s6296_s24 + $0x2d8] sm:$0xff]  ;;  %v9353_v8 = vand.u32 4294901760, %v9345_v41 }
 0x139   : > { %5511 = vmatprep.subr.bf16.mxu0 %v9341_v1  ;;  %v2563_v1 = vand.u32 4294901760, %v668_v5  ;;  %v525_v21 = vmul.f32 %v397_v39, %v397_v39  ;;  %v9352_v2 = vld [vmem:[#allocation13_spill] sm:$0xff]  ;;  %v526_v13 = vmul.f32 %v398_v56, %v398_v56  ;;  %v416_v55 = vmax.f32 %v288_v32, 1e-06 }
 0x13a   : > { %v7531_v50 = vpack.c.bf16 %v2743_v9, %v2736_v29  ;;  %v9355_v32 = vand.u32 4294901760, %v7463_v7  ;;  %v271_v29 = vld [vmem:[%s6296_s24 + $0x250] sm:$0xff] }
 0x13b   : > { %2108 = vmatmul.mubr.f32.vlgmr.msra.gmra.mrb[8].mxu0 %v9345_v41  ;;  %5509 = vmatpush3.bf16.msra.mxu1 %v7326_v58  ;;  %v7517_v23 = vpack.c.bf16 %v2563_v1, %v2560_v4  ;;  %v9021_v4 = vand.u32 4294901760, %v7503_v40  ;;  %v7529_v61 = vsub.f32 %v668_v5, %v2563_v1  ;;  %v2631_v41 = vand.u32 4294901760, %v2630_v46 }
 0x13c   : > { %5513 = vmatpush3.bf16.msra.mxu0 %v9346_v24  ;;  %4328 = vmatprep.mubr.msk.f32.mxu0 %vm747_vm2, %v9311_v12  ;;  %v541_v24 = vmul.f32 %v413_v36, %v413_v36  ;;  %v543_v1 = vmul.f32 %v415_v17, %v415_v17  ;;  %v653_v9 = vmul.f32 %v525_v21, %v397_v39 }
 0x13d   : > { %5515 = vmatprep.subr.bf16.mxu0 %v9349_v42  ;;  %5543 = vmatprep.subr.bf16.mxu1 %v9225_v26  ;;  %9351 = vst [vmem:[#allocation14_spill] sm:$0xff] %v7517_v23  ;;  %v2512_v42 = vand.u32 4294901760, %v651_v60  ;;  %v9022_v26 = vand.u32 4294901760, %v7490_v34  ;;  %v9354_v23 = vld [vmem:[#allocation15_spill] sm:$0xff]  ;;  %v654_v53 = vmul.f32 %v526_v13, %v398_v56  ;;  %v7565_v21 = vsub.f32 %v7495_v49, %v2515_v35 }
 0x13e   : > { %2216 = vmatmul.mubr.f32.vlgmr.msra.gmra.mrb[8].mxu1 %v9353_v8  ;;  %v669_v22 = vmul.f32 %v541_v24, %v413_v36  ;;  %v272_v24 = vld [vmem:[%s6296_s24 + $0x258] sm:$0xff]  ;;  %v2644_v8 = vsub.f32 %v7503_v40, %v9021_v4  ;;  %v7562_v56 = vmul.f32 %v543_v1, %v415_v17  ;;  %v9361_v49 = vand.u32 4294901760, %v7510_v16 }
 0x13f   : > { %5545 = vmatpush3.bf16.msra.mxu1 %v9314_v25  ;;  %4330 = vmatprep.mubr.msk.f32.mxu1 %vm747_vm2, %v9311_v12  ;;  %v9356_v25 = vand.u32 4294901760, %v7472_v38  ;;  %v7547_v36 = vsub.f32 %v651_v60, %v2512_v42  ;;  %v2637_v46 = vsub.f32 %v7490_v34, %v9022_v26  ;;  %v9359_v26 = vld [vmem:[#allocation21_spill] sm:$0xff]  ;;  %v2521_v39 = vand.u32 4294901760, %v654_v53 }
 0x140   : > { %5517 = vmatpush3.bf16.msra.mxu0 %v9352_v2  ;;  %v2624_v2 = vand.u32 4294901760, %v2623_v62  ;;  %5547 = vmatprep.subr.bf16.mxu1 %v9315_v11  ;;  %v7545_v62 = vpack.c.bf16 %v2515_v35, %v2512_v42  ;;  %v670_v11 = vmul.f32 %v542_v45, %v414_v63  ;;  %v2566_v60 = vand.u32 4294901760, %v669_v22 }
 0x141   : > { %5519 = vmatprep.subr.bf16.mxu0 %v9354_v23  ;;  %v2749_v23 = vsub.f32 %v7463_v7, %v9355_v32  ;;  %v2756_v5 = vsub.f32 %v7472_v38, %v9356_v25  ;;  %v544_v32 = vmul.f32 %v416_v55, %v416_v55  ;;  %v9358_v25 = vld [vmem:[#allocation33_spill] sm:$0xff]  ;;  %v400_v42 = vmax.f32 %v272_v24, 1e-06 }
 0x142   : > { %9357 = vst [vmem:[#allocation31_spill] sm:$0xff] %v7545_v62  ;;  %v7567_v4 = vpack.c.bf16 %v2631_v41, %v2624_v2  ;;  %v2638_v45 = vand.u32 4294901760, %v2637_v46  ;;  %v2763_v17 = vsub.f32 %v7510_v16, %v9361_v49  ;;  %v9362_v35 = vand.u32 4294901760, %v7529_v61 }
 0x143   : > { %5549 = vmatpush3.bf16.msra.mxu1 %v9317_v52  ;;  %v2750_v13 = vand.u32 4294901760, %v2749_v23  ;;  %v2757_v63 = vand.u32 4294901760, %v2756_v5  ;;  %v2518_v52 = vand.u32 4294901760, %v653_v9  ;;  %v7570_v62 = vmul.f32 %v544_v32, %v416_v55  ;;  %v289_v5 = vld [vmem:[%s6296_s24 + $0x2e0] sm:$0xff] }
 0x144   : > { %5521 = vmatpush3.bf16.msra.mxu0 %v7273_v30  ;;  %v399_v30 = vmax.f32 %v271_v29, 1e-06  ;;  %5551 = vmatprep.subr.bf16.mxu1 %v9318_v44  ;;  %v2645_v29 = vand.u32 4294901760, %v2644_v8  ;;  %v9360_v44 = vld [vmem:[#allocation24_spill] sm:$0xff]  ;;  %v2770_v2 = vsub.f32 %v7529_v61, %v9362_v35  ;;  %v528_v23 = vmul.f32 %v400_v42, %v400_v42 }
 0x145   : > { %5523 = vmatprep.subr.bf16.mxu0 %v9358_v25  ;;  %v2569_v25 = vand.u32 4294901760, %v670_v11  ;;  %v7583_v55 = vpack.c.bf16 %v2757_v63, %v2750_v13  ;;  %v7591_v46 = vsub.f32 %v653_v9, %v2518_v52  ;;  %v9025_v8 = vand.u32 4294901760, %v7547_v36  ;;  %v273_v63 = vld [vmem:[%s6296_s24 + $0x260] sm:$0xff]  ;;  %v291_v9 = vld [vmem:[%s6296_s24 + $0x2f0] sm:$0xff] }
 0x146   : > { %v527_v41 = vmul.f32 %v399_v30, %v399_v30  ;;  %v7598_v32 = vpack.c.bf16 %v2645_v29, %v2638_v45  ;;  %v2771_v49 = vand.u32 4294901760, %v2770_v2  ;;  %v275_v45 = vld [vmem:[%s6296_s24 + $0x270] sm:$0xff]  ;;  %v7612_v29 = vsub.f32 %v654_v53, %v2521_v39 }
 0x147   : > { %5553 = vmatpush3.bf16.msra.mxu1 %v9321_v57  ;;  %v9024_v57 = vand.u32 4294901760, %v7562_v56  ;;  %v7587_v1 = vpack.c.bf16 %v2569_v25, %v2566_v60  ;;  %v7589_v24 = vsub.f32 %v670_v11, %v2569_v25  ;;  %v274_v11 = vld [vmem:[%s6296_s24 + $0x268] sm:$0xff]  ;;  %v9364_v25 = vld [vmem:[#allocation37_spill] sm:$0xff]  ;;  %v7619_v13 = vmul.f32 %v528_v23, %v400_v42 }
 0x148   : > { %5525 = vmatpush3.bf16.msra.mxu0 %v9359_v26  ;;  %5555 = vmatprep.subr.bf16.mxu1 %v9323_v48  ;;  %v7581_v26 = vsub.f32 %v669_v22, %v2566_v60  ;;  %v290_v48 = vld [vmem:[%s6296_s24 + $0x2e8] sm:$0xff]  ;;  %v7596_v22 = vpack.c.bf16 %v2521_v39, %v2518_v52  ;;  %v7607_v35 = vmul.f32 %v527_v41, %v399_v30  ;;  %v292_v52 = vld [vmem:[%s6296_s24 + $0x2f8] sm:$0xff]  ;;  %v402_v2 = vmax.f32 %v274_v11, 1e-06 }
 0x149   : > { %5527 = vmatprep.subr.bf16.mxu0 %v9360_v44  ;;  %v2764_v44 = vand.u32 4294901760, %v2763_v17  ;;  %v7617_v60 = vsub.f32 %v7562_v56, %v9024_v57  ;;  %v7625_v30 = vsub.f32 %v7547_v36, %v9025_v8  ;;  %v401_v17 = vmax.f32 %v273_v63, 1e-06 }
 0x14a   : > { %9363 = vst [vmem:[#allocation27_spill] sm:$0xff] %v7596_v22  ;;  %v419_v41 = vmax.f32 %v291_v9, 1e-06  ;;  %v9368_v39 = vand.u32 4294901760, %v7565_v21  ;;  %v420_v23 = vmax.f32 %v292_v52, 1e-06 }
 0x14b   : > { %5557 = vmatpush3.bf16.msra.mxu1 %v9326_v43  ;;  %9365 = vst [vmem:[#allocation32_spill] sm:$0xff] %v7617_v60  ;;  %v276_v43 = vld [vmem:[%s6296_s24 + $0x278] sm:$0xff]  ;;  %v7640_v63 = vpack.c.bf16 %v2771_v49, %v2764_v44  ;;  %v734_v52 = vsub.s32 5, %v9313_v47  ;;  %v9372_v49 = vld [vmem:[#allocation39_spill] sm:$0xff] }
 0x14c   : > { %5529 = vmatpush3.bf16.msra.mxu0 %v7297_v31  ;;  %v417_v31 = vmax.f32 %v289_v5, 1e-06  ;;  %5559 = vmatprep.subr.bf16.mxu1 %v9328_v51  ;;  %v9366_v51 = vand.u32 4294901760, %v7570_v62  ;;  %v7636_v42 = vsub.f32 %v7565_v21, %v9368_v39  ;;  %v403_v5 = vmax.f32 %v275_v45, 1e-06  ;;  %v7651_v22 = vld [vmem:[%s6302_s4] sm:$0xff] }
 0x14d   : > { %5531 = vmatprep.subr.bf16.mxu0 %v9364_v25  ;;  %v418_v25 = vmax.f32 %v290_v48, 1e-06  ;;  %v9370_v48 = vld [vmem:[#allocation38_spill] sm:$0xff]  ;;  %9371 = vst [vmem:[#allocation33_spill] sm:$0xff] %v7640_v63  ;;  %v404_v9 = vmax.f32 %v276_v43, 1e-06  ;;  %v547_v44 = vmul.f32 %v419_v41, %v419_v41 }
 0x14e   : > { %v7631_v53 = vsub.f32 %v7570_v62, %v9366_v51  ;;  %9369 = vst [vmem:[#allocation15_spill] sm:$0xff] %v7636_v42  ;;  %v545_v11 = vmul.f32 %v417_v31, %v417_v31  ;;  %v531_v43 = vmul.f32 %v403_v5, %v403_v5  ;;  %9373 = vst [vmem:[#allocation21_spill] sm:$0xff] %v7651_v22  ;;  %v9375_v51 = vld [vmem:[#allocation40_spill] sm:$0xff]  ;;  %v9376_v45 = vand.u32 4294901760, %v7607_v35 }
 0x14f   : > { %5561 = vmatpush3.bf16.msra.mxu1 %v9332_v3  ;;  %v546_v57 = vmul.f32 %v418_v25, %v418_v25  ;;  %v530_v3 = vmul.f32 %v402_v2, %v402_v2  ;;  %v532_v8 = vmul.f32 %v404_v9, %v404_v9 }
 0x150   : > { %5533 = vmatpush3.bf16.msra.mxu0 %v7309_v54  ;;  %9367 = vst [vmem:[#allocation13_spill] sm:$0xff] %v7631_v53  ;;  %5563 = vmatprep.subr.bf16.mxu1 %v6988_v59  ;;  %v548_v54 = vmul.f32 %v420_v23, %v420_v23  ;;  %v7654_v59 = vrot.slane %v7651_v22, %v734_v52  ;;  %v9378_v52 = vand.u32 4294901760, %v7581_v26 }
 0x151   : > { %5535 = vmatprep.subr.bf16.mxu0 %v9370_v48  ;;  %v529_v48 = vmul.f32 %v401_v17, %v401_v17  ;;  %v7661_v39 = vsub.f32 %v7607_v35, %v9376_v45  ;;  %v7663_v63 = vmul.f32 %v545_v11, %v417_v31  ;;  %v7667_v42 = vmul.f32 %v546_v57, %v418_v25 }
 0x152   : > { %9374 = vst [vmem:[#allocation24_spill] sm:$0xff] %v7654_v59  ;;  %vm749_vm4 = vcmp.eq.s32.totalorder %v7654_v59, %v9313_v47  ;;  %v7679_v31 = vmul.f32 %v530_v3, %v402_v2  ;;  %v7681_v11 = vmul.f32 %v547_v44, %v419_v41  ;;  %v7688_v57 = vmul.f32 %v548_v54, %v420_v23 }
 0x153   : > { %5565 = vmatpush3.bf16.msra.mxu1 %v9336_v20  ;;  %9377 = vst [vmem:[#allocation37_spill] sm:$0xff] %v7661_v39  ;;  %v9028_v20 = vand.u32 4294901760, %v7591_v46  ;;  %v7677_v45 = vmul.f32 %v529_v48, %v401_v17  ;;  %v7690_v25 = vmul.f32 %v531_v43, %v403_v5  ;;  %v730_v17 = vsub.s32 4, %v9313_v47 }
 0x154   : > { %5537 = vmatpush3.bf16.msra.mxu0 %v9372_v49  ;;  %5567 = vmatprep.subr.bf16.mxu1 %v9338_v14  ;;  %9380 = vst [vmem:[#allocation39_spill] sm:$0xff] %v7679_v31  ;;  %9381 = vst [vmem:[#allocation40_spill] sm:$0xff] %v7681_v11  ;;  %v9382_v49 = vmov 0.0   ;;  %v9386_v2 = vand.u32 4294901760, %v7619_v13  ;;  %v9030_v48 = vand.u32 4294901760, %v7663_v63  ;;  %v7704_v23 = vmul.f32 %v532_v8, %v404_v9 }
 0x155   : > { %5539 = vmatprep.subr.bf16.mxu0 %v9375_v51  ;;  %v7672_v51 = vsub.f32 %v7581_v26, %v9378_v52  ;;  %9379 = vst [vmem:[#allocation38_spill] sm:$0xff] %v7677_v45  ;;  %v4317_v14 = vsel %vm749_vm4, 1.0, %v9382_v49  ;;  %9383 = vst [vmem:[#allocation42_spill] sm:$0xff] %v7688_v57  ;;  %v9036_v5 = vand.u32 4294901760, %v7667_v42  ;;  %v9389_v3 = vand.u32 4294901760, %v7589_v24 }
 0x156   : > { %9384 = vst [vmem:[#allocation43_spill] sm:$0xff] %v7690_v25  ;;  %v7692_v52 = vsub.f32 %v4317_v14, %v4317_v14  ;;  %v7700_v41 = vsub.f32 %v7619_v13, %v9386_v2  ;;  %9388 = vst [vmem:[#allocation46_spill] sm:$0xff] %v7704_v23  ;;  %v9035_v8 = vand.u32 4294901760, %v7677_v45  ;;  %v7724_v9 = vsub.f32 %v7591_v46, %v9028_v20 }
 0x157   : > { %5569 = vmatpush3.bf16.msra.mxu1 %v7217_v37  ;;  %v7712_v37 = vsub.f32 %v7589_v24, %v9389_v3  ;;  %v7734_v54 = vrot.slane %v7651_v22, %v730_v17  ;;  %v7741_v20 = vsub.f32 %v7663_v63, %v9030_v48  ;;  %v2790_v14 = vand.u32 4294901760, %v7617_v60 }
 0x158   : > { %5541 = vmatpush3.bf16.msra.mxu0 %v7332_v33  ;;  %9385 = vst [vmem:[#allocation44_spill] sm:$0xff] %v7692_v52  ;;  %9387 = vst [vmem:[#allocation45_spill] sm:$0xff] %v7700_v41  ;;  %v9031_v33 = vand.u32 4294901760, %v7612_v29  ;;  %5571 = vmatprep.subr.bf16.mxu1 %v7230_v10  ;;  %v9029_v44 = vand.u32 4294901760, %v7692_v52  ;;  %v2797_v17 = vand.u32 4294901760, %v7631_v53  ;;  %v2685_v43 = vand.u32 4294901760, %v7700_v41 }
 0x159   : > { %5575 = vmatprep.subr.bf16.mxu0 %v7423_v6  ;;  %9390 = vst [vmem:[#allocation47_spill] sm:$0xff] %v7734_v54  ;;  %v7757_v48 = vsub.f32 %v7667_v42, %v9036_v5  ;;  %v9392_v22 = vand.u32 4294901760, %v7681_v11  ;;  %vm748_vm5 = vcmp.eq.s32.totalorder %v7734_v54, %v9313_v47  ;;  %v2666_v0 = vand.u32 4294901760, %v7724_v9  ;;  %v9403_v54 = vld [vmem:[#allocation16_spill] sm:$0xff]  ;;  %v9407_v47 = vld [vmem:[#allocation34_spill] sm:$0xff] }
 0x15a   : > { %v2592_v3 = vsub.f32 %v7692_v52, %v9029_v44  ;;  %v7746_v2 = vsub.f32 %v7612_v29, %v9031_v33  ;;  %v7762_v33 = vsub.f32 %v7677_v45, %v9035_v8  ;;  %v9391_v44 = vand.u32 4294901760, %v7679_v31  ;;  %v9412_v45 = vld [vmem:[#allocation23_spill] sm:$0xff] }
 0x15b   : > { %4329 = vmatmul.mubr.msk.f32.vlgmr.msra.gmra.mrb[10].mxu0 %vm746_vm3, %v9311_v12  ;;  %5573 = vmatpush3.bf16.msra.mxu1 %v7326_v58  ;;  %v2678_v58 = vand.u32 4294901760, %v7661_v39  ;;  %v9394_v8 = vand.u32 4294901760, %v7688_v57  ;;  %v2804_v9 = vand.u32 4294901760, %v7741_v20 }
 0x15c   : > { %5577 = vmatpush3.bf16.msra.mxu0 %v7428_v28  ;;  %5607 = vmatprep.subr.bf16.mxu1 %v7465_v27  ;;  %v2593_v10 = vand.u32 4294901760, %v2592_v3  ;;  %v7767_v27 = vsub.f32 %v7679_v31, %v9391_v44  ;;  %v2785_v3 = vand.u32 4294901760, %v7712_v37  ;;  %v9396_v44 = vand.u32 4294901760, %v7690_v25 }
 0x15d   : > { %5579 = vmatprep.subr.bf16.mxu0 %v7436_v19  ;;  %v7772_v19 = vsub.f32 %v7681_v11, %v9392_v22  ;;  %v7783_v5 = vsub.f32 %v7688_v57, %v9394_v8  ;;  %v9398_v22 = vld [vmem:[#allocation41_spill] sm:$0xff]  ;;  %v2673_v37 = vand.u32 4294901760, %v7746_v2  ;;  %v9399_v8 = vand.u32 4294901760, %v7704_v23  ;;  %v9406_v57 = vld [vmem:[#allocation14_spill] sm:$0xff] }
 0x15e   : > { %4331 = vmatmul.mubr.msk.f32.vlgmr.msra.gmra.mrb[10].mxu1 %vm746_vm3, %v9311_v12  ;;  %v7788_v28 = vsub.f32 %v7690_v25, %v9396_v44  ;;  %v2798_v44 = vsub.f32 %v7631_v53, %v2797_v17  ;;  %v7805_v52 = vsub.f32 %v7661_v39, %v2678_v58  ;;  %2594 = vmatprep.mubr.f32.mxu0 %v2593_v10  ;;  %v4316_v2 = vsel %vm748_vm5, 1.0, %v9382_v49  ;;  %v9401_v49 = vld [vmem:[#allocation29_spill] sm:$0xff] }
 0x15f   : > { %9393 = vst [vmem:[#allocation48_spill] sm:$0xff] %v7772_v19  ;;  %9395 = vst [vmem:[#allocation49_spill] sm:$0xff] %v7783_v5  ;;  %5609 = vmatpush3.bf16.msra.mxu1 %v9398_v22  ;;  %v7800_v6 = vsub.f32 %v7704_v23, %v9399_v8  ;;  %v7808_v22 = vsub.f32 %v7700_v41, %v2685_v43  ;;  %v2811_v8 = vand.u32 4294901760, %v7757_v48  ;;  %4332 = vmatprep.mubr.msk.f32.mxu1 %vm749_vm4, %v9311_v12  ;;  %v9400_v41 = vld [vmem:[#allocation30_spill] sm:$0xff]  ;;  %v9409_v12 = vld [vmem:[#allocation17_spill] sm:$0xff] }
 0x160   : > { %5581 = vmatpush3.bf16.msra.mxu0 %v7452_v18  ;;  %9397 = vst [vmem:[#allocation50_spill] sm:$0xff] %v7788_v28  ;;  %v2791_v18 = vsub.f32 %v7617_v60, %v2790_v14  ;;  %5611 = vmatprep.subr.bf16.mxu1 %v7531_v50  ;;  %v2692_v50 = vand.u32 4294901760, %v7762_v33  ;;  %v2818_v10 = vand.u32 4294901760, %v7772_v19  ;;  %v2825_v39 = vand.u32 4294901760, %v7783_v5  ;;  %v9414_v5 = vld [vmem:[#allocation35_spill] sm:$0xff] }
 0x161   : > { %5583 = vmatprep.subr.bf16.mxu0 %v7470_v15  ;;  %v2699_v15 = vand.u32 4294901760, %v7767_v27  ;;  %v2706_v53 = vand.u32 4294901760, %v7788_v28  ;;  %v9402_v60 = vand.u32 4294901760, %v9401_v49  ;;  %v9404_v23 = vand.u32 4294901760, %v9403_v54 }
 0x162   : > { %v2713_v59 = vand.u32 4294901760, %v7800_v6  ;;  %v9410_v11 = vand.u32 4294901760, %v9409_v12  ;;  %v9413_v28 = vand.u32 4294901760, %v9412_v45  ;;  %v9415_v49 = vand.u32 4294901760, %v9414_v5 }
 0x163   : > { %v7830_v25 = vpack.c.bf16 %v9404_v23, %v9402_v60  ;;  %5613 = vmatpush3.bf16.msra.mxu1 %v7567_v4  ;;  %v9417_v60 = vld [vmem:[#allocation26_spill] sm:$0xff]  ;;  %v9422_v4 = vand.u32 4294901760, %v7463_v7  ;;  %v9423_v12 = vand.u32 4294901760, %v7472_v38 }
 0x164   : > { %5585 = vmatpush3.bf16.msra.mxu0 %v9400_v41  ;;  %v9408_v41 = vand.u32 4294901760, %v9407_v47  ;;  %v7845_v19 = vpack.c.bf16 %v9415_v49, %v9413_v28  ;;  %v9418_v23 = vand.u32 4294901760, %v9417_v60  ;;  %5615 = vmatprep.subr.bf16.mxu1 %v7583_v55  ;;  %v9428_v49 = vand.u32 4294901760, %v7510_v16 }
 0x165   : > { %9405 = vst [vmem:[#allocation41_spill] sm:$0xff] %v7830_v25  ;;  %5587 = vmatprep.subr.bf16.mxu0 %v9406_v57  ;;  %v9419_v25 = vld [vmem:[#allocation25_spill] sm:$0xff]  ;;  %v9431_v55 = vand.u32 4294901760, %v7547_v36 }
 0x166   : > { %v7839_v31 = vpack.c.bf16 %v9410_v11, %v9408_v41  ;;  %9416 = vst [vmem:[#allocation23_spill] sm:$0xff] %v7845_v19  ;;  %v9420_v57 = vand.u32 4294901760, %v9419_v25  ;;  %v7858_v11 = vpack.c.bf16 %v9423_v12, %v9422_v4  ;;  %v9425_v41 = vand.u32 4294901760, %v7490_v34 }
 0x167   : > { %v9429_v19 = vand.u32 4294901760, %v7529_v61  ;;  %v9434_v12 = vand.u32 4294901760, %v7581_v26  ;;  %v9435_v4 = vand.u32 4294901760, %v7589_v24  ;;  %5617 = vmatpush3.bf16.msra.mxu1 %v7598_v32  ;;  %v2805_v32 = vsub.f32 %v7741_v20, %v2804_v9 }
 0x168   : > { %9411 = vst [vmem:[#allocation34_spill] sm:$0xff] %v7839_v31  ;;  %v7851_v54 = vpack.c.bf16 %v9420_v57, %v9418_v23  ;;  %9424 = vst [vmem:[#allocation26_spill] sm:$0xff] %v7858_v11  ;;  %v9426_v31 = vand.u32 4294901760, %v7503_v40  ;;  %v9432_v23 = vand.u32 4294901760, %v7565_v21 }
 0x169   : > { %v7870_v57 = vpack.c.bf16 %v9429_v19, %v9428_v49  ;;  %v7882_v11 = vpack.c.bf16 %v9435_v4, %v9434_v12  ;;  %v7890_v19 = vpack.c.bf16 %v2797_v17, %v2790_v14  ;;  %v7892_v49 = vpack.c.bf16 %v2685_v43, %v2678_v58  ;;  %v9449_v58 = vld [vmem:[#allocation15_spill] sm:$0xff] }
 0x16a   : > { %9421 = vst [vmem:[#allocation35_spill] sm:$0xff] %v7851_v54  ;;  %v7864_v28 = vpack.c.bf16 %v9426_v31, %v9425_v41  ;;  %v7876_v54 = vpack.c.bf16 %v9432_v23, %v9431_v55  ;;  %v9436_v31 = vand.u32 4294901760, %v7591_v46  ;;  %v9437_v41 = vand.u32 4294901760, %v7612_v29 }
 0x16b   : > { %9430 = vst [vmem:[#allocation51_spill] sm:$0xff] %v7870_v57  ;;  %9439 = vst [vmem:[#allocation54_spill] sm:$0xff] %v7890_v19  ;;  %v9441_v57 = vld [vmem:[#allocation31_spill] sm:$0xff]  ;;  %v7895_v55 = vpack.c.bf16 %v2811_v8, %v2804_v9  ;;  %v7897_v23 = vpack.c.bf16 %v2699_v15, %v2692_v50  ;;  %v7901_v12 = vpack.c.bf16 %v2713_v59, %v2706_v53  ;;  %v9446_v4 = vand.u32 4294901760, %v7562_v56 }
 0x16c   : > { %9427 = vst [vmem:[#allocation25_spill] sm:$0xff] %v7864_v28  ;;  %9433 = vst [vmem:[#allocation52_spill] sm:$0xff] %v7876_v54  ;;  %v7888_v28 = vpack.c.bf16 %v9437_v41, %v9436_v31  ;;  %5589 = vmatpush3.bf16.msra.mxu0 %v9441_v57  ;;  %v7899_v54 = vpack.c.bf16 %v2825_v39, %v2818_v10  ;;  %v9447_v14 = vand.u32 4294901760, %v7570_v62  ;;  %v9448_v17 = vand.u32 4294901760, %v7625_v30 }
 0x16d   : > { %9440 = vst [vmem:[#allocation55_spill] sm:$0xff] %v7892_v49  ;;  %9442 = vst [vmem:[#allocation31_spill] sm:$0xff] %v7895_v55  ;;  %5591 = vmatprep.subr.bf16.mxu0 %v7587_v1  ;;  %v9450_v31 = vand.u32 4294901760, %v9449_v58  ;;  %v2799_v55 = vand.u32 4294901760, %v2798_v44  ;;  %v2812_v56 = vsub.f32 %v7757_v48, %v2811_v8  ;;  %v9453_v62 = vand.u32 4294901760, %v7607_v35  ;;  %v9458_v8 = vld [vmem:[#allocation48_spill] sm:$0xff] }
 0x16e   : > { %9438 = vst [vmem:[#allocation53_spill] sm:$0xff] %v7888_v28  ;;  %9443 = vst [vmem:[#allocation56_spill] sm:$0xff] %v7897_v23  ;;  %v7909_v43 = vpack.c.bf16 %v9447_v14, %v9446_v4  ;;  %v2792_v23 = vand.u32 4294901760, %v2791_v18  ;;  %v9454_v4 = vand.u32 4294901760, %v7619_v13  ;;  %v7926_v30 = vsub.f32 %v4316_v2, %v4316_v2 }
 0x16f   : > { %9444 = vst [vmem:[#allocation57_spill] sm:$0xff] %v7899_v54  ;;  %9445 = vst [vmem:[#allocation58_spill] sm:$0xff] %v7901_v12  ;;  %v5620_v41 = vpack.c.bf16 %v9450_v31, %v9448_v17  ;;  %v9451_v54 = vld [vmem:[#allocation33_spill] sm:$0xff]  ;;  %v9452_v12 = vand.u32 4294901760, %v7672_v51  ;;  %v9455_v17 = vld [vmem:[#allocation27_spill] sm:$0xff]  ;;  %v9456_v18 = vand.u32 4294901760, %v7663_v63  ;;  %v2693_v35 = vsub.f32 %v7762_v33, %v2692_v50 }
 0x170   : > { %5619 = vmatprep.subr.bf16.mxu1 %v9451_v54  ;;  %v7924_v14 = vpack.c.bf16 %v9454_v4, %v9453_v62  ;;  %5593 = vmatpush3.bf16.msra.mxu0 %v9455_v17  ;;  %v9457_v54 = vand.u32 4294901760, %v7667_v42  ;;  %v2680_v44 = vand.u32 4294901760, %v7805_v52  ;;  %v2687_v9 = vand.u32 4294901760, %v7808_v22  ;;  %v9460_v22 = vld [vmem:[#allocation38_spill] sm:$0xff]  ;;  %v9462_v31 = vld [vmem:[#allocation39_spill] sm:$0xff]  ;;  %v9464_v50 = vld [vmem:[#allocation40_spill] sm:$0xff] }
 0x171   : > { %v5622_v49 = vpack.c.bf16 %v2785_v3, %v9452_v12  ;;  %v5624_v3 = vpack.c.bf16 %v2673_v37, %v2666_v0  ;;  %5595 = vmatprep.subr.bf16.mxu0 %v7909_v43  ;;  %5621 = vmatpush3.bf16.msra.mxu1 %v5620_v41  ;;  %v5626_v13 = vpack.c.bf16 %v2799_v55, %v2792_v23  ;;  %v2806_v63 = vand.u32 4294901760, %v2805_v32  ;;  %v9459_v0 = vld [vmem:[#allocation49_spill] sm:$0xff]  ;;  %v310_v62 = vld [vmem:[%s6296_s24 + $0x388] sm:$0xff] }
 0x172   : > { %v7933_v51 = vpack.c.bf16 %v9457_v54, %v9456_v18  ;;  %v2700_v2 = vsub.f32 %v7767_v27, %v2699_v15  ;;  %v2813_v42 = vand.u32 4294901760, %v2812_v56  ;;  %v2819_v12 = vsub.f32 %v9458_v8, %v2818_v10  ;;  %v9466_v15 = vld [vmem:[#allocation42_spill] sm:$0xff] }
 0x173   : > { %5623 = vmatprep.subr.bf16.mxu1 %v5622_v49  ;;  %v2826_v37 = vsub.f32 %v9459_v0, %v2825_v39  ;;  %v9072_v52 = vand.u32 4294901760, %v7926_v30  ;;  %v9461_v58 = vand.u32 4294901760, %v9460_v22  ;;  %v9463_v41 = vand.u32 4294901760, %v9462_v31  ;;  %v309_v10 = vld [vmem:[%s6296_s24 + $0x380] sm:$0xff] }
 0x174   : > { %5597 = vmatpush3.bf16.msra.mxu0 %v7924_v14  ;;  %v9465_v23 = vand.u32 4294901760, %v9464_v50  ;;  %v9467_v49 = vand.u32 4294901760, %v9466_v15  ;;  %v5628_v56 = vpack.c.bf16 %v2687_v9, %v2680_v44  ;;  %v2694_v39 = vand.u32 4294901760, %v2693_v35  ;;  %v9468_v18 = vld [vmem:[#allocation50_spill] sm:$0xff] }
 0x175   : > { %v7948_v55 = vpack.c.bf16 %v9463_v41, %v9461_v58  ;;  %5599 = vmatprep.subr.bf16.mxu0 %v7933_v51  ;;  %5625 = vmatpush3.bf16.msra.mxu1 %v5624_v3  ;;  %v2701_v4 = vand.u32 4294901760, %v2700_v2  ;;  %v2707_v54 = vsub.f32 %v9468_v18, %v2706_v53  ;;  %v2714_v22 = vsub.f32 %v7800_v6, %v2713_v59  ;;  %v9469_v3 = vld [vmem:[#allocation43_spill] sm:$0xff]  ;;  %v9471_v2 = vld [vmem:[#allocation46_spill] sm:$0xff]  ;;  %v9473_v59 = vld [vmem:[#allocation29_spill] sm:$0xff] }
 0x176   : > { %v7954_v32 = vpack.c.bf16 %v9467_v49, %v9465_v23  ;;  %5627 = vmatprep.subr.bf16.mxu1 %v5626_v13  ;;  %v5630_v58 = vpack.c.bf16 %v2813_v42, %v2806_v63  ;;  %v2820_v31 = vand.u32 4294901760, %v2819_v12  ;;  %v2827_v41 = vand.u32 4294901760, %v2826_v37  ;;  %v9474_v13 = vld [vmem:[#allocation16_spill] sm:$0xff]  ;;  %v293_v49 = vld [vmem:[%s6296_s24 + $0x300] sm:$0xff] }
 0x177   : > { %v2598_v44 = vsub.f32 %v7926_v30, %v9072_v52  ;;  %v437_v9 = vmax.f32 %v309_v10, 1e-06  ;;  %v438_v50 = vmax.f32 %v310_v62, 1e-06  ;;  %v9470_v35 = vand.u32 4294901760, %v9469_v3  ;;  %v9490_v52 = vld [vmem:[#allocation36_spill] sm:$0xff] }
 0x178   : > { %5601 = vmatpush3.bf16.msra.mxu0 %v7948_v55  ;;  %v9472_v23 = vand.u32 4294901760, %v9471_v2  ;;  %v5638_v63 = vpack.c.bf16 %v9474_v13, %v9473_v59  ;;  %v5632_v42 = vpack.c.bf16 %v2701_v4, %v2694_v39  ;;  %v2708_v12 = vand.u32 4294901760, %v2707_v54  ;;  %v294_v2 = vld [vmem:[%s6296_s24 + $0x308] sm:$0xff] }
 0x179   : > { %5603 = vmatprep.subr.bf16.mxu0 %v7954_v32  ;;  %5629 = vmatpush3.bf16.msra.mxu1 %v5628_v56  ;;  %v2715_v37 = vand.u32 4294901760, %v2714_v22  ;;  %v5634_v15 = vpack.c.bf16 %v2827_v41, %v2820_v31  ;;  %v2599_v10 = vand.u32 4294901760, %v2598_v44  ;;  %v565_v62 = vmul.f32 %v437_v9, %v437_v9  ;;  %v311_v22 = vld [vmem:[%s6296_s24 + $0x390] sm:$0xff] }
 0x17a   : > { %v7969_v53 = vpack.c.bf16 %v9472_v23, %v9470_v35  ;;  %5631 = vmatprep.subr.bf16.mxu1 %v5630_v58  ;;  %v566_v3 = vmul.f32 %v438_v50, %v438_v50  ;;  %v9475_v35 = vld [vmem:[#allocation17_spill] sm:$0xff]  ;;  %v5642_v39 = vpack.c.bf16 %v9414_v5, %v9412_v45  ;;  %v421_v54 = vmax.f32 %v293_v49, 1e-06  ;;  %v295_v23 = vld [vmem:[%s6296_s24 + $0x310] sm:$0xff] }
 0x17b   : > { %v5640_v56 = vpack.c.bf16 %v9475_v35, %v9407_v47  ;;  %v5636_v4 = vpack.c.bf16 %v2715_v37, %v2708_v12  ;;  %v312_v58 = vld [vmem:[%s6296_s24 + $0x398] sm:$0xff]  ;;  %v7983_v31 = vmul.f32 %v565_v62, %v437_v9  ;;  %v422_v44 = vmax.f32 %v294_v2, 1e-06  ;;  %v9476_v45 = vld [vmem:[#allocation44_spill] sm:$0xff]  ;;  %v313_v37 = vld [vmem:[%s6296_s24 + $0x3a0] sm:$0xff] }
 0x17c   : > { %5605 = vmatpush3.bf16.msra.mxu0 %v7969_v53  ;;  %v7985_v41 = vmul.f32 %v566_v3, %v438_v50  ;;  %v296_v47 = vld [vmem:[%s6296_s24 + $0x318] sm:$0xff]  ;;  %v5644_v59 = vpack.c.bf16 %v9419_v25, %v9417_v60  ;;  %v439_v5 = vmax.f32 %v311_v22, 1e-06  ;;  %v440_v13 = vmax.f32 %v312_v58, 1e-06  ;;  %v314_v60 = vld [vmem:[%s6296_s24 + $0x3a8] sm:$0xff] }
 0x17d   : > { %5639 = vmatprep.subr.bf16.mxu0 %v5638_v63  ;;  %5633 = vmatpush3.bf16.msra.mxu1 %v5632_v42  ;;  %v5646_v9 = vpack.c.bf16 %v7472_v38, %v7463_v7  ;;  %v549_v50 = vmul.f32 %v421_v54, %v421_v54  ;;  %v9477_v63 = vld [vmem:[#allocation18_spill] sm:$0xff]  ;;  %v423_v42 = vmax.f32 %v295_v23, 1e-06  ;;  %v424_v12 = vmax.f32 %v296_v47, 1e-06  ;;  %v9480_v3 = vld [vmem:[#allocation20_spill] sm:$0xff] }
 0x17e   : > { %5635 = vmatprep.subr.bf16.mxu1 %v5634_v15  ;;  %v3404_v15 = vand.u32 4294901760, %v7983_v31  ;;  %v3407_v49 = vand.u32 4294901760, %v7985_v41  ;;  %v550_v25 = vmul.f32 %v422_v44, %v422_v44  ;;  %v5648_v7 = vpack.c.bf16 %v7503_v40, %v7490_v34  ;;  %v9482_v58 = vld [vmem:[#allocation28_spill] sm:$0xff] }
 0x17f   : > { %2600 = vmatmul.mubr.f32.vlgmr.msra.gmra.mrb[12].mxu0 %v2599_v10  ;;  %v9478_v10 = vmov 1.0   ;;  %v567_v38 = vmul.f32 %v439_v5, %v439_v5  ;;  %v568_v35 = vmul.f32 %v440_v13, %v440_v13  ;;  %v5650_v2 = vpack.c.bf16 %v7529_v61, %v7510_v16 }
 0x180   : > { %5641 = vmatpush3.bf16.msra.mxu0 %v5640_v56  ;;  %2967 = vmatprep.mubr.f32.mxu0 %v9476_v45  ;;  %v9481_v56 = vld [vmem:[#allocation19_spill] sm:$0xff]  ;;  %v441_v22 = vmax.f32 %v313_v37, 1e-06  ;;  %v5654_v23 = vpack.c.bf16 %v7589_v24, %v7581_v26  ;;  %v9483_v34 = vand.u32 4294901760, %v9476_v45  ;;  %v551_v40 = vmul.f32 %v423_v42, %v423_v42  ;;  %v9486_v26 = vld [vmem:[#allocation32_spill] sm:$0xff]  ;;  %v9487_v24 = vld [vmem:[#allocation13_spill] sm:$0xff] }
 0x181   : > { %5643 = vmatprep.subr.bf16.mxu0 %v5642_v39  ;;  %5637 = vmatpush3.bf16.msra.mxu1 %v5636_v4  ;;  %v5652_v39 = vpack.c.bf16 %v7565_v21, %v7547_v36  ;;  %v677_v4 = vmul.f32 %v549_v50, %v421_v54  ;;  %v552_v47 = vmul.f32 %v424_v12, %v424_v12  ;;  %v9488_v45 = vld [vmem:[#allocation37_spill] sm:$0xff] }
 0x182   : > { %5671 = vmatprep.subr.bf16.mxu1 %v9477_v63  ;;  %v5656_v16 = vpack.c.bf16 %v7612_v29, %v7591_v46  ;;  %v8019_v61 = vsub.f32 %v7983_v31, %v3404_v15  ;;  %v8022_v36 = vsub.f32 %v7985_v41, %v3407_v49  ;;  %v678_v21 = vmul.f32 %v550_v25, %v422_v44  ;;  %v9489_v50 = vld [vmem:[#allocation45_spill] sm:$0xff]  ;;  %v298_v41 = vld [vmem:[%s6296_s24 + $0x328] sm:$0xff]  ;;  %v9491_v44 = vld [vmem:[#allocation22_spill] sm:$0xff] }
 0x183   : > { %v5658_v54 = vpack.c.bf16 %v9487_v24, %v9486_v26  ;;  %v3356_v29 = vand.u32 4294901760, %v677_v4  ;;  %v569_v31 = vmul.f32 %v441_v22, %v441_v22  ;;  %v680_v26 = vmul.f32 %v552_v47, %v424_v12  ;;  %v9494_v25 = vld [vmem:[#allocation14_spill] sm:$0xff] }
 0x184   : > { %5645 = vmatpush3.bf16.msra.mxu0 %v5644_v59  ;;  %4333 = vmatmul.mubr.msk.f32.vlgmr.msra.gmra.mrb[12].mxu1 %vm748_vm5, %v9478_v10  ;;  %v442_v59 = vmax.f32 %v314_v60, 1e-06  ;;  %9484 = vst [vmem:[#allocation15_spill] sm:$0xff] %v8019_v61  ;;  %9485 = vst [vmem:[#allocation33_spill] sm:$0xff] %v8022_v36  ;;  %v695_v60 = vmul.f32 %v567_v38, %v439_v5  ;;  %v3359_v38 = vand.u32 4294901760, %v678_v21 }
 0x185   : > { %5647 = vmatprep.subr.bf16.mxu0 %v5646_v9  ;;  %5673 = vmatpush3.bf16.msra.mxu1 %v9481_v56  ;;  %v297_v9 = vld [vmem:[%s6296_s24 + $0x320] sm:$0xff]  ;;  %v426_v37 = vmax.f32 %v298_v41, 1e-06  ;;  %v8042_v12 = vsub.f32 %v677_v4, %v3356_v29 }
 0x186   : > { %5675 = vmatprep.subr.bf16.mxu1 %v9482_v58  ;;  %3074 = vmatprep.mubr.f32.mxu1 %v9483_v34  ;;  %v696_v34 = vmul.f32 %v568_v35, %v440_v13  ;;  %v425_v62 = vmax.f32 %v297_v9, 1e-06  ;;  %v570_v5 = vmul.f32 %v442_v59, %v442_v59  ;;  %v3410_v24 = vand.u32 4294901760, %v695_v60  ;;  %v315_v13 = vld [vmem:[%s6296_s24 + $0x3b0] sm:$0xff] }
 0x187   : > { %9493 = vst [vmem:[#allocation27_spill] sm:$0xff] %v8042_v12  ;;  %v8046_v35 = vpack.c.bf16 %v3407_v49, %v3404_v15  ;;  %v8048_v9 = vpack.c.bf16 %v3359_v38, %v3356_v29  ;;  %v8050_v41 = vsub.f32 %v678_v21, %v3359_v38  ;;  %v554_v49 = vmul.f32 %v426_v37, %v426_v37 }
 0x188   : > { %5649 = vmatpush3.bf16.msra.mxu0 %v5648_v7  ;;  %v679_v7 = vmul.f32 %v551_v40, %v423_v42  ;;  %v3413_v46 = vand.u32 4294901760, %v696_v34  ;;  %v9492_v42 = vld [vmem:[#allocation30_spill] sm:$0xff]  ;;  %v697_v40 = vmul.f32 %v569_v31, %v441_v22  ;;  %v553_v47 = vmul.f32 %v425_v62, %v425_v62 }
 0x189   : > { %5651 = vmatprep.subr.bf16.mxu0 %v5650_v2  ;;  %5677 = vmatpush3.bf16.msra.mxu1 %v9490_v52  ;;  %9495 = vst [vmem:[#allocation48_spill] sm:$0xff] %v8046_v35  ;;  %v3365_v2 = vand.u32 4294901760, %v680_v26  ;;  %v698_v19 = vmul.f32 %v570_v5, %v442_v59  ;;  %9496 = vst [vmem:[#allocation49_spill] sm:$0xff] %v8048_v9  ;;  %v9498_v22 = vand.u32 4294901760, %v8022_v36  ;;  %v316_v59 = vld [vmem:[%s6296_s24 + $0x3b8] sm:$0xff] }
 0x18a   : > { %5679 = vmatprep.subr.bf16.mxu1 %v9491_v44  ;;  %v8058_v28 = vpack.c.bf16 %v3413_v46, %v3410_v24  ;;  %v8060_v15 = vsub.f32 %v695_v60, %v3410_v24  ;;  %v443_v29 = vmax.f32 %v315_v13, 1e-06  ;;  %v8064_v21 = vsub.f32 %v696_v34, %v3413_v46  ;;  %v4382_v60 = vpop.f32.mrb[0].mxu0  ;;  %v317_v34 = vld [vmem:[%s6296_s24 + $0x3c0] sm:$0xff] }
 0x18b   : > { %v3590_v31 = vsub.f32 %v8022_v36, %v9498_v22  ;;  %v3416_v5 = vand.u32 4294901760, %v697_v40  ;;  %v8066_v38 = vmul.f32 %v553_v47, %v425_v62  ;;  %v8075_v13 = vsub.f32 %v680_v26, %v3365_v2  ;;  %v4383_v46 = vpop.f32.mrb[1].mxu0  ;;  %v318_v26 = vld [vmem:[%s6296_s24 + $0x3c8] sm:$0xff] }
 0x18c   : > { %5653 = vmatpush3.bf16.msra.mxu0 %v5652_v39  ;;  %v3362_v39 = vand.u32 4294901760, %v679_v7  ;;  %9499 = vst [vmem:[#allocation38_spill] sm:$0xff] %v8058_v28  ;;  %v300_v28 = vld [vmem:[%s6296_s24 + $0x338] sm:$0xff]  ;;  %v9081_v47 = vand.u32 4294901760, %v8050_v41  ;;  %v9501_v36 = vpack.c.bf16 %v9489_v50, %v9488_v45  ;;  %v9503_v45 = vand.u32 4294901760, %v8042_v12 }
 0x18d   : > { %5655 = vmatprep.subr.bf16.mxu0 %v5654_v23  ;;  %5681 = vmatpush3.bf16.msra.mxu1 %v9492_v42  ;;  %v9497_v23 = vand.u32 4294901760, %v8019_v61  ;;  %v3591_v62 = vand.u32 4294901760, %v3590_v31  ;;  %v9080_v31 = vand.u32 4294901760, %v8066_v38  ;;  %v428_v50 = vmax.f32 %v300_v28, 1e-06 }
 0x18e   : > { %5683 = vmatprep.subr.bf16.mxu1 %v9494_v25  ;;  %v8071_v24 = vpack.c.bf16 %v3365_v2, %v3362_v39  ;;  %v8073_v22 = vsub.f32 %v679_v7, %v3362_v39  ;;  %v571_v7 = vmul.f32 %v443_v29, %v443_v29  ;;  %v9502_v2 = vpack.c.bf16 %v7757_v48, %v7741_v20 }
 0x18f   : > { %v3583_v4 = vsub.f32 %v8019_v61, %v9497_v23  ;;  %v444_v23 = vmax.f32 %v316_v59, 1e-06  ;;  %v4384_v61 = vadd.f32 %v4383_v46, %v4382_v60  ;;  %v9082_v20 = vand.u32 4294901760, %v8060_v15  ;;  %v4417_v59 = vpop.f32.mrb[0].mxu1 }
 0x190   : > { %5657 = vmatpush3.bf16.msra.mxu0 %v5656_v16  ;;  %v299_v16 = vld [vmem:[%s6296_s24 + $0x330] sm:$0xff]  ;;  %9500 = vst [vmem:[#allocation39_spill] sm:$0xff] %v8071_v24  ;;  %v8083_v24 = vmul.f32 %v554_v49, %v426_v37  ;;  %v445_v49 = vmax.f32 %v317_v34, 1e-06  ;;  %v446_v46 = vmax.f32 %v318_v26, 1e-06  ;;  %v9505_v28 = vpack.c.bf16 %v7767_v27, %v7762_v33 }
 0x191   : > { %5659 = vmatprep.subr.bf16.mxu0 %v5658_v54  ;;  %5685 = vmatpush3.bf16.msra.mxu1 %v9441_v57  ;;  %v3419_v54 = vand.u32 4294901760, %v698_v19  ;;  %v3584_v9 = vand.u32 4294901760, %v3583_v4  ;;  %v427_v39 = vmax.f32 %v299_v16, 1e-06  ;;  %v8090_v4 = vsub.f32 %v697_v40, %v3416_v5 }
 0x192   : > { %5687 = vmatprep.subr.bf16.mxu1 %v7587_v1  ;;  %v572_v60 = vmul.f32 %v444_v23, %v444_v23  ;;  %v3478_v48 = vsub.f32 %v8050_v41, %v9081_v47  ;;  %v8113_v34 = vmul.f32 %v571_v7, %v443_v29  ;;  %v8123_v33 = vsub.f32 %v8066_v38, %v9080_v31 }
 0x193   : > { %v8097_v37 = vpack.c.bf16 %v3419_v54, %v3416_v5  ;;  %v8101_v40 = vsub.f32 %v698_v19, %v3419_v54  ;;  %v8103_v16 = vpack.c.bf16 %v3591_v62, %v3584_v9  ;;  %v4418_v5 = vpop.f32.mrb[1].mxu1  ;;  %v555_v19 = vmul.f32 %v427_v39, %v427_v39  ;;  %v302_v54 = vld [vmem:[%s6296_s24 + $0x348] sm:$0xff] }
 0x194   : > { %5661 = vmatpush3.bf16.msra.mxu0 %v9501_v36  ;;  %v3471_v36 = vsub.f32 %v8042_v12, %v9503_v45  ;;  %9506 = vst [vmem:[#allocation42_spill] sm:$0xff] %v8113_v34  ;;  %v4419_v9 = vadd.f32 %v4418_v5, %v4417_v59  ;;  %v9507_v62 = vpack.c.bf16 %v9459_v0, %v9458_v8  ;;  %v9508_v7 = vand.u32 4294901760, %v8064_v21 }
 0x195   : > { %5663 = vmatprep.subr.bf16.mxu0 %v9502_v2  ;;  %5689 = vmatpush3.bf16.msra.mxu1 %v9455_v17  ;;  %9504 = vst [vmem:[#allocation40_spill] sm:$0xff] %v8097_v37  ;;  %v301_v2 = vld [vmem:[%s6296_s24 + $0x340] sm:$0xff]  ;;  %v556_v26 = vmul.f32 %v428_v50, %v428_v50  ;;  %v3597_v29 = vsub.f32 %v8060_v15, %v9082_v20  ;;  %v430_v31 = vmax.f32 %v302_v54, 1e-06  ;;  %v3479_v47 = vand.u32 4294901760, %v3478_v48  ;;  %v9512_v37 = vld [vmem:[#allocation41_spill] sm:$0xff] }
 0x196   : > { %5691 = vmatprep.subr.bf16.mxu1 %v7909_v43  ;;  %v3472_v27 = vand.u32 4294901760, %v3471_v36  ;;  %v3604_v8 = vsub.f32 %v8064_v21, %v9508_v7  ;;  %v573_v0 = vmul.f32 %v445_v49, %v445_v49  ;;  %v429_v59 = vmax.f32 %v301_v2, 1e-06 }
 0x197   : > { %v8134_v5 = vmul.f32 %v572_v60, %v444_v23  ;;  %v9510_v36 = vpack.c.bf16 %v7800_v6, %v9468_v18  ;;  %v9084_v20 = vand.u32 4294901760, %v8113_v34  ;;  %v8140_v45 = vmul.f32 %v555_v19, %v427_v39  ;;  %v319_v19 = vld [vmem:[%s6296_s24 + $0x3d0] sm:$0xff] }
 0x198   : > { %5665 = vmatpush3.bf16.msra.mxu0 %v9505_v28  ;;  %v8132_v28 = vadd.f32 %v4419_v9, %v4384_v61  ;;  %v9085_v7 = vand.u32 4294901760, %v8073_v22  ;;  %v9513_v61 = vand.u32 4294901760, %v8083_v24  ;;  %v8150_v60 = vmul.f32 %v556_v26, %v428_v50 }
 0x199   : > { %5667 = vmatprep.subr.bf16.mxu0 %v9507_v62  ;;  %5693 = vmatpush3.bf16.msra.mxu1 %v7924_v14  ;;  %9509 = vst [vmem:[#allocation50_spill] sm:$0xff] %v8134_v5  ;;  %v574_v62 = vmul.f32 %v446_v46, %v446_v46  ;;  %9511 = vst [vmem:[#allocation43_spill] sm:$0xff] %v8140_v45  ;;  %v9086_v6 = vand.u32 4294901760, %v8075_v13  ;;  %v9087_v18 = vand.u32 4294901760, %v8090_v4  ;;  %v3598_v39 = vand.u32 4294901760, %v3597_v29 }
 0x19a   : > { %5695 = vmatprep.subr.bf16.mxu1 %v7933_v51  ;;  %v8148_v23 = vsub.f32 %v8083_v24, %v9513_v61  ;;  %9515 = vst [vmem:[#allocation29_spill] sm:$0xff] %v8150_v60  ;;  %v8155_v48 = vmul.f32 %v573_v0, %v445_v49  ;;  %v557_v2 = vmul.f32 %v429_v59, %v429_v59  ;;  %v9089_v54 = vand.u32 4294901760, %v8134_v5  ;;  %v9531_v0 = vld [vmem:[#allocation35_spill] sm:$0xff] }
 0x19b   : > { %v3605_v50 = vand.u32 4294901760, %v3604_v8  ;;  %v8161_v9 = vmul.f32 %v574_v62, %v446_v46  ;;  %v558_v26 = vmul.f32 %v430_v31, %v430_v31  ;;  %v8168_v49 = vpack.c.bf16 %v3479_v47, %v3472_v27  ;;  %v9523_v8 = vld [vmem:[#allocation23_spill] sm:$0xff] }
 0x19c   : > { %5669 = vmatpush3.bf16.msra.mxu0 %v9510_v36  ;;  %9514 = vst [vmem:[#allocation46_spill] sm:$0xff] %v8148_v23  ;;  %9516 = vst [vmem:[#allocation16_spill] sm:$0xff] %v8155_v48  ;;  %v9518_v36 = vld [vmem:[#allocation34_spill] sm:$0xff]  ;;  %v8173_v29 = vsub.f32 %v8113_v34, %v9084_v20  ;;  %v8179_v46 = vsub.f32 %v8073_v22, %v9085_v7  ;;  %v8187_v47 = vsub.f32 %v8075_v13, %v9086_v6 }
 0x19d   : > { %5703 = vmatprep.subr.bf16.mxu0 %v9512_v37  ;;  %5697 = vmatpush3.bf16.msra.mxu1 %v7948_v55  ;;  %v9088_v37 = vand.u32 4294901760, %v8101_v40  ;;  %9517 = vst [vmem:[#allocation17_spill] sm:$0xff] %v8161_v9  ;;  %9520 = vst [vmem:[#allocation44_spill] sm:$0xff] %v8168_v49  ;;  %v8192_v27 = vsub.f32 %v8090_v4, %v9087_v18  ;;  %v447_v20 = vmax.f32 %v319_v19, 1e-06  ;;  %v9094_v62 = vand.u32 4294901760, %v8123_v33 }
 0x19e   : > { %5699 = vmatprep.subr.bf16.mxu1 %v7954_v32  ;;  %9521 = vst [vmem:[#allocation18_spill] sm:$0xff] %v8173_v29  ;;  %9522 = vst [vmem:[#allocation20_spill] sm:$0xff] %v8179_v46  ;;  %v8202_v6 = vmul.f32 %v557_v2, %v429_v59  ;;  %v8208_v18 = vsub.f32 %v8134_v5, %v9089_v54  ;;  %v8210_v19 = vpack.c.bf16 %v3605_v50, %v3598_v39  ;;  %v322_v39 = vld [vmem:[%s6296_s24 + $0x3e8] sm:$0xff] }
 0x19f   : > { %2970 = vmatmul.mubr.f32.vlgmr.msra.gmra.mrb[14].mxu0 %v7926_v30  ;;  %9524 = vst [vmem:[#allocation19_spill] sm:$0xff] %v8187_v47  ;;  %9525 = vst [vmem:[#allocation28_spill] sm:$0xff] %v8192_v27  ;;  %v8200_v7 = vsub.f32 %v8101_v40, %v9088_v37  ;;  %v9532_v59 = vand.u32 4294901760, %v7926_v30  ;;  %v9533_v2 = vand.u32 4294901760, %v8140_v45  ;;  %v9536_v30 = vand.u32 4294901760, %v8150_v60  ;;  %v9546_v46 = vld [vmem:[#allocation51_spill] sm:$0xff] }
 0x1a0   : > { %5705 = vmatpush3.bf16.msra.mxu0 %v9518_v36  ;;  %4334 = vmatprep.mubr.msk.f32.mxu0 %vm749_vm4, %v9478_v10  ;;  %v320_v36 = vld [vmem:[%s6296_s24 + $0x3d8] sm:$0xff]  ;;  %9527 = vst [vmem:[#allocation13_spill] sm:$0xff] %v8202_v6  ;;  %9528 = vst [vmem:[#allocation37_spill] sm:$0xff] %v8208_v18  ;;  %v575_v54 = vmul.f32 %v447_v20, %v447_v20  ;;  %v9541_v61 = vand.u32 4294901760, %v8161_v9  ;;  %v450_v47 = vmax.f32 %v322_v39, 1e-06 }
 0x1a1   : > { %5707 = vmatprep.subr.bf16.mxu0 %v9523_v8  ;;  %5701 = vmatpush3.bf16.msra.mxu1 %v7969_v53  ;;  %9526 = vst [vmem:[#allocation32_spill] sm:$0xff] %v8200_v7  ;;  %9529 = vst [vmem:[#allocation45_spill] sm:$0xff] %v8210_v19  ;;  %v8213_v8 = vmul.f32 %v558_v26, %v430_v31  ;;  %v8221_v37 = vsub.f32 %v8140_v45, %v9533_v2  ;;  %v448_v50 = vmax.f32 %v320_v36, 1e-06  ;;  %v304_v31 = vld [vmem:[%s6296_s24 + $0x358] sm:$0xff]  ;;  %v9535_v26 = vld [vmem:[#allocation26_spill] sm:$0xff] }
 0x1a2   : > { %5735 = vmatprep.subr.bf16.mxu1 %v9477_v63  ;;  %v303_v63 = vld [vmem:[%s6296_s24 + $0x350] sm:$0xff]  ;;  %v321_v36 = vld [vmem:[%s6296_s24 + $0x3e0] sm:$0xff]  ;;  %v8261_v19 = vsub.f32 %v8161_v9, %v9541_v61  ;;  %v324_v2 = vld [vmem:[%s6296_s24 + $0x3f8] sm:$0xff]  ;;  %v8273_v61 = vmul.f32 %v575_v54, %v447_v20  ;;  %v578_v34 = vmul.f32 %v450_v47, %v450_v47 }
 0x1a3   : > { %9530 = vst [vmem:[#allocation36_spill] sm:$0xff] %v8213_v8  ;;  %9534 = vst [vmem:[#allocation22_spill] sm:$0xff] %v8221_v37  ;;  %v323_v45 = vld [vmem:[%s6296_s24 + $0x3f0] sm:$0xff]  ;;  %v9543_v7 = vld [vmem:[#allocation25_spill] sm:$0xff]  ;;  %v576_v49 = vmul.f32 %v448_v50, %v448_v50 }
 0x1a4   : > { %5709 = vmatpush3.bf16.msra.mxu0 %v9531_v0  ;;  %3078 = vmatmul.mubr.f32.vlgmr.msra.gmra.mrb[14].mxu1 %v9532_v59  ;;  %v8232_v0 = vsub.f32 %v8150_v60, %v9536_v30  ;;  %v8253_v59 = vsub.f32 %v8123_v33, %v9094_v62  ;;  %v306_v60 = vld [vmem:[%s6296_s24 + $0x368] sm:$0xff]  ;;  %9542 = vst [vmem:[#allocation34_spill] sm:$0xff] %v8261_v19  ;;  %v431_v30 = vmax.f32 %v303_v63, 1e-06  ;;  %v9544_v62 = vand.u32 4294901760, %v8148_v23  ;;  %v308_v9 = vld [vmem:[%s6296_s24 + $0x378] sm:$0xff] }
 0x1a5   : > { %5711 = vmatprep.subr.bf16.mxu0 %v9535_v26  ;;  %5737 = vmatpush3.bf16.msra.mxu1 %v9481_v56  ;;  %v9538_v56 = vand.u32 4294901760, %v8155_v48  ;;  %v434_v39 = vmax.f32 %v306_v60, 1e-06  ;;  %v9549_v63 = vld [vmem:[#allocation52_spill] sm:$0xff] }
 0x1a6   : > { %9537 = vst [vmem:[#allocation30_spill] sm:$0xff] %v8232_v0  ;;  %5739 = vmatprep.subr.bf16.mxu1 %v9482_v58  ;;  %4336 = vmatprep.mubr.msk.f32.mxu1 %vm749_vm4, %v9478_v10  ;;  %9540 = vst [vmem:[#allocation41_spill] sm:$0xff] %v8253_v59  ;;  %v305_v58 = vld [vmem:[%s6296_s24 + $0x360] sm:$0xff]  ;;  %v8269_v27 = vsub.f32 %v8148_v23, %v9544_v62  ;;  %v449_v59 = vmax.f32 %v321_v36, 1e-06  ;;  %v9547_v62 = vand.u32 4294901760, %v8202_v6 }
 0x1a7   : > { %v8246_v26 = vsub.f32 %v8155_v48, %v9538_v56  ;;  %v432_v48 = vmax.f32 %v304_v31, 1e-06  ;;  %v433_v56 = vmax.f32 %v305_v58, 1e-06  ;;  %v559_v54 = vmul.f32 %v431_v30, %v431_v30 }
 0x1a8   : > { %5713 = vmatpush3.bf16.msra.mxu0 %v9543_v7  ;;  %9545 = vst [vmem:[#allocation24_spill] sm:$0xff] %v8269_v27  ;;  %v307_v7 = vld [vmem:[%s6296_s24 + $0x370] sm:$0xff]  ;;  %v8283_v36 = vsub.f32 %v8202_v6, %v9547_v62  ;;  %v452_v27 = vmax.f32 %v324_v2, 1e-06  ;;  %v742_v58 = vsub.s32 7, %v9480_v3  ;;  %v577_v5 = vmul.f32 %v449_v59, %v449_v59 }
 0x1a9   : > { %9539 = vst [vmem:[#allocation14_spill] sm:$0xff] %v8246_v26  ;;  %5715 = vmatprep.subr.bf16.mxu0 %v9546_v46  ;;  %5741 = vmatpush3.bf16.msra.mxu1 %v9490_v52  ;;  %v451_v46 = vmax.f32 %v323_v45, 1e-06  ;;  %v9548_v52 = vand.u32 4294901760, %v8213_v8  ;;  %v560_v31 = vmul.f32 %v432_v48, %v432_v48  ;;  %v435_v62 = vmax.f32 %v307_v7, 1e-06 }
 0x1aa   : > { %5743 = vmatprep.subr.bf16.mxu1 %v9491_v44  ;;  %v8292_v44 = vmul.f32 %v576_v49, %v448_v50  ;;  %v561_v60 = vmul.f32 %v433_v56, %v433_v56  ;;  %v436_v2 = vmax.f32 %v308_v9, 1e-06  ;;  %v562_v50 = vmul.f32 %v434_v39, %v434_v39 }
 0x1ab   : > { %v8288_v20 = vsub.f32 %v8213_v8, %v9548_v52  ;;  %v9550_v52 = vld [vmem:[#allocation21_spill] sm:$0xff]  ;;  %v579_v7 = vmul.f32 %v451_v46, %v451_v46  ;;  %v580_v6 = vmul.f32 %v452_v27, %v452_v27  ;;  %v8311_v45 = vmul.f32 %v559_v54, %v431_v30 }
 0x1ac   : > { %5717 = vmatpush3.bf16.msra.mxu0 %v9549_v63  ;;  %v8298_v8 = vrot.slane %v9550_v52, %v742_v58  ;;  %v9552_v63 = vand.u32 4294901760, %v8173_v29  ;;  %v8313_v9 = vmul.f32 %v560_v31, %v432_v48  ;;  %v8318_v58 = vmul.f32 %v577_v5, %v449_v59  ;;  %v4452_v5 = vpop.f32.mrb[2].mxu0 }
 0x1ad   : > { %5719 = vmatprep.subr.bf16.mxu0 %v7882_v11  ;;  %5745 = vmatpush3.bf16.msra.mxu1 %v9492_v42  ;;  %v9554_v11 = vand.u32 4294901760, %v8208_v18  ;;  %v8320_v52 = vmul.f32 %v578_v34, %v450_v47  ;;  %v8329_v30 = vmul.f32 %v561_v60, %v433_v56  ;;  %v564_v31 = vmul.f32 %v436_v2, %v436_v2  ;;  %v9562_v34 = vld [vmem:[#allocation55_spill] sm:$0xff] }
 0x1ae   : > { %9551 = vst [vmem:[#allocation23_spill] sm:$0xff] %v8298_v8  ;;  %5747 = vmatprep.subr.bf16.mxu1 %v9494_v25  ;;  %v8304_v49 = vsub.f32 %v8173_v29, %v9552_v63  ;;  %vm751_vm6 = vcmp.eq.s32.totalorder %v8298_v8, %v9480_v3  ;;  %v9556_v25 = vld [vmem:[#allocation53_spill] sm:$0xff]  ;;  %v563_v63 = vmul.f32 %v435_v62, %v435_v62  ;;  %v9103_v60 = vand.u32 4294901760, %v8311_v45 }
 0x1af   : > { %v8309_v42 = vsub.f32 %v8208_v18, %v9554_v11  ;;  %v8335_v47 = vmul.f32 %v562_v50, %v434_v39  ;;  %v8337_v59 = vmul.f32 %v579_v7, %v451_v46  ;;  %v9105_v39 = vand.u32 4294901760, %v8318_v58 }
 0x1b0   : > { %9553 = vst [vmem:[#allocation35_spill] sm:$0xff] %v8304_v49  ;;  %5721 = vmatpush3.bf16.msra.mxu0 %v9556_v25  ;;  %v9557_v49 = vmov 0.0   ;;  %v8339_v25 = vmul.f32 %v580_v6, %v452_v27  ;;  %v8351_v46 = vmul.f32 %v563_v63, %v435_v62  ;;  %v9564_v27 = vld [vmem:[#allocation31_spill] sm:$0xff]  ;;  %v9565_v50 = vand.u32 4294901760, %v8292_v44 }
 0x1b1   : > { %9555 = vst [vmem:[#allocation26_spill] sm:$0xff] %v8309_v42  ;;  %v4319_v11 = vsel %vm751_vm6, 1.0, %v9557_v49  ;;  %v9558_v42 = vld [vmem:[#allocation54_spill] sm:$0xff]  ;;  %5749 = vmatpush3.bf16.msra.mxu1 %v9441_v57  ;;  %v9560_v57 = vand.u32 4294901760, %v8273_v61  ;;  %v9109_v63 = vand.u32 4294901760, %v8335_v47 }
 0x1b2   : > { %5723 = vmatprep.subr.bf16.mxu0 %v9558_v42  ;;  %v8331_v54 = vsub.f32 %v4319_v11, %v4319_v11  ;;  %5751 = vmatprep.subr.bf16.mxu1 %v7587_v1  ;;  %v4453_v42 = vpop.f32.mrb[3].mxu0  ;;  %v9104_v11 = vand.u32 4294901760, %v8313_v9  ;;  %9563 = vst [vmem:[#allocation52_spill] sm:$0xff] %v8351_v46  ;;  %v8359_v7 = vsub.f32 %v8292_v44, %v9565_v50 }
 0x1b3   : > { %v8344_v56 = vsub.f32 %v8273_v61, %v9560_v57  ;;  %v4454_v48 = vadd.f32 %v4453_v42, %v4452_v5  ;;  %v9108_v57 = vand.u32 4294901760, %v8320_v52  ;;  %v9107_v5 = vand.u32 4294901760, %v8329_v30 }
 0x1b4   : > { %9559 = vst [vmem:[#allocation25_spill] sm:$0xff] %v8331_v54  ;;  %5725 = vmatpush3.bf16.msra.mxu0 %v9562_v34  ;;  %v9106_v6 = vand.u32 4294901760, %v8331_v54  ;;  %9566 = vst [vmem:[#allocation21_spill] sm:$0xff] %v8359_v7  ;;  %v8363_v34 = vmul.f32 %v564_v31, %v436_v2  ;;  %v8373_v50 = vsub.f32 %v8311_v45, %v9103_v60  ;;  %v9571_v60 = vld [vmem:[#allocation58_spill] sm:$0xff] }
 0x1b5   : > { %9561 = vst [vmem:[#allocation51_spill] sm:$0xff] %v8344_v56  ;;  %5727 = vmatprep.subr.bf16.mxu0 %v9564_v27  ;;  %5753 = vmatpush3.bf16.msra.mxu1 %v9455_v17  ;;  %v1248_v62 = vadd.f32 %v4454_v48, %v8132_v28  ;;  %v4487_v27 = vpop.f32.mrb[2].mxu1  ;;  %v8378_v2 = vsub.f32 %v8313_v9, %v9104_v11  ;;  %v9567_v48 = vld [vmem:[#allocation56_spill] sm:$0xff]  ;;  %v9112_v17 = vand.u32 4294901760, %v8351_v46  ;;  %v9568_v28 = vld [vmem:[#allocation57_spill] sm:$0xff] }
 0x1b6   : > { %5755 = vmatprep.subr.bf16.mxu1 %v7909_v43  ;;  %v4488_v31 = vpop.f32.mrb[3].mxu1  ;;  %v8386_v1 = vsub.f32 %v8318_v58, %v9105_v39  ;;  %v3454_v11 = vsub.f32 %v8331_v54, %v9106_v6  ;;  %v8403_v39 = vsub.f32 %v8329_v30, %v9107_v5  ;;  %v9570_v6 = vand.u32 4294901760, %v8339_v25 }
 0x1b7   : > { %v4489_v42 = vadd.f32 %v4488_v31, %v4487_v27  ;;  %v8410_v27 = vsub.f32 %v8335_v47, %v9109_v63  ;;  %v9583_v43 = vand.u32 4294901760, %v8064_v21 }
 0x1b8   : > { %5729 = vmatpush3.bf16.msra.mxu0 %v9567_v48  ;;  %v8398_v48 = vsub.f32 %v8320_v52, %v9108_v57  ;;  %v8421_v5 = vsub.f32 %v8339_v25, %v9570_v6  ;;  %v3455_v54 = vand.u32 4294901760, %v3454_v11  ;;  %v738_v6 = vsub.s32 6, %v9480_v3 }
 0x1b9   : > { %5731 = vmatprep.subr.bf16.mxu0 %v9568_v28  ;;  %5757 = vmatpush3.bf16.msra.mxu1 %v7924_v14  ;;  %v9569_v28 = vand.u32 4294901760, %v8337_v59  ;;  %v8423_v57 = vadd.f32 %v4489_v42, %v1248_v62  ;;  %v9572_v62 = vand.u32 4294901760, %v8363_v34  ;;  %v9582_v14 = vand.u32 4294901760, %v8060_v15 }
 0x1ba   : > { %5759 = vmatprep.subr.bf16.mxu1 %v7933_v51 }
 0x1bb   : > { %v8416_v31 = vsub.f32 %v8337_v59, %v9569_v28  ;;  %v8432_v28 = vsub.f32 %v8351_v46, %v9112_v17  ;;  %v8441_v42 = vsub.f32 %v8363_v34, %v9572_v62  ;;  %v9579_v17 = vand.u32 4294901760, %v8042_v12 }
 0x1bc   : > { %5733 = vmatpush3.bf16.msra.mxu0 %v9571_v60  ;;  %v8470_v63 = vpack.c.bf16 %v9583_v43, %v9582_v14  ;;  %v9589_v12 = vand.u32 4294901760, %v8101_v40  ;;  %v9592_v43 = vand.u32 4294901760, %v8123_v33  ;;  %v9593_v14 = vand.u32 4294901760, %v8148_v23 }
 0x1bd   : > { %5767 = vmatprep.subr.bf16.mxu0 %v8046_v35  ;;  %5761 = vmatpush3.bf16.msra.mxu1 %v7948_v55  ;;  %v9573_v55 = vld [vmem:[#allocation15_spill] sm:$0xff]  ;;  %v9575_v35 = vld [vmem:[#allocation33_spill] sm:$0xff] }
 0x1be   : > { %5763 = vmatprep.subr.bf16.mxu1 %v7954_v32  ;;  %v9574_v51 = vand.u32 4294901760, %v9573_v55  ;;  %v9576_v46 = vand.u32 4294901760, %v9575_v35  ;;  %v9580_v32 = vand.u32 4294901760, %v8050_v41  ;;  %9584 = vst [vmem:[#allocation55_spill] sm:$0xff] %v8470_v63  ;;  %v9588_v35 = vand.u32 4294901760, %v8090_v4 }
 0x1bf   : > { %4335 = vmatmul.mubr.msk.f32.vlgmr.msra.gmra.mrb[16].mxu0 %vm748_vm5, %v9478_v10  ;;  %v8490_v63 = vpack.c.bf16 %v9593_v14, %v9592_v43  ;;  %v9602_v43 = vand.u32 4294901760, %v8246_v26  ;;  %v9603_v14 = vand.u32 4294901760, %v8261_v19 }
 0x1c0   : > { %v8454_v62 = vpack.c.bf16 %v9576_v46, %v9574_v51  ;;  %v8464_v11 = vpack.c.bf16 %v9580_v32, %v9579_v17  ;;  %v9585_v46 = vand.u32 4294901760, %v8073_v22  ;;  %v9586_v51 = vand.u32 4294901760, %v8075_v13  ;;  %v9591_v17 = vld [vmem:[#allocation49_spill] sm:$0xff]  ;;  %3456 = vmatprep.mubr.f32.mxu0 %v3455_v54  ;;  %v9601_v54 = vld [vmem:[#allocation38_spill] sm:$0xff] }
 0x1c1   : > { %v8482_v55 = vpack.c.bf16 %v9589_v12, %v9588_v35  ;;  %5769 = vmatpush3.bf16.msra.mxu0 %v9591_v17  ;;  %9594 = vst [vmem:[#allocation57_spill] sm:$0xff] %v8490_v63  ;;  %v9598_v35 = vand.u32 4294901760, %v8221_v37  ;;  %v9599_v12 = vand.u32 4294901760, %v8232_v0  ;;  %5765 = vmatpush3.bf16.msra.mxu1 %v7969_v53  ;;  %v8511_v63 = vpack.c.bf16 %v9603_v14, %v9602_v43  ;;  %v9649_v17 = vld [vmem:[#allocation35_spill] sm:$0xff] }
 0x1c2   : > { %9577 = vst [vmem:[#allocation53_spill] sm:$0xff] %v8454_v62  ;;  %9581 = vst [vmem:[#allocation54_spill] sm:$0xff] %v8464_v11  ;;  %v8476_v62 = vpack.c.bf16 %v9586_v51, %v9585_v46  ;;  %v9595_v46 = vand.u32 4294901760, %v8173_v29  ;;  %v9596_v51 = vand.u32 4294901760, %v8208_v18  ;;  %5771 = vmatprep.subr.bf16.mxu0 %v9601_v54  ;;  %5799 = vmatprep.subr.bf16.mxu1 %v8103_v16  ;;  %v9611_v53 = vand.u32 4294901760, %v8373_v50  ;;  %v9645_v18 = vld [vmem:[#allocation32_spill] sm:$0xff] }
 0x1c3   : > { %9590 = vst [vmem:[#allocation56_spill] sm:$0xff] %v8482_v55  ;;  %v8502_v55 = vpack.c.bf16 %v9599_v12, %v9598_v35  ;;  %9604 = vst [vmem:[#allocation59_spill] sm:$0xff] %v8511_v63  ;;  %v9608_v35 = vand.u32 4294901760, %v8344_v56  ;;  %v9609_v12 = vand.u32 4294901760, %v8359_v7  ;;  %v9612_v32 = vand.u32 4294901760, %v8378_v2 }
 0x1c4   : > { %9587 = vst [vmem:[#allocation31_spill] sm:$0xff] %v8476_v62  ;;  %v8496_v62 = vpack.c.bf16 %v9596_v51, %v9595_v46  ;;  %v9605_v46 = vand.u32 4294901760, %v8283_v36  ;;  %v9606_v51 = vand.u32 4294901760, %v8288_v20  ;;  %v9614_v14 = vand.u32 4294901760, %v8386_v1  ;;  %4337 = vmatmul.mubr.msk.f32.vlgmr.msra.gmra.mrb[16].mxu1 %vm748_vm5, %v9478_v10 }
 0x1c5   : > { %9600 = vst [vmem:[#allocation47_spill] sm:$0xff] %v8502_v55  ;;  %v8523_v55 = vpack.c.bf16 %v9609_v12, %v9608_v35  ;;  %v8530_v43 = vpack.c.bf16 %v9612_v32, %v9611_v53  ;;  %v9615_v63 = vand.u32 4294901760, %v8398_v48  ;;  %v9620_v16 = vand.u32 4294901760, %v8416_v31  ;;  %4338 = vmatprep.mubr.msk.f32.mxu1 %vm751_vm6, %v9478_v10 }
 0x1c6   : > { %9597 = vst [vmem:[#allocation58_spill] sm:$0xff] %v8496_v62  ;;  %v8517_v62 = vpack.c.bf16 %v9606_v51, %v9605_v46  ;;  %v9617_v51 = vand.u32 4294901760, %v8403_v39  ;;  %v9621_v12 = vand.u32 4294901760, %v8421_v5  ;;  %v9623_v32 = vand.u32 4294901760, %v8066_v38  ;;  %v9634_v38 = vld [vmem:[#allocation20_spill] sm:$0xff] }
 0x1c7   : > { %9610 = vst [vmem:[#allocation61_spill] sm:$0xff] %v8523_v55  ;;  %9613 = vst [vmem:[#allocation62_spill] sm:$0xff] %v8530_v43  ;;  %v8536_v46 = vpack.c.bf16 %v9615_v63, %v9614_v14  ;;  %v9624_v53 = vand.u32 4294901760, %v8083_v24  ;;  %v9625_v63 = vld [vmem:[#allocation42_spill] sm:$0xff]  ;;  %v9635_v24 = vand.u32 4294901760, %v9634_v38  ;;  %v9646_v29 = vand.u32 4294901760, %v9645_v18 }
 0x1c8   : > { %9607 = vst [vmem:[#allocation60_spill] sm:$0xff] %v8517_v62  ;;  %v9618_v62 = vand.u32 4294901760, %v8410_v27  ;;  %v8548_v55 = vpack.c.bf16 %v9621_v12, %v9620_v16  ;;  %v9626_v14 = vand.u32 4294901760, %v9625_v63  ;;  %v9633_v16 = vld [vmem:[#allocation39_spill] sm:$0xff]  ;;  %v9639_v63 = vld [vmem:[#allocation24_spill] sm:$0xff]  ;;  %v9652_v18 = vand.u32 4294901760, %v8261_v19 }
 0x1c9   : > { %9616 = vst [vmem:[#allocation63_spill] sm:$0xff] %v8536_v46  ;;  %v8554_v43 = vpack.c.bf16 %v9624_v53, %v9623_v32  ;;  %v9627_v46 = vld [vmem:[#allocation50_spill] sm:$0xff]  ;;  %5773 = vmatpush3.bf16.msra.mxu0 %v9633_v16  ;;  %v9636_v12 = vld [vmem:[#allocation19_spill] sm:$0xff]  ;;  %v9643_v16 = vld [vmem:[#allocation28_spill] sm:$0xff] }
 0x1ca   : > { %v8542_v35 = vpack.c.bf16 %v9618_v62, %v9617_v51  ;;  %9622 = vst [vmem:[#allocation65_spill] sm:$0xff] %v8548_v55  ;;  %v9628_v11 = vand.u32 4294901760, %v9627_v46  ;;  %v9630_v62 = vand.u32 4294901760, %v8432_v28  ;;  %v9631_v51 = vand.u32 4294901760, %v8441_v42 }
 0x1cb   : > { %v9637_v32 = vand.u32 4294901760, %v9636_v12  ;;  %v9640_v55 = vand.u32 4294901760, %v8221_v37  ;;  %v9644_v60 = vand.u32 4294901760, %v9643_v16  ;;  %v9647_v12 = vand.u32 4294901760, %v8232_v0 }
 0x1cc   : > { %9619 = vst [vmem:[#allocation64_spill] sm:$0xff] %v8542_v35  ;;  %v8560_v54 = vpack.c.bf16 %v9628_v11, %v9626_v14  ;;  %v8566_v35 = vpack.c.bf16 %v9631_v51, %v9630_v62  ;;  %v9638_v11 = vld [vmem:[#allocation41_spill] sm:$0xff]  ;;  %v3507_v14 = vand.u32 4294901760, %v9639_v63  ;;  %v9641_v51 = vld [vmem:[#allocation40_spill] sm:$0xff] }
 0x1cd   : > { %v5804_v46 = vpack.c.bf16 %v9637_v32, %v9635_v24  ;;  %v3500_v53 = vand.u32 4294901760, %v9638_v11  ;;  %v3513_v62 = vsub.f32 %v8221_v37, %v9640_v55  ;;  %5775 = vmatprep.subr.bf16.mxu0 %v9641_v51  ;;  %v5806_v38 = vpack.c.bf16 %v9646_v29, %v9644_v60  ;;  %v6015_v32 = vld [vmem:[%s6302_s4] sm:$0xff]  ;;  %v9648_v63 = vld [vmem:[#allocation45_spill] sm:$0xff] }
 0x1ce   : > { %9629 = vst [vmem:[#allocation42_spill] sm:$0xff] %v8560_v54  ;;  %9632 = vst [vmem:[#allocation50_spill] sm:$0xff] %v8566_v35  ;;  %v9642_v35 = vld [vmem:[#allocation44_spill] sm:$0xff]  ;;  %v3520_v24 = vsub.f32 %v8232_v0, %v9647_v12  ;;  %v8592_v11 = vrot.slane %v6015_v32, %v738_v6  ;;  %v3626_v55 = vand.u32 4294901760, %v9649_v17  ;;  %v9650_v37 = vld [vmem:[#allocation26_spill] sm:$0xff]  ;;  %v3646_v29 = vsub.f32 %v8261_v19, %v9652_v18 }
 0x1cf   : > { %5801 = vmatpush3.bf16.msra.mxu1 %v9642_v35  ;;  %v3633_v51 = vand.u32 4294901760, %v9650_v37  ;;  %v9651_v35 = vand.u32 4294901760, %v8246_v26  ;;  %v9653_v6 = vld [vmem:[#allocation43_spill] sm:$0xff]  ;;  %v9655_v12 = vld [vmem:[#allocation29_spill] sm:$0xff]  ;;  %v9657_v37 = vand.u32 4294901760, %v8283_v36  ;;  %5777 = vmatpush3.bf16.msra.mxu0 %v8554_v43  ;;  %v5808_v8 = vpack.c.bf16 %v3507_v14, %v3500_v53 }
 0x1d0   : > { %5803 = vmatprep.subr.bf16.mxu1 %v9648_v63  ;;  %v9654_v60 = vand.u32 4294901760, %v9653_v6  ;;  %v9656_v32 = vand.u32 4294901760, %v9655_v12  ;;  %v9660_v18 = vld [vmem:[#allocation17_spill] sm:$0xff]  ;;  %v3514_v23 = vand.u32 4294901760, %v3513_v62  ;;  %v9662_v6 = vand.u32 4294901760, %v8288_v20  ;;  %5779 = vmatprep.subr.bf16.mxu0 %v8560_v54 }
 0x1d1   : > { %v3639_v16 = vsub.f32 %v8246_v26, %v9651_v35  ;;  %v3527_v63 = vsub.f32 %v8283_v36, %v9657_v37  ;;  %v9658_v35 = vld [vmem:[#allocation16_spill] sm:$0xff]  ;;  %v9661_v19 = vand.u32 4294901760, %v9660_v18  ;;  %vm750_vm7 = vcmp.eq.s32.totalorder %v8592_v11, %v9480_v3  ;;  %v9665_v14 = vld [vmem:[#allocation13_spill] sm:$0xff] }
 0x1d2   : > { %v8611_v17 = vpack.c.bf16 %v9656_v32, %v9654_v60  ;;  %v9659_v26 = vand.u32 4294901760, %v9658_v35  ;;  %v3534_v12 = vsub.f32 %v8288_v20, %v9662_v6  ;;  %v3521_v60 = vand.u32 4294901760, %v3520_v24  ;;  %v9667_v6 = vld [vmem:[#allocation36_spill] sm:$0xff] }
 0x1d3   : > { %5805 = vmatpush3.bf16.msra.mxu1 %v5804_v46  ;;  %v9663_v32 = vand.u32 4294901760, %v8344_v56  ;;  %v9664_v35 = vand.u32 4294901760, %v8359_v7  ;;  %v3647_v53 = vand.u32 4294901760, %v3646_v29  ;;  %v9666_v62 = vand.u32 4294901760, %v9665_v14 }
 0x1d4   : > { %v8621_v0 = vpack.c.bf16 %v9661_v19, %v9659_v26  ;;  %5807 = vmatprep.subr.bf16.mxu1 %v5806_v38  ;;  %v5810_v19 = vpack.c.bf16 %v3633_v51, %v3626_v55  ;;  %v3640_v26 = vand.u32 4294901760, %v3639_v16  ;;  %v9668_v46 = vand.u32 4294901760, %v9667_v6  ;;  %5781 = vmatpush3.bf16.msra.mxu0 %v8611_v17 }
 0x1d5   : > { %v3653_v37 = vsub.f32 %v8344_v56, %v9663_v32  ;;  %v3660_v18 = vsub.f32 %v8359_v7, %v9664_v35  ;;  %v3528_v54 = vand.u32 4294901760, %v3527_v63  ;;  %v3535_v32 = vand.u32 4294901760, %v3534_v12 }
 0x1d6   : > { %v8639_v24 = vpack.c.bf16 %v9668_v46, %v9666_v62  ;;  %v9669_v56 = vand.u32 4294901760, %v8373_v50  ;;  %v9670_v7 = vand.u32 4294901760, %v8378_v2  ;;  %v4318_v38 = vsel %vm750_vm7, 1.0, %v9557_v49  ;;  %5783 = vmatprep.subr.bf16.mxu0 %v8621_v0 }
 0x1d7   : > { %5809 = vmatpush3.bf16.msra.mxu1 %v5808_v8  ;;  %v9671_v55 = vand.u32 4294901760, %v8273_v61  ;;  %v9672_v16 = vand.u32 4294901760, %v8292_v44  ;;  %v5812_v63 = vpack.c.bf16 %v3521_v60, %v3514_v23  ;;  %v3661_v12 = vand.u32 4294901760, %v3660_v18 }
 0x1d8   : > { %v3541_v35 = vsub.f32 %v8373_v50, %v9669_v56  ;;  %v3548_v51 = vsub.f32 %v8378_v2, %v9670_v7  ;;  %v3654_v56 = vand.u32 4294901760, %v3653_v37  ;;  %5811 = vmatprep.subr.bf16.mxu1 %v5810_v19  ;;  %v5814_v14 = vpack.c.bf16 %v3647_v53, %v3640_v26  ;;  %5785 = vmatpush3.bf16.msra.mxu0 %v8639_v24 }
 0x1d9   : > { %v8657_v29 = vpack.c.bf16 %v9672_v16, %v9671_v55  ;;  %v9673_v7 = vand.u32 4294901760, %v8386_v1  ;;  %v9674_v49 = vand.u32 4294901760, %v8398_v48  ;;  %v9675_v8 = vand.u32 4294901760, %v8311_v45 }
 0x1da   : > { %v9676_v61 = vand.u32 4294901760, %v8313_v9  ;;  %v8671_v46 = vsub.f32 %v4318_v38, %v4318_v38  ;;  %v9677_v23 = vand.u32 4294901760, %v8318_v58  ;;  %v9678_v60 = vand.u32 4294901760, %v8320_v52  ;;  %v4522_v58 = vpop.f32.mrb[4].mxu0 }
 0x1db   : > { %v3667_v62 = vsub.f32 %v8386_v1, %v9673_v7  ;;  %v3674_v6 = vsub.f32 %v8398_v48, %v9674_v49  ;;  %v5816_v18 = vpack.c.bf16 %v3535_v32, %v3528_v54  ;;  %v3542_v19 = vand.u32 4294901760, %v3541_v35  ;;  %5787 = vmatprep.subr.bf16.mxu0 %v8657_v29  ;;  %5813 = vmatpush3.bf16.msra.mxu1 %v5812_v63  ;;  %v4523_v63 = vpop.f32.mrb[5].mxu0 }
 0x1dc   : > { %v8669_v44 = vpack.c.bf16 %v9676_v61, %v9675_v8  ;;  %v8678_v37 = vpack.c.bf16 %v9678_v60, %v9677_v23  ;;  %v3549_v26 = vand.u32 4294901760, %v3548_v51  ;;  %v5818_v45 = vpack.c.bf16 %v3661_v12, %v3654_v56  ;;  %5815 = vmatprep.subr.bf16.mxu1 %v5814_v14 }
 0x1dd   : > { %v9679_v9 = vand.u32 4294901760, %v8403_v39  ;;  %v9680_v38 = vand.u32 4294901760, %v8410_v27  ;;  %v3668_v52 = vand.u32 4294901760, %v3667_v62  ;;  %v3675_v16 = vand.u32 4294901760, %v3674_v6 }
 0x1de   : > { %v9681_v54 = vand.u32 4294901760, %v8416_v31  ;;  %v9682_v35 = vand.u32 4294901760, %v8421_v5  ;;  %v3459_v56 = vand.u32 4294901760, %v8671_v46  ;;  %v4524_v12 = vadd.f32 %v4523_v63, %v4522_v58  ;;  %5789 = vmatpush3.bf16.msra.mxu0 %v8669_v44 }
 0x1df   : > { %v3555_v53 = vsub.f32 %v8403_v39, %v9679_v9  ;;  %v3562_v55 = vsub.f32 %v8410_v27, %v9680_v38  ;;  %v9683_v7 = vand.u32 4294901760, %v8329_v30  ;;  %v9684_v14 = vand.u32 4294901760, %v8335_v47  ;;  %5791 = vmatprep.subr.bf16.mxu0 %v8678_v37  ;;  %5817 = vmatpush3.bf16.msra.mxu1 %v5816_v18 }
 0x1e0   : > { %v3681_v32 = vsub.f32 %v8416_v31, %v9681_v54  ;;  %v3688_v51 = vsub.f32 %v8421_v5, %v9682_v35  ;;  %v9685_v49 = vand.u32 4294901760, %v8337_v59  ;;  %v9686_v6 = vand.u32 4294901760, %v8339_v25  ;;  %5819 = vmatprep.subr.bf16.mxu1 %v5818_v45 }
 0x1e1   : > { %v8699_v62 = vpack.c.bf16 %v9684_v14, %v9683_v7  ;;  %v5820_v61 = vpack.c.bf16 %v3549_v26, %v3542_v19  ;;  %v3556_v23 = vand.u32 4294901760, %v3555_v53  ;;  %v3563_v60 = vand.u32 4294901760, %v3562_v55  ;;  %v4557_v19 = vpop.f32.mrb[4].mxu1  ;;  %v9689_v53 = vld [vmem:[#allocation52_spill] sm:$0xff]  ;;  %v9692_v7 = vld [vmem:[#allocation15_spill] sm:$0xff] }
 0x1e2   : > { %v8705_v8 = vpack.c.bf16 %v9686_v6, %v9685_v49  ;;  %v9687_v9 = vand.u32 4294901760, %v8432_v28  ;;  %v9688_v47 = vand.u32 4294901760, %v8441_v42  ;;  %v1524_v59 = vadd.f32 %v4524_v12, %v8423_v57  ;;  %v4558_v26 = vpop.f32.mrb[5].mxu1  ;;  %v9693_v57 = vld [vmem:[#allocation33_spill] sm:$0xff]  ;;  %v9694_v6 = vld [vmem:[#allocation27_spill] sm:$0xff] }
 0x1e3   : > { %v5822_v25 = vpack.c.bf16 %v3675_v16, %v3668_v52  ;;  %v3682_v58 = vand.u32 4294901760, %v3681_v32  ;;  %v3689_v54 = vand.u32 4294901760, %v3688_v51  ;;  %v3460_v18 = vsub.f32 %v8671_v46, %v3459_v56  ;;  %5793 = vmatpush3.bf16.msra.mxu0 %v8699_v62  ;;  %5821 = vmatpush3.bf16.msra.mxu1 %v5820_v61 }
 0x1e4   : > { %v3569_v30 = vsub.f32 %v8432_v28, %v9687_v9  ;;  %v3576_v38 = vsub.f32 %v8441_v42, %v9688_v47  ;;  %v9690_v55 = vand.u32 4294901760, %v9689_v53  ;;  %v9691_v35 = vand.u32 4294901760, %v8363_v34  ;;  %5795 = vmatprep.subr.bf16.mxu0 %v8705_v8 }
 0x1e5   : > { %v5830_v45 = vpack.c.bf16 %v9693_v57, %v9692_v7  ;;  %v4559_v52 = vadd.f32 %v4558_v26, %v4557_v19  ;;  %v5824_v16 = vpack.c.bf16 %v3563_v60, %v3556_v23  ;;  %5823 = vmatprep.subr.bf16.mxu1 %v5822_v25  ;;  %v5826_v12 = vpack.c.bf16 %v3689_v54, %v3682_v58  ;;  %v9695_v23 = vld [vmem:[#allocation25_spill] sm:$0xff]  ;;  %v9704_v25 = vld [vmem:[#allocation30_spill] sm:$0xff]  ;;  %v9705_v54 = vld [vmem:[#allocation39_spill] sm:$0xff] }
 0x1e6   : > { %v8723_v63 = vpack.c.bf16 %v9691_v35, %v9690_v55  ;;  %v3570_v32 = vand.u32 4294901760, %v3569_v30  ;;  %v3577_v51 = vand.u32 4294901760, %v3576_v38  ;;  %v3461_v49 = vand.u32 4294901760, %v3460_v18  ;;  %v9700_v30 = vld [vmem:[#allocation37_spill] sm:$0xff]  ;;  %v9706_v19 = vld [vmem:[#allocation14_spill] sm:$0xff]  ;;  %v9708_v26 = vld [vmem:[#allocation40_spill] sm:$0xff] }
 0x1e7   : > { %v1628_v14 = vadd.f32 %v4559_v52, %v1524_v59  ;;  %v5832_v34 = vpack.c.bf16 %v8050_v41, %v9694_v6  ;;  %5825 = vmatpush3.bf16.msra.mxu1 %v5824_v16  ;;  %v5834_v9 = vpack.c.bf16 %v8064_v21, %v8060_v15  ;;  %v5836_v61 = vpack.c.bf16 %v8075_v13, %v8073_v22  ;;  %v9696_v41 = vld [vmem:[#allocation48_spill] sm:$0xff]  ;;  %v9697_v15 = vld [vmem:[#allocation46_spill] sm:$0xff]  ;;  %v9698_v22 = vld [vmem:[#allocation49_spill] sm:$0xff] }
 0x1e8   : > { %5797 = vmatpush3.bf16.msra.mxu0 %v8723_v63  ;;  %v5828_v47 = vpack.c.bf16 %v3577_v51, %v3570_v32  ;;  %5827 = vmatprep.subr.bf16.mxu1 %v5826_v12  ;;  %v5838_v60 = vpack.c.bf16 %v8101_v40, %v8090_v4  ;;  %v5840_v21 = vpack.c.bf16 %v9697_v15, %v8123_v33  ;;  %v9699_v13 = vld [vmem:[#allocation18_spill] sm:$0xff]  ;;  %v9702_v4 = vand.u32 4294901760, %v9695_v23  ;;  %v9709_v55 = vld [vmem:[#allocation51_spill] sm:$0xff]  ;;  %v9710_v35 = vld [vmem:[#allocation21_spill] sm:$0xff] }
 0x1e9   : > { %5831 = vmatprep.subr.bf16.mxu0 %v5830_v45  ;;  %v5842_v38 = vpack.c.bf16 %v9700_v30, %v9699_v13  ;;  %v9701_v59 = vld [vmem:[#allocation38_spill] sm:$0xff]  ;;  %v5848_v53 = vpack.c.bf16 %v8288_v20, %v8283_v36  ;;  %v5850_v7 = vpack.c.bf16 %v9710_v35, %v9709_v55  ;;  %v5852_v45 = vpack.c.bf16 %v8378_v2, %v8373_v50 }
 0x1ea   : > { %v9703_v40 = vld [vmem:[#allocation22_spill] sm:$0xff]  ;;  %v5854_v52 = vpack.c.bf16 %v8398_v48, %v8386_v1  ;;  %v5856_v32 = vpack.c.bf16 %v8410_v27, %v8403_v39  ;;  %v5858_v50 = vpack.c.bf16 %v8421_v5, %v8416_v31  ;;  %v5860_v48 = vpack.c.bf16 %v8441_v42, %v8432_v28  ;;  %v9712_v27 = vld [vmem:[#allocation53_spill] sm:$0xff]  ;;  %v9715_v28 = vld [vmem:[#allocation55_spill] sm:$0xff] }
 0x1eb   : > { %3462 = vmatmul.mubr.f32.vlgmr.msra.gmra.mrb[18].mxu0 %v3461_v49  ;;  %5829 = vmatpush3.bf16.msra.mxu1 %v5828_v47  ;;  %v5844_v58 = vpack.c.bf16 %v9704_v25, %v9703_v40  ;;  %v9707_v33 = vld [vmem:[#allocation34_spill] sm:$0xff]  ;;  %v9716_v42 = vld [vmem:[#allocation31_spill] sm:$0xff]  ;;  %v9718_v49 = vld [vmem:[#allocation57_spill] sm:$0xff] }
 0x1ec   : > { %5833 = vmatpush3.bf16.msra.mxu0 %v5832_v34  ;;  %3829 = vmatprep.mubr.f32.mxu0 %v9695_v23  ;;  %v5846_v18 = vpack.c.bf16 %v9707_v33, %v9706_v19  ;;  %v9711_v57 = vld [vmem:[#allocation42_spill] sm:$0xff]  ;;  %v9722_v34 = vld [vmem:[#allocation60_spill] sm:$0xff] }
 0x1ed   : > { %5835 = vmatprep.subr.bf16.mxu0 %v5834_v9  ;;  %5863 = vmatprep.subr.bf16.mxu1 %v9696_v41  ;;  %v9713_v5 = vld [vmem:[#allocation54_spill] sm:$0xff]  ;;  %v9723_v9 = vld [vmem:[#allocation61_spill] sm:$0xff] }
 0x1ee   : > { %4339 = vmatmul.mubr.msk.f32.vlgmr.msra.gmra.mrb[18].mxu1 %vm750_vm7, %v9478_v10  ;;  %v4592_v16 = vpop.f32.mrb[6].mxu0  ;;  %v9719_v6 = vld [vmem:[#allocation58_spill] sm:$0xff] }
 0x1ef   : > { %5865 = vmatpush3.bf16.msra.mxu1 %v9698_v22  ;;  %3936 = vmatprep.mubr.f32.mxu1 %v9702_v4  ;;  %v4593_v36 = vpop.f32.mrb[7].mxu0  ;;  %v9728_v30 = vld [vmem:[#allocation50_spill] sm:$0xff] }
 0x1f0   : > { %5837 = vmatpush3.bf16.msra.mxu0 %v5836_v61  ;;  %5867 = vmatprep.subr.bf16.mxu1 %v9701_v59  ;;  %v4594_v20 = vadd.f32 %v4593_v36, %v4592_v16 }
 0x1f1   : > { %5839 = vmatprep.subr.bf16.mxu0 %v5838_v60  ;;  %v4627_v51 = vpop.f32.mrb[6].mxu1  ;;  %v9724_v60 = vld [vmem:[#allocation62_spill] sm:$0xff] }
 0x1f2   : > { %v1740_v2 = vadd.f32 %v4594_v20, %v1628_v14  ;;  %v4628_v1 = vpop.f32.mrb[7].mxu1  ;;  %v9717_v14 = vld [vmem:[#allocation56_spill] sm:$0xff] }
 0x1f3   : > { %5869 = vmatpush3.bf16.msra.mxu1 %v9705_v54  ;;  %v4629_v12 = vadd.f32 %v4628_v1, %v4627_v51 }
 0x1f4   : > { %5841 = vmatpush3.bf16.msra.mxu0 %v5840_v21  ;;  %5871 = vmatprep.subr.bf16.mxu1 %v9708_v26  ;;  %v9726_v21 = vld [vmem:[#allocation64_spill] sm:$0xff] }
 0x1f5   : > { %5843 = vmatprep.subr.bf16.mxu0 %v5842_v38  ;;  %v1972_v39 = vadd.f32 %v4629_v12, %v1740_v2 }
 0x1f7   : > { %5873 = vmatpush3.bf16.msra.mxu1 %v8554_v43 }
 0x1f8   : > { %5845 = vmatpush3.bf16.msra.mxu0 %v5844_v58  ;;  %5875 = vmatprep.subr.bf16.mxu1 %v9711_v57 }
 0x1f9   : > { %5847 = vmatprep.subr.bf16.mxu0 %v5846_v18 }
 0x1fb   : > { %5877 = vmatpush3.bf16.msra.mxu1 %v8611_v17 }
 0x1fc   : > { %5849 = vmatpush3.bf16.msra.mxu0 %v5848_v53  ;;  %5879 = vmatprep.subr.bf16.mxu1 %v8621_v0 }
 0x1fd   : > { %5851 = vmatprep.subr.bf16.mxu0 %v5850_v7 }
 0x1ff   : > { %5881 = vmatpush3.bf16.msra.mxu1 %v8639_v24 }
 0x200   : > { %5853 = vmatpush3.bf16.msra.mxu0 %v5852_v45  ;;  %5883 = vmatprep.subr.bf16.mxu1 %v8657_v29 }
 0x201   : > { %5855 = vmatprep.subr.bf16.mxu0 %v5854_v52 }
 0x203   : > { %5885 = vmatpush3.bf16.msra.mxu1 %v8669_v44 }
 0x204   : > { %5857 = vmatpush3.bf16.msra.mxu0 %v5856_v32  ;;  %5887 = vmatprep.subr.bf16.mxu1 %v8678_v37 }
 0x205   : > { %5859 = vmatprep.subr.bf16.mxu0 %v5858_v50 }
 0x207   : > { %5889 = vmatpush3.bf16.msra.mxu1 %v8699_v62 }
 0x208   : > { %5861 = vmatpush3.bf16.msra.mxu0 %v5860_v48  ;;  %5891 = vmatprep.subr.bf16.mxu1 %v8705_v8 }
 0x209   : > { %5895 = vmatprep.subr.bf16.mxu0 %v9712_v27 }
 0x20b   : > { %3832 = vmatmul.mubr.f32.vlgmr.msra.gmra.mrb[20].mxu0 %v8671_v46  ;;  %5893 = vmatpush3.bf16.msra.mxu1 %v8723_v63  ;;  %v9720_v46 = vld [vmem:[#allocation47_spill] sm:$0xff] }
 0x20c   : > { %5897 = vmatpush3.bf16.msra.mxu0 %v9713_v5  ;;  %4340 = vmatprep.mubr.msk.f32.mxu0 %vm751_vm6, %v9478_v10 }
 0x20d   : > { %5899 = vmatprep.subr.bf16.mxu0 %v9715_v28  ;;  %5927 = vmatprep.subr.bf16.mxu1 %v9696_v41  ;;  %v9725_v41 = vld [vmem:[#allocation63_spill] sm:$0xff] }
 0x20e   : > { %3940 = vmatmul.mubr.f32.vlgmr.msra.gmra.mrb[20].mxu1 %v3459_v56  ;;  %v9721_v56 = vld [vmem:[#allocation59_spill] sm:$0xff]  ;;  %v4662_v47 = vpop.f32.mrb[8].mxu0 }
 0x20f   : > { %5929 = vmatpush3.bf16.msra.mxu1 %v9698_v22  ;;  %4342 = vmatprep.mubr.msk.f32.mxu1 %vm751_vm6, %v9478_v10  ;;  %v4663_v61 = vpop.f32.mrb[9].mxu0 }
 0x210   : > { %5901 = vmatpush3.bf16.msra.mxu0 %v9716_v42  ;;  %5931 = vmatprep.subr.bf16.mxu1 %v9701_v59  ;;  %v4664_v23 = vadd.f32 %v4663_v61, %v4662_v47 }
 0x211   : > { %5903 = vmatprep.subr.bf16.mxu0 %v9717_v14  ;;  %v4697_v15 = vpop.f32.mrb[8].mxu1 }
 0x212   : > { %v4698_v22 = vpop.f32.mrb[9].mxu1 }
 0x213   : > { %5933 = vmatpush3.bf16.msra.mxu1 %v9705_v54  ;;  %v4699_v13 = vadd.f32 %v4698_v22, %v4697_v15 }
 0x214   : > { %5905 = vmatpush3.bf16.msra.mxu0 %v9718_v49  ;;  %5935 = vmatprep.subr.bf16.mxu1 %v9708_v26 }
 0x215   : > { %5907 = vmatprep.subr.bf16.mxu0 %v9719_v6 }
 0x217   : > { %5937 = vmatpush3.bf16.msra.mxu1 %v8554_v43  ;;  %v2110_v43 = vadd.f32 %v4664_v23, %v1972_v39 }
 0x218   : > { %5909 = vmatpush3.bf16.msra.mxu0 %v9720_v46  ;;  %5939 = vmatprep.subr.bf16.mxu1 %v9711_v57 }
 0x219   : > { %5911 = vmatprep.subr.bf16.mxu0 %v9721_v56 }
 0x21b   : > { %5941 = vmatpush3.bf16.msra.mxu1 %v8611_v17  ;;  %v9727_v17 = vld [vmem:[#allocation65_spill] sm:$0xff] }
 0x21c   : > { %5913 = vmatpush3.bf16.msra.mxu0 %v9722_v34  ;;  %5943 = vmatprep.subr.bf16.mxu1 %v8621_v0  ;;  %v2218_v0 = vadd.f32 %v4699_v13, %v2110_v43 }
 0x21d   : > { %5915 = vmatprep.subr.bf16.mxu0 %v9723_v9 }
 0x21f   : > { %5945 = vmatpush3.bf16.msra.mxu1 %v8639_v24 }
 0x220   : > { %5917 = vmatpush3.bf16.msra.mxu0 %v9724_v60  ;;  %5947 = vmatprep.subr.bf16.mxu1 %v8657_v29 }
 0x221   : > { %5919 = vmatprep.subr.bf16.mxu0 %v9725_v41  ;;  %v768_v41 = vld [vmem:[#allocation9] sm:$0xff] }
 0x223   : > { %5949 = vmatpush3.bf16.msra.mxu1 %v8669_v44 }
 0x224   : > { %5921 = vmatpush3.bf16.msra.mxu0 %v9726_v21  ;;  %5951 = vmatprep.subr.bf16.mxu1 %v8678_v37 }
 0x225   : > { %5923 = vmatprep.subr.bf16.mxu0 %v9727_v17 }
 0x227   : > { %5953 = vmatpush3.bf16.msra.mxu1 %v8699_v62 }
 0x228   : > { %5925 = vmatpush3.bf16.msra.mxu0 %v9728_v30  ;;  %5955 = vmatprep.subr.bf16.mxu1 %v8705_v8 }
 0x22b   : > { %4341 = vmatmul.mubr.msk.f32.vlgmr.msra.gmra.mrb[22].mxu0 %vm750_vm7, %v9478_v10  ;;  %5957 = vmatpush3.bf16.msra.mxu1 %v8723_v63 }
 0x22e   : > { %4343 = vmatmul.mubr.msk.f32.vlgmr.msra.gmra.mrb[22].mxu1 %vm750_vm7, %v9478_v10  ;;  %v4732_v24 = vpop.f32.mrb[10].mxu0 }
 0x22f   : > { %v4733_v29 = vpop.f32.mrb[11].mxu0 }
 0x230   : > { %v4734_v44 = vadd.f32 %v4733_v29, %v4732_v24 }
 0x231   : > { %v4767_v38 = vpop.f32.mrb[10].mxu1 }
 0x232   : > { %v2386_v37 = vadd.f32 %v4734_v44, %v2218_v0  ;;  %v4768_v62 = vpop.f32.mrb[11].mxu1 }
 0x233   : > { %v4769_v59 = vadd.f32 %v4768_v62, %v4767_v38 }
 0x235   : > { %v2490_v8 = vadd.f32 %v4769_v59, %v2386_v37 }
 0x252   : > { %v4802_v4 = vpop.f32.mrb[12].mxu0 }
 0x253   : > { %v4803_v40 = vpop.f32.mrb[13].mxu0 }
 0x254   : > { %v4804_v25 = vadd.f32 %v4803_v40, %v4802_v4 }
 0x256   : > { %v2602_v58 = vadd.f32 %v4804_v25, %v2490_v8 }
 0x257   : > { %v4837_v54 = vpop.f32.mrb[12].mxu1 }
 0x258   : > { %v4838_v19 = vpop.f32.mrb[13].mxu1 }
 0x259   : > { %v4839_v63 = vadd.f32 %v4838_v19, %v4837_v54 }
 0x25b   : > { %v2834_v33 = vadd.f32 %v4839_v63, %v2602_v58 }
 0x272   : > { %v4872_v18 = vpop.f32.mrb[14].mxu0 }
 0x273   : > { %v4873_v26 = vpop.f32.mrb[15].mxu0 }
 0x274   : > { %v4874_v3 = vadd.f32 %v4873_v26, %v4872_v18 }
 0x276   : > { %v2972_v10 = vadd.f32 %v4874_v3, %v2834_v33 }
 0x277   : > { %v4907_v11 = vpop.f32.mrb[14].mxu1 }
 0x278   : > { %v4908_v53 = vpop.f32.mrb[15].mxu1 }
 0x279   : > { %v4909_v55 = vadd.f32 %v4908_v53, %v4907_v11 }
 0x27b   : > { %v3080_v35 = vadd.f32 %v4909_v55, %v2972_v10 }
 0x292   : > { %v4942_v7 = vpop.f32.mrb[16].mxu0 }
 0x293   : > { %v4943_v57 = vpop.f32.mrb[17].mxu0 }
 0x294   : > { %v4944_v45 = vadd.f32 %v4943_v57, %v4942_v7 }
 0x296   : > { %v3248_v52 = vadd.f32 %v4944_v45, %v3080_v35 }
 0x297   : > { %v4977_v16 = vpop.f32.mrb[16].mxu1 }
 0x298   : > { %v4978_v36 = vpop.f32.mrb[17].mxu1 }
 0x299   : > { %v4979_v20 = vadd.f32 %v4978_v36, %v4977_v16 }
 0x29b   : > { %v3352_v32 = vadd.f32 %v4979_v20, %v3248_v52 }
 0x2be   : > { %v5012_v50 = vpop.f32.mrb[18].mxu0 }
 0x2bf   : > { %v5013_v2 = vpop.f32.mrb[19].mxu0 }
 0x2c0   : > { %v5014_v51 = vadd.f32 %v5013_v2, %v5012_v50 }
 0x2c1   : > { %v5047_v48 = vpop.f32.mrb[18].mxu1 }
 0x2c2   : > { %v3464_v1 = vadd.f32 %v5014_v51, %v3352_v32  ;;  %v5048_v12 = vpop.f32.mrb[19].mxu1 }
 0x2c3   : > { %v5049_v39 = vadd.f32 %v5048_v12, %v5047_v48 }
 0x2c5   : > { %v3696_v27 = vadd.f32 %v5049_v39, %v3464_v1 }
 0x2de   : > { %v5082_v5 = vpop.f32.mrb[20].mxu0 }
 0x2df   : > { %v5083_v31 = vpop.f32.mrb[21].mxu0 }
 0x2e0   : > { %v5084_v28 = vadd.f32 %v5083_v31, %v5082_v5 }
 0x2e1   : > { %v5117_v14 = vpop.f32.mrb[20].mxu1 }
 0x2e2   : > { %v3834_v42 = vadd.f32 %v5084_v28, %v3696_v27  ;;  %v5118_v49 = vpop.f32.mrb[21].mxu1 }
 0x2e3   : > { %v5119_v6 = vadd.f32 %v5118_v49, %v5117_v14 }
 0x2e5   : > { %v3942_v46 = vadd.f32 %v5119_v6, %v3834_v42 }
 0x2fe   : > { %v5152_v56 = vpop.f32.mrb[22].mxu0 }
 0x2ff   : > { %v5153_v34 = vpop.f32.mrb[23].mxu0 }
 0x300   : > { %v5154_v9 = vadd.f32 %v5153_v34, %v5152_v56 }
 0x301   : > { %v5187_v61 = vpop.f32.mrb[22].mxu1 }
 0x302   : > { %v4110_v47 = vadd.f32 %v5154_v9, %v3942_v46  ;;  %v5188_v23 = vpop.f32.mrb[23].mxu1 }
 0x303   : > { %v5189_v60 = vadd.f32 %v5188_v23, %v5187_v61 }
 0x305   : > { %v4214_v43 = vadd.f32 %v5189_v60, %v4110_v47 }
 0x307   : > { %v4217_v15 = vadd.f32 %v4214_v43, %v768_v41 }
 0x309   : > { %4218 = vst [vmem:[#allocation9] sm:$0xff] %v4217_v15 }
 0x30a   : > { %6089 = shalt.err (!%p6086_p4)
}
 0x30b   : > { %s6090_s26 = scalar_lea.hbm %s8872_s3, 128 }
 0x30c   : > { %p6091_p5 = scmp.ne.s32.totalorder %s8872_s3, %s6090_s26  ;;  %p6096_p6 = scmp.lt.u32.totalorder %s6090_s26, %s8872_s3 }
 0x30e   : > { %p6092_p10 = pnand %p6091_p5, %p5974_p8 }
 0x310   : > { %p6093_p12 = pneg %p6092_p10 }
 0x312   : > { %p6098_p11 = pnand %p6096_p6, %p6093_p12 }
 0x314   : > { %6101 = shalt.err (!%p6098_p11)
}
 0x315   : > { %5963 = dma.vmem_to_hbm [thread:$0]  (%p5974_p8), %s4227_s25, 128, %s8872_s3, [#allocation6]  }
 0x316   : > { %6127 = dma.done.wait (%p5974_p8), [#allocation6], 128  }
 0x317   : > { %6129 = vsyncadd (%p5974_p8), [#allocation6], 4294967168 }
 0x318 PF: > { %p18_p7 = scmp.ge.s32.totalorder %s6196_s16, 4   ;;  %s9729_s12 = smov %s6136_s13 }
 0x319   : > { %s9730_s13 = smov %s6140_s14  ;;  %s9731_s14 = smov %s6206_s19 }
 0x31a   : > { %s9732_s0 = smov %s6196_s16  ;;  %20 = sbr.rel (!%p18_p7) target bundleno = 6 (0x6), region = 82 }
 0x321   :  { %4239 = vsyncpa [#allocation5], 1 }
 0x322   :  { %4241 = vsyncpa [#allocation5 + $0x1], 1 }
 0x323   :  { %4242 = vsyncpa [#allocation8], 1 }
 0x324   :  { %4244 = vsyncpa [#allocation8 + $0x1], 1 }
 0x325   :  { %4245 = vsyncpa [#allocation6], 1 }
 0x326   :  { %4247 = vsyncpa [#allocation6 + $0x1], 1 }

</bundles_post_ra>
